<compile_context>
chip_gen: v7x
topology: tpu7x:2x2x1
jax: 0.10.0
libtpu: 0.0.40
codegen_flags: <defaults>
</compile_context>

<pallas_src>
import functools

import jax
import jax.numpy as jnp
from jax.experimental import pallas as pl
from jax.experimental.pallas import tpu as pltpu


def lstm_model_kernel(x_ref, wih_ref, whh_ref, b_ref, wfc_ref, bfc_ref, out_ref,
                      h_scr, c_scr, gx_scr, *, hidden_pad, t_blk, seq_len):
    """One grid step == one (batch block, time chunk).

    x_ref   : (1, t_blk*Bb, I)  bf16  time chunk (time-major rows, batch inner)
    wih_ref : (I,  4Hp)         bf16  W_ih^T  (gate order i,f,o,g; H padded to Hp)
    whh_ref : (Hp, 4Hp)         bf16  W_hh^T
    b_ref   : (1,  4Hp)         f32   b_ih + b_hh
    wfc_ref : (Hp, O_pad)       f32   BN-folded fc.weight^T
    bfc_ref : (1,  O_pad)       f32   BN-folded fc.bias
    out_ref : (Bb, O_pad)       f32
    h_scr, c_scr : (Bb, Hp)     f32   LSTM state carried across time chunks
    gx_scr  : (t_blk*Bb, 4Hp)   f32   hoisted x-projection (+ bias) for the chunk
    """
    tb = pl.program_id(1)
    Hp = hidden_pad
    Bb = h_scr.shape[0]

    @pl.when(tb == 0)
    def _init():
        h_scr[...] = jnp.zeros_like(h_scr)
        c_scr[...] = jnp.zeros_like(c_scr)

    # Hoisted x-projection: one MXU-efficient matmul per chunk, bias folded in.
    gx_scr[...] = (jnp.dot(x_ref[0], wih_ref[...],
                           preferred_element_type=jnp.float32) + b_ref[...])

    w_hh = whh_ref[...]
    mask_tail = (seq_len % t_blk) != 0          # static
    n_valid = seq_len - tb * t_blk              # only used when mask_tail

    def step(t, carry):
        h, c = carry                            # f32 (Bb, Hp), lives in vregs
        row = pl.multiple_of(t * Bb, Bb)
        gates = gx_scr[pl.ds(row, Bb), :] + jnp.dot(
            h.astype(w_hh.dtype), w_hh, preferred_element_type=jnp.float32)
        # gate columns ordered (i, f, o, g): one sigmoid stream + one tanh stream
        act = 0.5 * (1.0 + jnp.tanh(0.5 * gates[:, :3 * Hp]))   # sigmoid via tanh
        i_g = act[:, 0 * Hp:1 * Hp]
        f_g = act[:, 1 * Hp:2 * Hp]
        o_g = act[:, 2 * Hp:3 * Hp]
        g_g = jnp.tanh(gates[:, 3 * Hp:])
        c_new = f_g * c + i_g * g_g
        h_new = o_g * jnp.tanh(c_new)
        if mask_tail:                           # ragged last chunk: freeze state
            valid = t < n_valid
            h_new = jnp.where(valid, h_new, h)
            c_new = jnp.where(valid, c_new, c)
        return h_new, c_new

    h, c = jax.lax.fori_loop(0, t_blk, step, (h_scr[...], c_scr[...]),
                             unroll=min(8, t_blk))
    h_scr[...] = h
    c_scr[...] = c

    @pl.when(tb == pl.num_programs(1) - 1)
    def _finalize():
        # BatchNorm (eval) folded into wfc/bfc in the wrapper; Dropout == identity.
        out_ref[...] = (jnp.dot(h, wfc_ref[...], preferred_element_type=jnp.float32)
                        + bfc_ref[...])


def _round_up(n, m):
    return (n + m - 1) // m * m


_GATE_ORDER = (0, 1, 3, 2)          # PyTorch (i, f, g, o)  ->  kernel (i, f, o, g)
_VMEM_BUDGET = 20 * 1024 * 1024     # planning budget for the time chunk
_VMEM_LIMIT = 48 * 1024 * 1024      # scoped VMEM limit (safe on v5e/v6e/v7x)
_MAX_T_BLK = 512


def _choose_time_block(T, b_blk, input_size, hidden_pad, o_pad):
    """Largest time chunk that fits the VMEM budget (weights counted 2x = worst case)."""
    Hp = hidden_pad
    fixed = 2 * (input_size * 4 * Hp * 2 + Hp * 4 * Hp * 2 + 4 * Hp * 4
                 + Hp * o_pad * 4 + o_pad * 4) \
            + 2 * b_blk * Hp * 4 + 2 * b_blk * o_pad * 4
    per_t = 2 * b_blk * input_size * 2 + b_blk * 4 * Hp * 4   # x (bf16, 2 bufs) + gx (f32)
    avail = max(_VMEM_BUDGET - fixed, per_t)
    return int(max(1, min(T, _MAX_T_BLK, avail // per_t)))


def lstm_model_forward(x, params, *, hidden_size, output_size,
                       compute_dtype=jnp.bfloat16, eps=1e-5):
    """x: (B, T, I) float32 (batch_first, as in the PyTorch module). Eval-mode forward."""
    (w_ih, w_hh, b_ih, b_hh, gamma, beta, rmean, rvar, w_fc, b_fc) = params
    B, T, I = x.shape
    H, O = hidden_size, output_size

    Hp = _round_up(H, 128)          # lane-aligned hidden (padded units stay exactly 0)
    O_pad = _round_up(O, 128)       # lane-dense output store (sliced off below)

    # batch blocking: one block (>=8 rows) or two "parallel" blocks (v7x megacore)
    if B > 8:
        b_blk = _round_up((B + 1) // 2, 8)
        n_b = 2
    else:
        b_blk, n_b = 8, 1
    B_pad = n_b * b_blk

    # ---- one-time wrapper-side parameter folding / padding (cheap XLA ops) ----
    b_sum = (b_ih + b_hh).astype(jnp.float32)
    w_ih_p = jnp.zeros((I, 4 * Hp), jnp.float32)
    w_hh_p = jnp.zeros((Hp, 4 * Hp), jnp.float32)
    b_p = jnp.zeros((1, 4 * Hp), jnp.float32)
    for slot, gi in enumerate(_GATE_ORDER):
        w_ih_p = w_ih_p.at[:, slot * Hp:slot * Hp + H].set(w_ih[gi * H:(gi + 1) * H, :].T)
        w_hh_p = w_hh_p.at[:H, slot * Hp:slot * Hp + H].set(w_hh[gi * H:(gi + 1) * H, :].T)
        b_p = b_p.at[0, slot * Hp:slot * Hp + H].set(b_sum[gi * H:(gi + 1) * H])
    w_ih_p = w_ih_p.astype(compute_dtype)
    w_hh_p = w_hh_p.astype(compute_dtype)

    # eval-mode BatchNorm folded into the FC (numerically identical in eval)
    a = gamma * jax.lax.rsqrt(rvar + eps)
    w_fc_fold = a[:, None] * w_fc.T                       # (H, O)
    b_fc_fold = b_fc + (beta - rmean * a) @ w_fc.T        # (O,)
    w_fc_p = jnp.zeros((Hp, O_pad), jnp.float32).at[:H, :O].set(w_fc_fold)
    b_fc_p = jnp.zeros((1, O_pad), jnp.float32).at[0, :O].set(b_fc_fold)

    # time chunking (VMEM-budget aware) + bf16, time-major, (batch-block, time*batch) layout
    t_blk = _choose_time_block(T, b_blk, I, Hp, O_pad)
    n_t = pl.cdiv(T, t_blk)
    T_pad = n_t * t_blk
    x_tm = jnp.transpose(x, (1, 0, 2))                                   # (T, B, I)
    x_tm = jnp.pad(x_tm, ((0, T_pad - T), (0, B_pad - B), (0, 0)))       # (Tp, Bp, I)
    x_arr = (x_tm.reshape(T_pad, n_b, b_blk, I)
                  .transpose(1, 0, 2, 3)
                  .reshape(n_b, T_pad * b_blk, I)
                  .astype(compute_dtype))                                # (n_b, Tp*Bb, I)

    kernel = functools.partial(lstm_model_kernel,
                               hidden_pad=Hp, t_blk=t_blk, seq_len=T)
    inv = lambda bb, tb: (0, 0)   # grid-invariant weights stay resident

    def call(single_buffer_weights):
        wkw = ({"pipeline_mode": pl.Buffered(1)} if single_buffer_weights else {})
        return pl.pallas_call(
            kernel,
            out_shape=jax.ShapeDtypeStruct((B_pad, O_pad), jnp.float32),
            grid_spec=pltpu.PrefetchScalarGridSpec(
                num_scalar_prefetch=0,
                grid=(n_b, n_t),
                in_specs=[
                    pl.BlockSpec((1, t_blk * b_blk, I), lambda bb, tb: (bb, tb, 0)),
                    pl.BlockSpec((I, 4 * Hp), inv, **wkw),
                    pl.BlockSpec((Hp, 4 * Hp), inv, **wkw),
                    pl.BlockSpec((1, 4 * Hp), inv, **wkw),
                    pl.BlockSpec((Hp, O_pad), inv, **wkw),
                    pl.BlockSpec((1, O_pad), inv, **wkw),
                ],
                out_specs=pl.BlockSpec((b_blk, O_pad), lambda bb, tb: (bb, 0)),
                scratch_shapes=[
                    pltpu.VMEM((b_blk, Hp), jnp.float32),               # h carry
                    pltpu.VMEM((b_blk, Hp), jnp.float32),               # c carry
                    pltpu.VMEM((t_blk * b_blk, 4 * Hp), jnp.float32),   # x-projection
                ],
            ),
            compiler_params=pltpu.CompilerParams(
                dimension_semantics=("parallel", "arbitrary"),
                vmem_limit_bytes=_VMEM_LIMIT),
        )(x_arr, w_ih_p, w_hh_p, b_p, w_fc_p, b_fc_p)

    try:
        out = call(True)      # single-buffer the grid-invariant weights
    except Exception:
        out = call(False)     # fallback: default double-buffering
    return out[:B, :O]


def make_params(key, input_size, hidden_size, output_size):
    """Deterministic synthetic parameters in PyTorch layout (nn.LSTM / BN1d / Linear)."""
    H, I, O = hidden_size, input_size, output_size
    k = jax.random.split(key, 6)
    s = 1.0 / jnp.sqrt(H)
    w_ih = jax.random.uniform(k[0], (4 * H, I), jnp.float32, -s, s)   # lstm.weight_ih_l0
    w_hh = jax.random.uniform(k[1], (4 * H, H), jnp.float32, -s, s)   # lstm.weight_hh_l0
    b_ih = jax.random.uniform(k[2], (4 * H,), jnp.float32, -s, s)
    b_hh = jax.random.uniform(k[3], (4 * H,), jnp.float32, -s, s)
    w_fc = jax.random.uniform(k[4], (O, H), jnp.float32, -s, s)       # fc.weight
    b_fc = jax.random.uniform(k[5], (O,), jnp.float32, -s, s)         # fc.bias
    gamma = jnp.ones((H,), jnp.float32)      # batch_norm.weight
    beta = jnp.zeros((H,), jnp.float32)      # batch_norm.bias
    rmean = jnp.zeros((H,), jnp.float32)     # running_mean
    rvar = jnp.ones((H,), jnp.float32)       # running_var
    return (w_ih, w_hh, b_ih, b_hh, gamma, beta, rmean, rvar, w_fc, b_fc)


def reference_forward(x, params, *, hidden_size, compute_dtype=jnp.float32, eps=1e-5):
    """Pure-JAX reference of the PyTorch eval-mode forward.

    compute_dtype=bf16 mirrors the kernel's operand rounding (split x/h matmuls,
    f32 accumulation); compute_dtype=f32 is the full-precision semantic target.
    """
    (w_ih, w_hh, b_ih, b_hh, gamma, beta, rmean, rvar, w_fc, b_fc) = params
    B, T, I = x.shape
    H = hidden_size
    wi = w_ih.T.astype(compute_dtype)              # (I, 4H)
    wh = w_hh.T.astype(compute_dtype)              # (H, 4H)
    b = (b_ih + b_hh)[None, :].astype(jnp.float32)
    h = jnp.zeros((B, H), jnp.float32)
    c = jnp.zeros((B, H), jnp.float32)
    for t in range(T):
        gx = jnp.dot(x[:, t, :].astype(compute_dtype), wi,
                     preferred_element_type=jnp.float32) + b
        gates = gx + jnp.dot(h.astype(compute_dtype), wh,
                             preferred_element_type=jnp.float32)
        i_g = jax.nn.sigmoid(gates[:, 0 * H:1 * H])
        f_g = jax.nn.sigmoid(gates[:, 1 * H:2 * H])
        g_g = jnp.tanh(gates[:, 2 * H:3 * H])
        o_g = jax.nn.sigmoid(gates[:, 3 * H:4 * H])
        c = f_g * c + i_g * g_g
        h = o_g * jnp.tanh(c)
    h_bn = (h - rmean) * jax.lax.rsqrt(rvar + eps) * gamma + beta
    return h_bn @ w_fc.T + b_fc


if __name__ == "__main__":
    B, T = 4, 8
    input_size, hidden_size, output_size = 8, 32, 4

    key = jax.random.PRNGKey(0)
    kx, kp = jax.random.split(key)
    x = jax.random.normal(kx, (B, T, input_size), jnp.float32)
    params = make_params(kp, input_size, hidden_size, output_size)

    out = lstm_model_forward(x, params,
                             hidden_size=hidden_size, output_size=output_size)
    out = jax.block_until_ready(out)
    assert out.shape == (B, output_size)

    # Tight check vs a reference using the SAME bf16 operand rounding as the kernel.
    ref_matched = reference_forward(x, params, hidden_size=hidden_size,
                                    compute_dtype=jnp.bfloat16)
    assert jnp.allclose(out, ref_matched, rtol=2e-3, atol=2e-3), \
        "mismatch vs matched-precision reference"

    # Loose semantic check vs the full-f32 PyTorch eval-mode forward
    # (kernel uses bf16 matmul operands, so allow bf16-level error).
    ref_f32 = reference_forward(x, params, hidden_size=hidden_size,
                                compute_dtype=jnp.float32)
    assert jnp.allclose(out, ref_f32, rtol=1e-1, atol=1e-1), \
        "mismatch vs f32 reference"

    print("KERNEL_OK")
</pallas_src>

<mosaic_0001>
module attributes {stable_mosaic.version = 11 : i64} {
  func.func @lstm_model_kernel(%arg0: i32, %arg1: i32, %arg2: memref<1x64x8xbf16, #tpu.memory_space<vmem>>, %arg3: memref<8x512xbf16, #tpu.memory_space<vmem>>, %arg4: memref<128x512xbf16, #tpu.memory_space<vmem>>, %arg5: memref<1x512xf32, #tpu.memory_space<vmem>>, %arg6: memref<128x128xf32, #tpu.memory_space<vmem>>, %arg7: memref<1x128xf32, #tpu.memory_space<vmem>>, %arg8: memref<8x128xf32, #tpu.memory_space<vmem>>, %arg9: memref<8x128xf32, #tpu.memory_space<vmem>>, %arg10: memref<8x128xf32, #tpu.memory_space<vmem>>, %arg11: memref<64x512xf32, #tpu.memory_space<vmem>>) attributes {dimension_semantics = [#tpu.dimension_semantics<parallel>, #tpu.dimension_semantics<arbitrary>], iteration_bounds = array<i64: 1, 1>, scalar_prefetch = 0 : i64, scratch_operands = 3 : i64, tpu.core_type = #tpu.core_type<tc>, window_params = [{transform_indices = @transform_0, window_bounds = array<i64: 1, 64, 8>}, {pipeline_mode = #tpu.pipeline_mode<synchronous>, transform_indices = @transform_1, window_bounds = array<i64: 8, 512>}, {pipeline_mode = #tpu.pipeline_mode<synchronous>, transform_indices = @transform_2, window_bounds = array<i64: 128, 512>}, {pipeline_mode = #tpu.pipeline_mode<synchronous>, transform_indices = @transform_3, window_bounds = array<i64: 1, 512>}, {pipeline_mode = #tpu.pipeline_mode<synchronous>, transform_indices = @transform_4, window_bounds = array<i64: 128, 128>}, {pipeline_mode = #tpu.pipeline_mode<synchronous>, transform_indices = @transform_5, window_bounds = array<i64: 1, 128>}, {transform_indices = @transform_6, window_bounds = array<i64: 8, 128>}]} {
    %c0_i32 = arith.constant 0 : i32
    %0 = arith.cmpi eq, %arg1, %c0_i32 : i32
    %1 = arith.extui %0 : i1 to i32
    %c0_i32_0 = arith.constant 0 : i32
    %2 = arith.cmpi ne, %1, %c0_i32_0 : i32
    scf.if %2 {
      %cst_70 = arith.constant 0.000000e+00 : f32
      %219 = vector.broadcast %cst_70 : f32 to vector<8x128xf32>
      %c0_71 = arith.constant 0 : index
      %c0_72 = arith.constant 0 : index
      %220 = vector.load %arg9[%c0_71, %c0_72] : memref<8x128xf32, #tpu.memory_space<vmem>>, vector<8x128xf32>
      tpu.vector_store %arg9[%c0_71, %c0_72], %219 {strides = array<i32>} : memref<8x128xf32, #tpu.memory_space<vmem>>, vector<8x128xf32>,
      %cst_73 = arith.constant 0.000000e+00 : f32
      %221 = vector.broadcast %cst_73 : f32 to vector<8x128xf32>
      %c0_74 = arith.constant 0 : index
      %c0_75 = arith.constant 0 : index
      %222 = vector.load %arg10[%c0_74, %c0_75] : memref<8x128xf32, #tpu.memory_space<vmem>>, vector<8x128xf32>
      tpu.vector_store %arg10[%c0_74, %c0_75], %221 {strides = array<i32>} : memref<8x128xf32, #tpu.memory_space<vmem>>, vector<8x128xf32>,
    } else {
    }
    %c0 = arith.constant 0 : index
    %c0_1 = arith.constant 0 : index
    %c0_2 = arith.constant 0 : index
    %3 = vector.load %arg2[%c0, %c0_1, %c0_2] : memref<1x64x8xbf16, #tpu.memory_space<vmem>>, vector<1x64x8xbf16>
    %4 = vector.shape_cast %3 : vector<1x64x8xbf16> to vector<64x8xbf16>
    %c0_3 = arith.constant 0 : index
    %c0_4 = arith.constant 0 : index
    %5 = vector.load %arg3[%c0_3, %c0_4] : memref<8x512xbf16, #tpu.memory_space<vmem>>, vector<8x512xbf16>
    %cst = arith.constant dense<0.000000e+00> : vector<64x512xf32>
    %6 = tpu.matmul %4, %5, %cst {dimension_numbers = #tpu.dot_dimension_numbers<[1], [0], [0], [1], [0, 0, 1, 1], [], []>} : vector<64x8xbf16>, vector<8x512xbf16>, vector<64x512xf32> -> vector<64x512xf32>
    %c0_5 = arith.constant 0 : index
    %c0_6 = arith.constant 0 : index
    %7 = vector.load %arg5[%c0_5, %c0_6] : memref<1x512xf32, #tpu.memory_space<vmem>>, vector<1x512xf32>
    %8 = vector.broadcast %7 : vector<1x512xf32> to vector<64x512xf32>
    %9 = arith.addf %6, %8 : vector<64x512xf32>
    %c0_7 = arith.constant 0 : index
    %c0_8 = arith.constant 0 : index
    %10 = vector.load %arg11[%c0_7, %c0_8] : memref<64x512xf32, #tpu.memory_space<vmem>>, vector<64x512xf32>
    tpu.vector_store %arg11[%c0_7, %c0_8], %9 {strides = array<i32>} : memref<64x512xf32, #tpu.memory_space<vmem>>, vector<64x512xf32>,
    %c0_9 = arith.constant 0 : index
    %c0_10 = arith.constant 0 : index
    %11 = vector.load %arg4[%c0_9, %c0_10] : memref<128x512xbf16, #tpu.memory_space<vmem>>, vector<128x512xbf16>
    %c0_11 = arith.constant 0 : index
    %c0_12 = arith.constant 0 : index
    %12 = vector.load %arg9[%c0_11, %c0_12] : memref<8x128xf32, #tpu.memory_space<vmem>>, vector<8x128xf32>
    %c0_13 = arith.constant 0 : index
    %c0_14 = arith.constant 0 : index
    %13 = vector.load %arg10[%c0_13, %c0_14] : memref<8x128xf32, #tpu.memory_space<vmem>>, vector<8x128xf32>
    %c0_i32_15 = arith.constant 0 : i32
    %c8_i32 = arith.constant 8 : i32
    %14 = arith.muli %c0_i32_15, %c8_i32 : i32
    %15 = tpu.assume_multiple %14, 8 : i32
    %16 = arith.index_cast %15 : i32 to index
    %c0_16 = arith.constant 0 : index
    %17 = vector.load %arg11[%16, %c0_16] : memref<64x512xf32, #tpu.memory_space<vmem>>, vector<8x512xf32>
    %18 = arith.truncf %12 : vector<8x128xf32> to vector<8x128xbf16>
    %cst_17 = arith.constant dense<0.000000e+00> : vector<8x512xf32>
    %19 = tpu.matmul %18, %11, %cst_17 {dimension_numbers = #tpu.dot_dimension_numbers<[1], [0], [0], [1], [0, 0, 1, 1], [], []>} : vector<8x128xbf16>, vector<128x512xbf16>, vector<8x512xf32> -> vector<8x512xf32>
    %20 = arith.addf %17, %19 : vector<8x512xf32>
    %21 = vector.extract_strided_slice %20 {offsets = [0, 0], sizes = [8, 384], strides = [1, 1]} : vector<8x512xf32> to vector<8x384xf32>
    %cst_18 = arith.constant 5.000000e-01 : f32
    %22 = vector.broadcast %cst_18 : f32 to vector<8x384xf32>
    %23 = arith.mulf %22, %21 : vector<8x384xf32>
    %24 = math.tanh %23 : vector<8x384xf32>
    %cst_19 = arith.constant 1.000000e+00 : f32
    %25 = vector.broadcast %cst_19 : f32 to vector<8x384xf32>
    %26 = arith.addf %25, %24 : vector<8x384xf32>
    %cst_20 = arith.constant 5.000000e-01 : f32
    %27 = vector.broadcast %cst_20 : f32 to vector<8x384xf32>
    %28 = arith.mulf %27, %26 : vector<8x384xf32>
    %29 = vector.extract_strided_slice %28 {offsets = [0, 0], sizes = [8, 128], strides = [1, 1]} : vector<8x384xf32> to vector<8x128xf32>
    %30 = vector.extract_strided_slice %28 {offsets = [0, 128], sizes = [8, 128], strides = [1, 1]} : vector<8x384xf32> to vector<8x128xf32>
    %31 = vector.extract_strided_slice %28 {offsets = [0, 256], sizes = [8, 128], strides = [1, 1]} : vector<8x384xf32> to vector<8x128xf32>
    %32 = vector.extract_strided_slice %20 {offsets = [0, 384], sizes = [8, 128], strides = [1, 1]} : vector<8x512xf32> to vector<8x128xf32>
    %33 = math.tanh %32 : vector<8x128xf32>
    %34 = arith.mulf %30, %13 : vector<8x128xf32>
    %35 = arith.mulf %29, %33 : vector<8x128xf32>
    %36 = arith.addf %34, %35 : vector<8x128xf32>
    %37 = math.tanh %36 : vector<8x128xf32>
    %38 = arith.mulf %31, %37 : vector<8x128xf32>
    %c1_i32 = arith.constant 1 : i32
    %c8_i32_21 = arith.constant 8 : i32
    %39 = arith.muli %c1_i32, %c8_i32_21 : i32
    %40 = tpu.assume_multiple %39, 8 : i32
    %41 = arith.index_cast %40 : i32 to index
    %c0_22 = arith.constant 0 : index
    %42 = vector.load %arg11[%41, %c0_22] : memref<64x512xf32, #tpu.memory_space<vmem>>, vector<8x512xf32>
    %43 = arith.truncf %38 : vector<8x128xf32> to vector<8x128xbf16>
    %cst_23 = arith.constant dense<0.000000e+00> : vector<8x512xf32>
    %44 = tpu.matmul %43, %11, %cst_23 {dimension_numbers = #tpu.dot_dimension_numbers<[1], [0], [0], [1], [0, 0, 1, 1], [], []>} : vector<8x128xbf16>, vector<128x512xbf16>, vector<8x512xf32> -> vector<8x512xf32>
    %45 = arith.addf %42, %44 : vector<8x512xf32>
    %46 = vector.extract_strided_slice %45 {offsets = [0, 0], sizes = [8, 384], strides = [1, 1]} : vector<8x512xf32> to vector<8x384xf32>
    %cst_24 = arith.constant 5.000000e-01 : f32
    %47 = vector.broadcast %cst_24 : f32 to vector<8x384xf32>
    %48 = arith.mulf %47, %46 : vector<8x384xf32>
    %49 = math.tanh %48 : vector<8x384xf32>
    %cst_25 = arith.constant 1.000000e+00 : f32
    %50 = vector.broadcast %cst_25 : f32 to vector<8x384xf32>
    %51 = arith.addf %50, %49 : vector<8x384xf32>
    %cst_26 = arith.constant 5.000000e-01 : f32
    %52 = vector.broadcast %cst_26 : f32 to vector<8x384xf32>
    %53 = arith.mulf %52, %51 : vector<8x384xf32>
    %54 = vector.extract_strided_slice %53 {offsets = [0, 0], sizes = [8, 128], strides = [1, 1]} : vector<8x384xf32> to vector<8x128xf32>
    %55 = vector.extract_strided_slice %53 {offsets = [0, 128], sizes = [8, 128], strides = [1, 1]} : vector<8x384xf32> to vector<8x128xf32>
    %56 = vector.extract_strided_slice %53 {offsets = [0, 256], sizes = [8, 128], strides = [1, 1]} : vector<8x384xf32> to vector<8x128xf32>
    %57 = vector.extract_strided_slice %45 {offsets = [0, 384], sizes = [8, 128], strides = [1, 1]} : vector<8x512xf32> to vector<8x128xf32>
    %58 = math.tanh %57 : vector<8x128xf32>
    %59 = arith.mulf %55, %36 : vector<8x128xf32>
    %60 = arith.mulf %54, %58 : vector<8x128xf32>
    %61 = arith.addf %59, %60 : vector<8x128xf32>
    %62 = math.tanh %61 : vector<8x128xf32>
    %63 = arith.mulf %56, %62 : vector<8x128xf32>
    %c2_i32 = arith.constant 2 : i32
    %c8_i32_27 = arith.constant 8 : i32
    %64 = arith.muli %c2_i32, %c8_i32_27 : i32
    %65 = tpu.assume_multiple %64, 8 : i32
    %66 = arith.index_cast %65 : i32 to index
    %c0_28 = arith.constant 0 : index
    %67 = vector.load %arg11[%66, %c0_28] : memref<64x512xf32, #tpu.memory_space<vmem>>, vector<8x512xf32>
    %68 = arith.truncf %63 : vector<8x128xf32> to vector<8x128xbf16>
    %cst_29 = arith.constant dense<0.000000e+00> : vector<8x512xf32>
    %69 = tpu.matmul %68, %11, %cst_29 {dimension_numbers = #tpu.dot_dimension_numbers<[1], [0], [0], [1], [0, 0, 1, 1], [], []>} : vector<8x128xbf16>, vector<128x512xbf16>, vector<8x512xf32> -> vector<8x512xf32>
    %70 = arith.addf %67, %69 : vector<8x512xf32>
    %71 = vector.extract_strided_slice %70 {offsets = [0, 0], sizes = [8, 384], strides = [1, 1]} : vector<8x512xf32> to vector<8x384xf32>
    %cst_30 = arith.constant 5.000000e-01 : f32
    %72 = vector.broadcast %cst_30 : f32 to vector<8x384xf32>
    %73 = arith.mulf %72, %71 : vector<8x384xf32>
    %74 = math.tanh %73 : vector<8x384xf32>
    %cst_31 = arith.constant 1.000000e+00 : f32
    %75 = vector.broadcast %cst_31 : f32 to vector<8x384xf32>
    %76 = arith.addf %75, %74 : vector<8x384xf32>
    %cst_32 = arith.constant 5.000000e-01 : f32
    %77 = vector.broadcast %cst_32 : f32 to vector<8x384xf32>
    %78 = arith.mulf %77, %76 : vector<8x384xf32>
    %79 = vector.extract_strided_slice %78 {offsets = [0, 0], sizes = [8, 128], strides = [1, 1]} : vector<8x384xf32> to vector<8x128xf32>
    %80 = vector.extract_strided_slice %78 {offsets = [0, 128], sizes = [8, 128], strides = [1, 1]} : vector<8x384xf32> to vector<8x128xf32>
    %81 = vector.extract_strided_slice %78 {offsets = [0, 256], sizes = [8, 128], strides = [1, 1]} : vector<8x384xf32> to vector<8x128xf32>
    %82 = vector.extract_strided_slice %70 {offsets = [0, 384], sizes = [8, 128], strides = [1, 1]} : vector<8x512xf32> to vector<8x128xf32>
    %83 = math.tanh %82 : vector<8x128xf32>
    %84 = arith.mulf %80, %61 : vector<8x128xf32>
    %85 = arith.mulf %79, %83 : vector<8x128xf32>
    %86 = arith.addf %84, %85 : vector<8x128xf32>
    %87 = math.tanh %86 : vector<8x128xf32>
    %88 = arith.mulf %81, %87 : vector<8x128xf32>
    %c3_i32 = arith.constant 3 : i32
    %c8_i32_33 = arith.constant 8 : i32
    %89 = arith.muli %c3_i32, %c8_i32_33 : i32
    %90 = tpu.assume_multiple %89, 8 : i32
    %91 = arith.index_cast %90 : i32 to index
    %c0_34 = arith.constant 0 : index
    %92 = vector.load %arg11[%91, %c0_34] : memref<64x512xf32, #tpu.memory_space<vmem>>, vector<8x512xf32>
    %93 = arith.truncf %88 : vector<8x128xf32> to vector<8x128xbf16>
    %cst_35 = arith.constant dense<0.000000e+00> : vector<8x512xf32>
    %94 = tpu.matmul %93, %11, %cst_35 {dimension_numbers = #tpu.dot_dimension_numbers<[1], [0], [0], [1], [0, 0, 1, 1], [], []>} : vector<8x128xbf16>, vector<128x512xbf16>, vector<8x512xf32> -> vector<8x512xf32>
    %95 = arith.addf %92, %94 : vector<8x512xf32>
    %96 = vector.extract_strided_slice %95 {offsets = [0, 0], sizes = [8, 384], strides = [1, 1]} : vector<8x512xf32> to vector<8x384xf32>
    %cst_36 = arith.constant 5.000000e-01 : f32
    %97 = vector.broadcast %cst_36 : f32 to vector<8x384xf32>
    %98 = arith.mulf %97, %96 : vector<8x384xf32>
    %99 = math.tanh %98 : vector<8x384xf32>
    %cst_37 = arith.constant 1.000000e+00 : f32
    %100 = vector.broadcast %cst_37 : f32 to vector<8x384xf32>
    %101 = arith.addf %100, %99 : vector<8x384xf32>
    %cst_38 = arith.constant 5.000000e-01 : f32
    %102 = vector.broadcast %cst_38 : f32 to vector<8x384xf32>
    %103 = arith.mulf %102, %101 : vector<8x384xf32>
    %104 = vector.extract_strided_slice %103 {offsets = [0, 0], sizes = [8, 128], strides = [1, 1]} : vector<8x384xf32> to vector<8x128xf32>
    %105 = vector.extract_strided_slice %103 {offsets = [0, 128], sizes = [8, 128], strides = [1, 1]} : vector<8x384xf32> to vector<8x128xf32>
    %106 = vector.extract_strided_slice %103 {offsets = [0, 256], sizes = [8, 128], strides = [1, 1]} : vector<8x384xf32> to vector<8x128xf32>
    %107 = vector.extract_strided_slice %95 {offsets = [0, 384], sizes = [8, 128], strides = [1, 1]} : vector<8x512xf32> to vector<8x128xf32>
    %108 = math.tanh %107 : vector<8x128xf32>
    %109 = arith.mulf %105, %86 : vector<8x128xf32>
    %110 = arith.mulf %104, %108 : vector<8x128xf32>
    %111 = arith.addf %109, %110 : vector<8x128xf32>
    %112 = math.tanh %111 : vector<8x128xf32>
    %113 = arith.mulf %106, %112 : vector<8x128xf32>
    %c4_i32 = arith.constant 4 : i32
    %c8_i32_39 = arith.constant 8 : i32
    %114 = arith.muli %c4_i32, %c8_i32_39 : i32
    %115 = tpu.assume_multiple %114, 8 : i32
    %116 = arith.index_cast %115 : i32 to index
    %c0_40 = arith.constant 0 : index
    %117 = vector.load %arg11[%116, %c0_40] : memref<64x512xf32, #tpu.memory_space<vmem>>, vector<8x512xf32>
    %118 = arith.truncf %113 : vector<8x128xf32> to vector<8x128xbf16>
    %cst_41 = arith.constant dense<0.000000e+00> : vector<8x512xf32>
    %119 = tpu.matmul %118, %11, %cst_41 {dimension_numbers = #tpu.dot_dimension_numbers<[1], [0], [0], [1], [0, 0, 1, 1], [], []>} : vector<8x128xbf16>, vector<128x512xbf16>, vector<8x512xf32> -> vector<8x512xf32>
    %120 = arith.addf %117, %119 : vector<8x512xf32>
    %121 = vector.extract_strided_slice %120 {offsets = [0, 0], sizes = [8, 384], strides = [1, 1]} : vector<8x512xf32> to vector<8x384xf32>
    %cst_42 = arith.constant 5.000000e-01 : f32
    %122 = vector.broadcast %cst_42 : f32 to vector<8x384xf32>
    %123 = arith.mulf %122, %121 : vector<8x384xf32>
    %124 = math.tanh %123 : vector<8x384xf32>
    %cst_43 = arith.constant 1.000000e+00 : f32
    %125 = vector.broadcast %cst_43 : f32 to vector<8x384xf32>
    %126 = arith.addf %125, %124 : vector<8x384xf32>
    %cst_44 = arith.constant 5.000000e-01 : f32
    %127 = vector.broadcast %cst_44 : f32 to vector<8x384xf32>
    %128 = arith.mulf %127, %126 : vector<8x384xf32>
    %129 = vector.extract_strided_slice %128 {offsets = [0, 0], sizes = [8, 128], strides = [1, 1]} : vector<8x384xf32> to vector<8x128xf32>
    %130 = vector.extract_strided_slice %128 {offsets = [0, 128], sizes = [8, 128], strides = [1, 1]} : vector<8x384xf32> to vector<8x128xf32>
    %131 = vector.extract_strided_slice %128 {offsets = [0, 256], sizes = [8, 128], strides = [1, 1]} : vector<8x384xf32> to vector<8x128xf32>
    %132 = vector.extract_strided_slice %120 {offsets = [0, 384], sizes = [8, 128], strides = [1, 1]} : vector<8x512xf32> to vector<8x128xf32>
    %133 = math.tanh %132 : vector<8x128xf32>
    %134 = arith.mulf %130, %111 : vector<8x128xf32>
    %135 = arith.mulf %129, %133 : vector<8x128xf32>
    %136 = arith.addf %134, %135 : vector<8x128xf32>
    %137 = math.tanh %136 : vector<8x128xf32>
    %138 = arith.mulf %131, %137 : vector<8x128xf32>
    %c5_i32 = arith.constant 5 : i32
    %c8_i32_45 = arith.constant 8 : i32
    %139 = arith.muli %c5_i32, %c8_i32_45 : i32
    %140 = tpu.assume_multiple %139, 8 : i32
    %141 = arith.index_cast %140 : i32 to index
    %c0_46 = arith.constant 0 : index
    %142 = vector.load %arg11[%141, %c0_46] : memref<64x512xf32, #tpu.memory_space<vmem>>, vector<8x512xf32>
    %143 = arith.truncf %138 : vector<8x128xf32> to vector<8x128xbf16>
    %cst_47 = arith.constant dense<0.000000e+00> : vector<8x512xf32>
    %144 = tpu.matmul %143, %11, %cst_47 {dimension_numbers = #tpu.dot_dimension_numbers<[1], [0], [0], [1], [0, 0, 1, 1], [], []>} : vector<8x128xbf16>, vector<128x512xbf16>, vector<8x512xf32> -> vector<8x512xf32>
    %145 = arith.addf %142, %144 : vector<8x512xf32>
    %146 = vector.extract_strided_slice %145 {offsets = [0, 0], sizes = [8, 384], strides = [1, 1]} : vector<8x512xf32> to vector<8x384xf32>
    %cst_48 = arith.constant 5.000000e-01 : f32
    %147 = vector.broadcast %cst_48 : f32 to vector<8x384xf32>
    %148 = arith.mulf %147, %146 : vector<8x384xf32>
    %149 = math.tanh %148 : vector<8x384xf32>
    %cst_49 = arith.constant 1.000000e+00 : f32
    %150 = vector.broadcast %cst_49 : f32 to vector<8x384xf32>
    %151 = arith.addf %150, %149 : vector<8x384xf32>
    %cst_50 = arith.constant 5.000000e-01 : f32
    %152 = vector.broadcast %cst_50 : f32 to vector<8x384xf32>
    %153 = arith.mulf %152, %151 : vector<8x384xf32>
    %154 = vector.extract_strided_slice %153 {offsets = [0, 0], sizes = [8, 128], strides = [1, 1]} : vector<8x384xf32> to vector<8x128xf32>
    %155 = vector.extract_strided_slice %153 {offsets = [0, 128], sizes = [8, 128], strides = [1, 1]} : vector<8x384xf32> to vector<8x128xf32>
    %156 = vector.extract_strided_slice %153 {offsets = [0, 256], sizes = [8, 128], strides = [1, 1]} : vector<8x384xf32> to vector<8x128xf32>
    %157 = vector.extract_strided_slice %145 {offsets = [0, 384], sizes = [8, 128], strides = [1, 1]} : vector<8x512xf32> to vector<8x128xf32>
    %158 = math.tanh %157 : vector<8x128xf32>
    %159 = arith.mulf %155, %136 : vector<8x128xf32>
    %160 = arith.mulf %154, %158 : vector<8x128xf32>
    %161 = arith.addf %159, %160 : vector<8x128xf32>
    %162 = math.tanh %161 : vector<8x128xf32>
    %163 = arith.mulf %156, %162 : vector<8x128xf32>
    %c6_i32 = arith.constant 6 : i32
    %c8_i32_51 = arith.constant 8 : i32
    %164 = arith.muli %c6_i32, %c8_i32_51 : i32
    %165 = tpu.assume_multiple %164, 8 : i32
    %166 = arith.index_cast %165 : i32 to index
    %c0_52 = arith.constant 0 : index
    %167 = vector.load %arg11[%166, %c0_52] : memref<64x512xf32, #tpu.memory_space<vmem>>, vector<8x512xf32>
    %168 = arith.truncf %163 : vector<8x128xf32> to vector<8x128xbf16>
    %cst_53 = arith.constant dense<0.000000e+00> : vector<8x512xf32>
    %169 = tpu.matmul %168, %11, %cst_53 {dimension_numbers = #tpu.dot_dimension_numbers<[1], [0], [0], [1], [0, 0, 1, 1], [], []>} : vector<8x128xbf16>, vector<128x512xbf16>, vector<8x512xf32> -> vector<8x512xf32>
    %170 = arith.addf %167, %169 : vector<8x512xf32>
    %171 = vector.extract_strided_slice %170 {offsets = [0, 0], sizes = [8, 384], strides = [1, 1]} : vector<8x512xf32> to vector<8x384xf32>
    %cst_54 = arith.constant 5.000000e-01 : f32
    %172 = vector.broadcast %cst_54 : f32 to vector<8x384xf32>
    %173 = arith.mulf %172, %171 : vector<8x384xf32>
    %174 = math.tanh %173 : vector<8x384xf32>
    %cst_55 = arith.constant 1.000000e+00 : f32
    %175 = vector.broadcast %cst_55 : f32 to vector<8x384xf32>
    %176 = arith.addf %175, %174 : vector<8x384xf32>
    %cst_56 = arith.constant 5.000000e-01 : f32
    %177 = vector.broadcast %cst_56 : f32 to vector<8x384xf32>
    %178 = arith.mulf %177, %176 : vector<8x384xf32>
    %179 = vector.extract_strided_slice %178 {offsets = [0, 0], sizes = [8, 128], strides = [1, 1]} : vector<8x384xf32> to vector<8x128xf32>
    %180 = vector.extract_strided_slice %178 {offsets = [0, 128], sizes = [8, 128], strides = [1, 1]} : vector<8x384xf32> to vector<8x128xf32>
    %181 = vector.extract_strided_slice %178 {offsets = [0, 256], sizes = [8, 128], strides = [1, 1]} : vector<8x384xf32> to vector<8x128xf32>
    %182 = vector.extract_strided_slice %170 {offsets = [0, 384], sizes = [8, 128], strides = [1, 1]} : vector<8x512xf32> to vector<8x128xf32>
    %183 = math.tanh %182 : vector<8x128xf32>
    %184 = arith.mulf %180, %161 : vector<8x128xf32>
    %185 = arith.mulf %179, %183 : vector<8x128xf32>
    %186 = arith.addf %184, %185 : vector<8x128xf32>
    %187 = math.tanh %186 : vector<8x128xf32>
    %188 = arith.mulf %181, %187 : vector<8x128xf32>
    %c7_i32 = arith.constant 7 : i32
    %c8_i32_57 = arith.constant 8 : i32
    %189 = arith.muli %c7_i32, %c8_i32_57 : i32
    %190 = tpu.assume_multiple %189, 8 : i32
    %191 = arith.index_cast %190 : i32 to index
    %c0_58 = arith.constant 0 : index
    %192 = vector.load %arg11[%191, %c0_58] : memref<64x512xf32, #tpu.memory_space<vmem>>, vector<8x512xf32>
    %193 = arith.truncf %188 : vector<8x128xf32> to vector<8x128xbf16>
    %cst_59 = arith.constant dense<0.000000e+00> : vector<8x512xf32>
    %194 = tpu.matmul %193, %11, %cst_59 {dimension_numbers = #tpu.dot_dimension_numbers<[1], [0], [0], [1], [0, 0, 1, 1], [], []>} : vector<8x128xbf16>, vector<128x512xbf16>, vector<8x512xf32> -> vector<8x512xf32>
    %195 = arith.addf %192, %194 : vector<8x512xf32>
    %196 = vector.extract_strided_slice %195 {offsets = [0, 0], sizes = [8, 384], strides = [1, 1]} : vector<8x512xf32> to vector<8x384xf32>
    %cst_60 = arith.constant 5.000000e-01 : f32
    %197 = vector.broadcast %cst_60 : f32 to vector<8x384xf32>
    %198 = arith.mulf %197, %196 : vector<8x384xf32>
    %199 = math.tanh %198 : vector<8x384xf32>
    %cst_61 = arith.constant 1.000000e+00 : f32
    %200 = vector.broadcast %cst_61 : f32 to vector<8x384xf32>
    %201 = arith.addf %200, %199 : vector<8x384xf32>
    %cst_62 = arith.constant 5.000000e-01 : f32
    %202 = vector.broadcast %cst_62 : f32 to vector<8x384xf32>
    %203 = arith.mulf %202, %201 : vector<8x384xf32>
    %204 = vector.extract_strided_slice %203 {offsets = [0, 0], sizes = [8, 128], strides = [1, 1]} : vector<8x384xf32> to vector<8x128xf32>
    %205 = vector.extract_strided_slice %203 {offsets = [0, 128], sizes = [8, 128], strides = [1, 1]} : vector<8x384xf32> to vector<8x128xf32>
    %206 = vector.extract_strided_slice %203 {offsets = [0, 256], sizes = [8, 128], strides = [1, 1]} : vector<8x384xf32> to vector<8x128xf32>
    %207 = vector.extract_strided_slice %195 {offsets = [0, 384], sizes = [8, 128], strides = [1, 1]} : vector<8x512xf32> to vector<8x128xf32>
    %208 = math.tanh %207 : vector<8x128xf32>
    %209 = arith.mulf %205, %186 : vector<8x128xf32>
    %210 = arith.mulf %204, %208 : vector<8x128xf32>
    %211 = arith.addf %209, %210 : vector<8x128xf32>
    %212 = math.tanh %211 : vector<8x128xf32>
    %213 = arith.mulf %206, %212 : vector<8x128xf32>
    %c8_i32_63 = arith.constant 8 : i32
    %c0_64 = arith.constant 0 : index
    %c0_65 = arith.constant 0 : index
    %214 = vector.load %arg9[%c0_64, %c0_65] : memref<8x128xf32, #tpu.memory_space<vmem>>, vector<8x128xf32>
    tpu.vector_store %arg9[%c0_64, %c0_65], %213 {strides = array<i32>} : memref<8x128xf32, #tpu.memory_space<vmem>>, vector<8x128xf32>,
    %c0_66 = arith.constant 0 : index
    %c0_67 = arith.constant 0 : index
    %215 = vector.load %arg10[%c0_66, %c0_67] : memref<8x128xf32, #tpu.memory_space<vmem>>, vector<8x128xf32>
    tpu.vector_store %arg10[%c0_66, %c0_67], %211 {strides = array<i32>} : memref<8x128xf32, #tpu.memory_space<vmem>>, vector<8x128xf32>,
    %c0_i32_68 = arith.constant 0 : i32
    %216 = arith.cmpi eq, %arg1, %c0_i32_68 : i32
    %217 = arith.extui %216 : i1 to i32
    %c0_i32_69 = arith.constant 0 : i32
    %218 = arith.cmpi ne, %217, %c0_i32_69 : i32
    scf.if %218 {
      %c0_70 = arith.constant 0 : index
      %c0_71 = arith.constant 0 : index
      %219 = vector.load %arg6[%c0_70, %c0_71] : memref<128x128xf32, #tpu.memory_space<vmem>>, vector<128x128xf32>
      %cst_72 = arith.constant dense<0.000000e+00> : vector<8x128xf32>
      %220 = tpu.matmul %213, %219, %cst_72 {dimension_numbers = #tpu.dot_dimension_numbers<[1], [0], [0], [1], [0, 0, 1, 1], [], []>} : vector<8x128xf32>, vector<128x128xf32>, vector<8x128xf32> -> vector<8x128xf32>
      %c0_73 = arith.constant 0 : index
      %c0_74 = arith.constant 0 : index
      %221 = vector.load %arg7[%c0_73, %c0_74] : memref<1x128xf32, #tpu.memory_space<vmem>>, vector<1x128xf32>
      %222 = vector.broadcast %221 : vector<1x128xf32> to vector<8x128xf32>
      %223 = arith.addf %220, %222 : vector<8x128xf32>
      %c0_75 = arith.constant 0 : index
      %c0_76 = arith.constant 0 : index
      %224 = vector.load %arg8[%c0_75, %c0_76] : memref<8x128xf32, #tpu.memory_space<vmem>>, vector<8x128xf32>
      tpu.vector_store %arg8[%c0_75, %c0_76], %223 {strides = array<i32>} : memref<8x128xf32, #tpu.memory_space<vmem>>, vector<8x128xf32>,
    } else {
    }
    return
  }
  func.func @transform_0(%arg0: i32, %arg1: i32) -> (i32, i32, i32) {
    %c0_i32 = arith.constant 0 : i32
    %c0_i32_0 = arith.constant 0 : i32
    return %arg0, %arg1, %c0_i32 : i32, i32, i32
  }
  func.func @transform_1(%arg0: i32, %arg1: i32) -> (i32, i32) {
    %c0_i32 = arith.constant 0 : i32
    %c0_i32_0 = arith.constant 0 : i32
    %c0_i32_1 = arith.constant 0 : i32
    return %c0_i32, %c0_i32_0 : i32, i32
  }
  func.func @transform_2(%arg0: i32, %arg1: i32) -> (i32, i32) {
    %c0_i32 = arith.constant 0 : i32
    %c0_i32_0 = arith.constant 0 : i32
    %c0_i32_1 = arith.constant 0 : i32
    return %c0_i32, %c0_i32_0 : i32, i32
  }
  func.func @transform_3(%arg0: i32, %arg1: i32) -> (i32, i32) {
    %c0_i32 = arith.constant 0 : i32
    %c0_i32_0 = arith.constant 0 : i32
    %c0_i32_1 = arith.constant 0 : i32
    return %c0_i32, %c0_i32_0 : i32, i32
  }
  func.func @transform_4(%arg0: i32, %arg1: i32) -> (i32, i32) {
    %c0_i32 = arith.constant 0 : i32
    %c0_i32_0 = arith.constant 0 : i32
    %c0_i32_1 = arith.constant 0 : i32
    return %c0_i32, %c0_i32_0 : i32, i32
  }
  func.func @transform_5(%arg0: i32, %arg1: i32) -> (i32, i32) {
    %c0_i32 = arith.constant 0 : i32
    %c0_i32_0 = arith.constant 0 : i32
    %c0_i32_1 = arith.constant 0 : i32
    return %c0_i32, %c0_i32_0 : i32, i32
  }
  func.func @transform_6(%arg0: i32, %arg1: i32) -> (i32, i32) {
    %c0_i32 = arith.constant 0 : i32
    %c0_i32_0 = arith.constant 0 : i32
    return %arg0, %c0_i32 : i32, i32
  }
}

module attributes {stable_mosaic.version = 11 : i64} {
  func.func @lstm_model_kernel(%arg0: i32, %arg1: i32, %arg2: memref<1x64x8xbf16, #tpu.memory_space<vmem>>, %arg3: memref<8x512xbf16, #tpu.memory_space<vmem>>, %arg4: memref<128x512xbf16, #tpu.memory_space<vmem>>, %arg5: memref<1x512xf32, #tpu.memory_space<vmem>>, %arg6: memref<128x128xf32, #tpu.memory_space<vmem>>, %arg7: memref<1x128xf32, #tpu.memory_space<vmem>>, %arg8: memref<8x128xf32, #tpu.memory_space<vmem>>, %arg9: memref<8x128xf32, #tpu.memory_space<vmem>>, %arg10: memref<8x128xf32, #tpu.memory_space<vmem>>, %arg11: memref<64x512xf32, #tpu.memory_space<vmem>>) attributes {dimension_semantics = [#tpu.dimension_semantics<parallel>, #tpu.dimension_semantics<arbitrary>], iteration_bounds = array<i64: 1, 1>, scalar_prefetch = 0 : i64, scratch_operands = 3 : i64, tpu.core_type = #tpu.core_type<tc>, window_params = [{transform_indices = @transform_0, window_bounds = array<i64: 1, 64, 8>}, {pipeline_mode = #tpu.pipeline_mode<synchronous>, transform_indices = @transform_1, window_bounds = array<i64: 8, 512>}, {pipeline_mode = #tpu.pipeline_mode<synchronous>, transform_indices = @transform_2, window_bounds = array<i64: 128, 512>}, {pipeline_mode = #tpu.pipeline_mode<synchronous>, transform_indices = @transform_3, window_bounds = array<i64: 1, 512>}, {pipeline_mode = #tpu.pipeline_mode<synchronous>, transform_indices = @transform_4, window_bounds = array<i64: 128, 128>}, {pipeline_mode = #tpu.pipeline_mode<synchronous>, transform_indices = @transform_5, window_bounds = array<i64: 1, 128>}, {transform_indices = @transform_6, window_bounds = array<i64: 8, 128>}]} {
    %c0_i32 = arith.constant 0 : i32
    %0 = arith.cmpi eq, %arg1, %c0_i32 : i32
    %1 = arith.extui %0 : i1 to i32
    %c0_i32_0 = arith.constant 0 : i32
    %2 = arith.cmpi ne, %1, %c0_i32_0 : i32
    scf.if %2 {
      %cst_70 = arith.constant 0.000000e+00 : f32
      %219 = vector.broadcast %cst_70 : f32 to vector<8x128xf32>
      %c0_71 = arith.constant 0 : index
      %c0_72 = arith.constant 0 : index
      %220 = vector.load %arg9[%c0_71, %c0_72] : memref<8x128xf32, #tpu.memory_space<vmem>>, vector<8x128xf32>
      tpu.vector_store %arg9[%c0_71, %c0_72], %219 {strides = array<i32>} : memref<8x128xf32, #tpu.memory_space<vmem>>, vector<8x128xf32>,
      %cst_73 = arith.constant 0.000000e+00 : f32
      %221 = vector.broadcast %cst_73 : f32 to vector<8x128xf32>
      %c0_74 = arith.constant 0 : index
      %c0_75 = arith.constant 0 : index
      %222 = vector.load %arg10[%c0_74, %c0_75] : memref<8x128xf32, #tpu.memory_space<vmem>>, vector<8x128xf32>
      tpu.vector_store %arg10[%c0_74, %c0_75], %221 {strides = array<i32>} : memref<8x128xf32, #tpu.memory_space<vmem>>, vector<8x128xf32>,
    } else {
    }
    %c0 = arith.constant 0 : index
    %c0_1 = arith.constant 0 : index
    %c0_2 = arith.constant 0 : index
    %3 = vector.load %arg2[%c0, %c0_1, %c0_2] : memref<1x64x8xbf16, #tpu.memory_space<vmem>>, vector<1x64x8xbf16>
    %4 = vector.shape_cast %3 : vector<1x64x8xbf16> to vector<64x8xbf16>
    %c0_3 = arith.constant 0 : index
    %c0_4 = arith.constant 0 : index
    %5 = vector.load %arg3[%c0_3, %c0_4] : memref<8x512xbf16, #tpu.memory_space<vmem>>, vector<8x512xbf16>
    %cst = arith.constant dense<0.000000e+00> : vector<64x512xf32>
    %6 = tpu.matmul %4, %5, %cst {dimension_numbers = #tpu.dot_dimension_numbers<[1], [0], [0], [1], [0, 0, 1, 1], [], []>} : vector<64x8xbf16>, vector<8x512xbf16>, vector<64x512xf32> -> vector<64x512xf32>
    %c0_5 = arith.constant 0 : index
    %c0_6 = arith.constant 0 : index
    %7 = vector.load %arg5[%c0_5, %c0_6] : memref<1x512xf32, #tpu.memory_space<vmem>>, vector<1x512xf32>
    %8 = vector.broadcast %7 : vector<1x512xf32> to vector<64x512xf32>
    %9 = arith.addf %6, %8 : vector<64x512xf32>
    %c0_7 = arith.constant 0 : index
    %c0_8 = arith.constant 0 : index
    %10 = vector.load %arg11[%c0_7, %c0_8] : memref<64x512xf32, #tpu.memory_space<vmem>>, vector<64x512xf32>
    tpu.vector_store %arg11[%c0_7, %c0_8], %9 {strides = array<i32>} : memref<64x512xf32, #tpu.memory_space<vmem>>, vector<64x512xf32>,
    %c0_9 = arith.constant 0 : index
    %c0_10 = arith.constant 0 : index
    %11 = vector.load %arg4[%c0_9, %c0_10] : memref<128x512xbf16, #tpu.memory_space<vmem>>, vector<128x512xbf16>
    %c0_11 = arith.constant 0 : index
    %c0_12 = arith.constant 0 : index
    %12 = vector.load %arg9[%c0_11, %c0_12] : memref<8x128xf32, #tpu.memory_space<vmem>>, vector<8x128xf32>
    %c0_13 = arith.constant 0 : index
    %c0_14 = arith.constant 0 : index
    %13 = vector.load %arg10[%c0_13, %c0_14] : memref<8x128xf32, #tpu.memory_space<vmem>>, vector<8x128xf32>
    %c0_i32_15 = arith.constant 0 : i32
    %c8_i32 = arith.constant 8 : i32
    %14 = arith.muli %c0_i32_15, %c8_i32 : i32
    %15 = tpu.assume_multiple %14, 8 : i32
    %16 = arith.index_cast %15 : i32 to index
    %c0_16 = arith.constant 0 : index
    %17 = vector.load %arg11[%16, %c0_16] : memref<64x512xf32, #tpu.memory_space<vmem>>, vector<8x512xf32>
    %18 = arith.truncf %12 : vector<8x128xf32> to vector<8x128xbf16>
    %cst_17 = arith.constant dense<0.000000e+00> : vector<8x512xf32>
    %19 = tpu.matmul %18, %11, %cst_17 {dimension_numbers = #tpu.dot_dimension_numbers<[1], [0], [0], [1], [0, 0, 1, 1], [], []>} : vector<8x128xbf16>, vector<128x512xbf16>, vector<8x512xf32> -> vector<8x512xf32>
    %20 = arith.addf %17, %19 : vector<8x512xf32>
    %21 = vector.extract_strided_slice %20 {offsets = [0, 0], sizes = [8, 384], strides = [1, 1]} : vector<8x512xf32> to vector<8x384xf32>
    %cst_18 = arith.constant 5.000000e-01 : f32
    %22 = vector.broadcast %cst_18 : f32 to vector<8x384xf32>
    %23 = arith.mulf %22, %21 : vector<8x384xf32>
    %24 = math.tanh %23 : vector<8x384xf32>
    %cst_19 = arith.constant 1.000000e+00 : f32
    %25 = vector.broadcast %cst_19 : f32 to vector<8x384xf32>
    %26 = arith.addf %25, %24 : vector<8x384xf32>
    %cst_20 = arith.constant 5.000000e-01 : f32
    %27 = vector.broadcast %cst_20 : f32 to vector<8x384xf32>
    %28 = arith.mulf %27, %26 : vector<8x384xf32>
    %29 = vector.extract_strided_slice %28 {offsets = [0, 0], sizes = [8, 128], strides = [1, 1]} : vector<8x384xf32> to vector<8x128xf32>
    %30 = vector.extract_strided_slice %28 {offsets = [0, 128], sizes = [8, 128], strides = [1, 1]} : vector<8x384xf32> to vector<8x128xf32>
    %31 = vector.extract_strided_slice %28 {offsets = [0, 256], sizes = [8, 128], strides = [1, 1]} : vector<8x384xf32> to vector<8x128xf32>
    %32 = vector.extract_strided_slice %20 {offsets = [0, 384], sizes = [8, 128], strides = [1, 1]} : vector<8x512xf32> to vector<8x128xf32>
    %33 = math.tanh %32 : vector<8x128xf32>
    %34 = arith.mulf %30, %13 : vector<8x128xf32>
    %35 = arith.mulf %29, %33 : vector<8x128xf32>
    %36 = arith.addf %34, %35 : vector<8x128xf32>
    %37 = math.tanh %36 : vector<8x128xf32>
    %38 = arith.mulf %31, %37 : vector<8x128xf32>
    %c1_i32 = arith.constant 1 : i32
    %c8_i32_21 = arith.constant 8 : i32
    %39 = arith.muli %c1_i32, %c8_i32_21 : i32
    %40 = tpu.assume_multiple %39, 8 : i32
    %41 = arith.index_cast %40 : i32 to index
    %c0_22 = arith.constant 0 : index
    %42 = vector.load %arg11[%41, %c0_22] : memref<64x512xf32, #tpu.memory_space<vmem>>, vector<8x512xf32>
    %43 = arith.truncf %38 : vector<8x128xf32> to vector<8x128xbf16>
    %cst_23 = arith.constant dense<0.000000e+00> : vector<8x512xf32>
    %44 = tpu.matmul %43, %11, %cst_23 {dimension_numbers = #tpu.dot_dimension_numbers<[1], [0], [0], [1], [0, 0, 1, 1], [], []>} : vector<8x128xbf16>, vector<128x512xbf16>, vector<8x512xf32> -> vector<8x512xf32>
    %45 = arith.addf %42, %44 : vector<8x512xf32>
    %46 = vector.extract_strided_slice %45 {offsets = [0, 0], sizes = [8, 384], strides = [1, 1]} : vector<8x512xf32> to vector<8x384xf32>
    %cst_24 = arith.constant 5.000000e-01 : f32
    %47 = vector.broadcast %cst_24 : f32 to vector<8x384xf32>
    %48 = arith.mulf %47, %46 : vector<8x384xf32>
    %49 = math.tanh %48 : vector<8x384xf32>
    %cst_25 = arith.constant 1.000000e+00 : f32
    %50 = vector.broadcast %cst_25 : f32 to vector<8x384xf32>
    %51 = arith.addf %50, %49 : vector<8x384xf32>
    %cst_26 = arith.constant 5.000000e-01 : f32
    %52 = vector.broadcast %cst_26 : f32 to vector<8x384xf32>
    %53 = arith.mulf %52, %51 : vector<8x384xf32>
    %54 = vector.extract_strided_slice %53 {offsets = [0, 0], sizes = [8, 128], strides = [1, 1]} : vector<8x384xf32> to vector<8x128xf32>
    %55 = vector.extract_strided_slice %53 {offsets = [0, 128], sizes = [8, 128], strides = [1, 1]} : vector<8x384xf32> to vector<8x128xf32>
    %56 = vector.extract_strided_slice %53 {offsets = [0, 256], sizes = [8, 128], strides = [1, 1]} : vector<8x384xf32> to vector<8x128xf32>
    %57 = vector.extract_strided_slice %45 {offsets = [0, 384], sizes = [8, 128], strides = [1, 1]} : vector<8x512xf32> to vector<8x128xf32>
    %58 = math.tanh %57 : vector<8x128xf32>
    %59 = arith.mulf %55, %36 : vector<8x128xf32>
    %60 = arith.mulf %54, %58 : vector<8x128xf32>
    %61 = arith.addf %59, %60 : vector<8x128xf32>
    %62 = math.tanh %61 : vector<8x128xf32>
    %63 = arith.mulf %56, %62 : vector<8x128xf32>
    %c2_i32 = arith.constant 2 : i32
    %c8_i32_27 = arith.constant 8 : i32
    %64 = arith.muli %c2_i32, %c8_i32_27 : i32
    %65 = tpu.assume_multiple %64, 8 : i32
    %66 = arith.index_cast %65 : i32 to index
    %c0_28 = arith.constant 0 : index
    %67 = vector.load %arg11[%66, %c0_28] : memref<64x512xf32, #tpu.memory_space<vmem>>, vector<8x512xf32>
    %68 = arith.truncf %63 : vector<8x128xf32> to vector<8x128xbf16>
    %cst_29 = arith.constant dense<0.000000e+00> : vector<8x512xf32>
    %69 = tpu.matmul %68, %11, %cst_29 {dimension_numbers = #tpu.dot_dimension_numbers<[1], [0], [0], [1], [0, 0, 1, 1], [], []>} : vector<8x128xbf16>, vector<128x512xbf16>, vector<8x512xf32> -> vector<8x512xf32>
    %70 = arith.addf %67, %69 : vector<8x512xf32>
    %71 = vector.extract_strided_slice %70 {offsets = [0, 0], sizes = [8, 384], strides = [1, 1]} : vector<8x512xf32> to vector<8x384xf32>
    %cst_30 = arith.constant 5.000000e-01 : f32
    %72 = vector.broadcast %cst_30 : f32 to vector<8x384xf32>
    %73 = arith.mulf %72, %71 : vector<8x384xf32>
    %74 = math.tanh %73 : vector<8x384xf32>
    %cst_31 = arith.constant 1.000000e+00 : f32
    %75 = vector.broadcast %cst_31 : f32 to vector<8x384xf32>
    %76 = arith.addf %75, %74 : vector<8x384xf32>
    %cst_32 = arith.constant 5.000000e-01 : f32
    %77 = vector.broadcast %cst_32 : f32 to vector<8x384xf32>
    %78 = arith.mulf %77, %76 : vector<8x384xf32>
    %79 = vector.extract_strided_slice %78 {offsets = [0, 0], sizes = [8, 128], strides = [1, 1]} : vector<8x384xf32> to vector<8x128xf32>
    %80 = vector.extract_strided_slice %78 {offsets = [0, 128], sizes = [8, 128], strides = [1, 1]} : vector<8x384xf32> to vector<8x128xf32>
    %81 = vector.extract_strided_slice %78 {offsets = [0, 256], sizes = [8, 128], strides = [1, 1]} : vector<8x384xf32> to vector<8x128xf32>
    %82 = vector.extract_strided_slice %70 {offsets = [0, 384], sizes = [8, 128], strides = [1, 1]} : vector<8x512xf32> to vector<8x128xf32>
    %83 = math.tanh %82 : vector<8x128xf32>
    %84 = arith.mulf %80, %61 : vector<8x128xf32>
    %85 = arith.mulf %79, %83 : vector<8x128xf32>
    %86 = arith.addf %84, %85 : vector<8x128xf32>
    %87 = math.tanh %86 : vector<8x128xf32>
    %88 = arith.mulf %81, %87 : vector<8x128xf32>
    %c3_i32 = arith.constant 3 : i32
    %c8_i32_33 = arith.constant 8 : i32
    %89 = arith.muli %c3_i32, %c8_i32_33 : i32
    %90 = tpu.assume_multiple %89, 8 : i32
    %91 = arith.index_cast %90 : i32 to index
    %c0_34 = arith.constant 0 : index
    %92 = vector.load %arg11[%91, %c0_34] : memref<64x512xf32, #tpu.memory_space<vmem>>, vector<8x512xf32>
    %93 = arith.truncf %88 : vector<8x128xf32> to vector<8x128xbf16>
    %cst_35 = arith.constant dense<0.000000e+00> : vector<8x512xf32>
    %94 = tpu.matmul %93, %11, %cst_35 {dimension_numbers = #tpu.dot_dimension_numbers<[1], [0], [0], [1], [0, 0, 1, 1], [], []>} : vector<8x128xbf16>, vector<128x512xbf16>, vector<8x512xf32> -> vector<8x512xf32>
    %95 = arith.addf %92, %94 : vector<8x512xf32>
    %96 = vector.extract_strided_slice %95 {offsets = [0, 0], sizes = [8, 384], strides = [1, 1]} : vector<8x512xf32> to vector<8x384xf32>
    %cst_36 = arith.constant 5.000000e-01 : f32
    %97 = vector.broadcast %cst_36 : f32 to vector<8x384xf32>
    %98 = arith.mulf %97, %96 : vector<8x384xf32>
    %99 = math.tanh %98 : vector<8x384xf32>
    %cst_37 = arith.constant 1.000000e+00 : f32
    %100 = vector.broadcast %cst_37 : f32 to vector<8x384xf32>
    %101 = arith.addf %100, %99 : vector<8x384xf32>
    %cst_38 = arith.constant 5.000000e-01 : f32
    %102 = vector.broadcast %cst_38 : f32 to vector<8x384xf32>
    %103 = arith.mulf %102, %101 : vector<8x384xf32>
    %104 = vector.extract_strided_slice %103 {offsets = [0, 0], sizes = [8, 128], strides = [1, 1]} : vector<8x384xf32> to vector<8x128xf32>
    %105 = vector.extract_strided_slice %103 {offsets = [0, 128], sizes = [8, 128], strides = [1, 1]} : vector<8x384xf32> to vector<8x128xf32>
    %106 = vector.extract_strided_slice %103 {offsets = [0, 256], sizes = [8, 128], strides = [1, 1]} : vector<8x384xf32> to vector<8x128xf32>
    %107 = vector.extract_strided_slice %95 {offsets = [0, 384], sizes = [8, 128], strides = [1, 1]} : vector<8x512xf32> to vector<8x128xf32>
    %108 = math.tanh %107 : vector<8x128xf32>
    %109 = arith.mulf %105, %86 : vector<8x128xf32>
    %110 = arith.mulf %104, %108 : vector<8x128xf32>
    %111 = arith.addf %109, %110 : vector<8x128xf32>
    %112 = math.tanh %111 : vector<8x128xf32>
    %113 = arith.mulf %106, %112 : vector<8x128xf32>
    %c4_i32 = arith.constant 4 : i32
    %c8_i32_39 = arith.constant 8 : i32
    %114 = arith.muli %c4_i32, %c8_i32_39 : i32
    %115 = tpu.assume_multiple %114, 8 : i32
    %116 = arith.index_cast %115 : i32 to index
    %c0_40 = arith.constant 0 : index
    %117 = vector.load %arg11[%116, %c0_40] : memref<64x512xf32, #tpu.memory_space<vmem>>, vector<8x512xf32>
    %118 = arith.truncf %113 : vector<8x128xf32> to vector<8x128xbf16>
    %cst_41 = arith.constant dense<0.000000e+00> : vector<8x512xf32>
    %119 = tpu.matmul %118, %11, %cst_41 {dimension_numbers = #tpu.dot_dimension_numbers<[1], [0], [0], [1], [0, 0, 1, 1], [], []>} : vector<8x128xbf16>, vector<128x512xbf16>, vector<8x512xf32> -> vector<8x512xf32>
    %120 = arith.addf %117, %119 : vector<8x512xf32>
    %121 = vector.extract_strided_slice %120 {offsets = [0, 0], sizes = [8, 384], strides = [1, 1]} : vector<8x512xf32> to vector<8x384xf32>
    %cst_42 = arith.constant 5.000000e-01 : f32
    %122 = vector.broadcast %cst_42 : f32 to vector<8x384xf32>
    %123 = arith.mulf %122, %121 : vector<8x384xf32>
    %124 = math.tanh %123 : vector<8x384xf32>
    %cst_43 = arith.constant 1.000000e+00 : f32
    %125 = vector.broadcast %cst_43 : f32 to vector<8x384xf32>
    %126 = arith.addf %125, %124 : vector<8x384xf32>
    %cst_44 = arith.constant 5.000000e-01 : f32
    %127 = vector.broadcast %cst_44 : f32 to vector<8x384xf32>
    %128 = arith.mulf %127, %126 : vector<8x384xf32>
    %129 = vector.extract_strided_slice %128 {offsets = [0, 0], sizes = [8, 128], strides = [1, 1]} : vector<8x384xf32> to vector<8x128xf32>
    %130 = vector.extract_strided_slice %128 {offsets = [0, 128], sizes = [8, 128], strides = [1, 1]} : vector<8x384xf32> to vector<8x128xf32>
    %131 = vector.extract_strided_slice %128 {offsets = [0, 256], sizes = [8, 128], strides = [1, 1]} : vector<8x384xf32> to vector<8x128xf32>
    %132 = vector.extract_strided_slice %120 {offsets = [0, 384], sizes = [8, 128], strides = [1, 1]} : vector<8x512xf32> to vector<8x128xf32>
    %133 = math.tanh %132 : vector<8x128xf32>
    %134 = arith.mulf %130, %111 : vector<8x128xf32>
    %135 = arith.mulf %129, %133 : vector<8x128xf32>
    %136 = arith.addf %134, %135 : vector<8x128xf32>
    %137 = math.tanh %136 : vector<8x128xf32>
    %138 = arith.mulf %131, %137 : vector<8x128xf32>
    %c5_i32 = arith.constant 5 : i32
    %c8_i32_45 = arith.constant 8 : i32
    %139 = arith.muli %c5_i32, %c8_i32_45 : i32
    %140 = tpu.assume_multiple %139, 8 : i32
    %141 = arith.index_cast %140 : i32 to index
    %c0_46 = arith.constant 0 : index
    %142 = vector.load %arg11[%141, %c0_46] : memref<64x512xf32, #tpu.memory_space<vmem>>, vector<8x512xf32>
    %143 = arith.truncf %138 : vector<8x128xf32> to vector<8x128xbf16>
    %cst_47 = arith.constant dense<0.000000e+00> : vector<8x512xf32>
    %144 = tpu.matmul %143, %11, %cst_47 {dimension_numbers = #tpu.dot_dimension_numbers<[1], [0], [0], [1], [0, 0, 1, 1], [], []>} : vector<8x128xbf16>, vector<128x512xbf16>, vector<8x512xf32> -> vector<8x512xf32>
    %145 = arith.addf %142, %144 : vector<8x512xf32>
    %146 = vector.extract_strided_slice %145 {offsets = [0, 0], sizes = [8, 384], strides = [1, 1]} : vector<8x512xf32> to vector<8x384xf32>
    %cst_48 = arith.constant 5.000000e-01 : f32
    %147 = vector.broadcast %cst_48 : f32 to vector<8x384xf32>
    %148 = arith.mulf %147, %146 : vector<8x384xf32>
    %149 = math.tanh %148 : vector<8x384xf32>
    %cst_49 = arith.constant 1.000000e+00 : f32
    %150 = vector.broadcast %cst_49 : f32 to vector<8x384xf32>
    %151 = arith.addf %150, %149 : vector<8x384xf32>
    %cst_50 = arith.constant 5.000000e-01 : f32
    %152 = vector.broadcast %cst_50 : f32 to vector<8x384xf32>
    %153 = arith.mulf %152, %151 : vector<8x384xf32>
    %154 = vector.extract_strided_slice %153 {offsets = [0, 0], sizes = [8, 128], strides = [1, 1]} : vector<8x384xf32> to vector<8x128xf32>
    %155 = vector.extract_strided_slice %153 {offsets = [0, 128], sizes = [8, 128], strides = [1, 1]} : vector<8x384xf32> to vector<8x128xf32>
    %156 = vector.extract_strided_slice %153 {offsets = [0, 256], sizes = [8, 128], strides = [1, 1]} : vector<8x384xf32> to vector<8x128xf32>
    %157 = vector.extract_strided_slice %145 {offsets = [0, 384], sizes = [8, 128], strides = [1, 1]} : vector<8x512xf32> to vector<8x128xf32>
    %158 = math.tanh %157 : vector<8x128xf32>
    %159 = arith.mulf %155, %136 : vector<8x128xf32>
    %160 = arith.mulf %154, %158 : vector<8x128xf32>
    %161 = arith.addf %159, %160 : vector<8x128xf32>
    %162 = math.tanh %161 : vector<8x128xf32>
    %163 = arith.mulf %156, %162 : vector<8x128xf32>
    %c6_i32 = arith.constant 6 : i32
    %c8_i32_51 = arith.constant 8 : i32
    %164 = arith.muli %c6_i32, %c8_i32_51 : i32
    %165 = tpu.assume_multiple %164, 8 : i32
    %166 = arith.index_cast %165 : i32 to index
    %c0_52 = arith.constant 0 : index
    %167 = vector.load %arg11[%166, %c0_52] : memref<64x512xf32, #tpu.memory_space<vmem>>, vector<8x512xf32>
    %168 = arith.truncf %163 : vector<8x128xf32> to vector<8x128xbf16>
    %cst_53 = arith.constant dense<0.000000e+00> : vector<8x512xf32>
    %169 = tpu.matmul %168, %11, %cst_53 {dimension_numbers = #tpu.dot_dimension_numbers<[1], [0], [0], [1], [0, 0, 1, 1], [], []>} : vector<8x128xbf16>, vector<128x512xbf16>, vector<8x512xf32> -> vector<8x512xf32>
    %170 = arith.addf %167, %169 : vector<8x512xf32>
    %171 = vector.extract_strided_slice %170 {offsets = [0, 0], sizes = [8, 384], strides = [1, 1]} : vector<8x512xf32> to vector<8x384xf32>
    %cst_54 = arith.constant 5.000000e-01 : f32
    %172 = vector.broadcast %cst_54 : f32 to vector<8x384xf32>
    %173 = arith.mulf %172, %171 : vector<8x384xf32>
    %174 = math.tanh %173 : vector<8x384xf32>
    %cst_55 = arith.constant 1.000000e+00 : f32
    %175 = vector.broadcast %cst_55 : f32 to vector<8x384xf32>
    %176 = arith.addf %175, %174 : vector<8x384xf32>
    %cst_56 = arith.constant 5.000000e-01 : f32
    %177 = vector.broadcast %cst_56 : f32 to vector<8x384xf32>
    %178 = arith.mulf %177, %176 : vector<8x384xf32>
    %179 = vector.extract_strided_slice %178 {offsets = [0, 0], sizes = [8, 128], strides = [1, 1]} : vector<8x384xf32> to vector<8x128xf32>
    %180 = vector.extract_strided_slice %178 {offsets = [0, 128], sizes = [8, 128], strides = [1, 1]} : vector<8x384xf32> to vector<8x128xf32>
    %181 = vector.extract_strided_slice %178 {offsets = [0, 256], sizes = [8, 128], strides = [1, 1]} : vector<8x384xf32> to vector<8x128xf32>
    %182 = vector.extract_strided_slice %170 {offsets = [0, 384], sizes = [8, 128], strides = [1, 1]} : vector<8x512xf32> to vector<8x128xf32>
    %183 = math.tanh %182 : vector<8x128xf32>
    %184 = arith.mulf %180, %161 : vector<8x128xf32>
    %185 = arith.mulf %179, %183 : vector<8x128xf32>
    %186 = arith.addf %184, %185 : vector<8x128xf32>
    %187 = math.tanh %186 : vector<8x128xf32>
    %188 = arith.mulf %181, %187 : vector<8x128xf32>
    %c7_i32 = arith.constant 7 : i32
    %c8_i32_57 = arith.constant 8 : i32
    %189 = arith.muli %c7_i32, %c8_i32_57 : i32
    %190 = tpu.assume_multiple %189, 8 : i32
    %191 = arith.index_cast %190 : i32 to index
    %c0_58 = arith.constant 0 : index
    %192 = vector.load %arg11[%191, %c0_58] : memref<64x512xf32, #tpu.memory_space<vmem>>, vector<8x512xf32>
    %193 = arith.truncf %188 : vector<8x128xf32> to vector<8x128xbf16>
    %cst_59 = arith.constant dense<0.000000e+00> : vector<8x512xf32>
    %194 = tpu.matmul %193, %11, %cst_59 {dimension_numbers = #tpu.dot_dimension_numbers<[1], [0], [0], [1], [0, 0, 1, 1], [], []>} : vector<8x128xbf16>, vector<128x512xbf16>, vector<8x512xf32> -> vector<8x512xf32>
    %195 = arith.addf %192, %194 : vector<8x512xf32>
    %196 = vector.extract_strided_slice %195 {offsets = [0, 0], sizes = [8, 384], strides = [1, 1]} : vector<8x512xf32> to vector<8x384xf32>
    %cst_60 = arith.constant 5.000000e-01 : f32
    %197 = vector.broadcast %cst_60 : f32 to vector<8x384xf32>
    %198 = arith.mulf %197, %196 : vector<8x384xf32>
    %199 = math.tanh %198 : vector<8x384xf32>
    %cst_61 = arith.constant 1.000000e+00 : f32
    %200 = vector.broadcast %cst_61 : f32 to vector<8x384xf32>
    %201 = arith.addf %200, %199 : vector<8x384xf32>
    %cst_62 = arith.constant 5.000000e-01 : f32
    %202 = vector.broadcast %cst_62 : f32 to vector<8x384xf32>
    %203 = arith.mulf %202, %201 : vector<8x384xf32>
    %204 = vector.extract_strided_slice %203 {offsets = [0, 0], sizes = [8, 128], strides = [1, 1]} : vector<8x384xf32> to vector<8x128xf32>
    %205 = vector.extract_strided_slice %203 {offsets = [0, 128], sizes = [8, 128], strides = [1, 1]} : vector<8x384xf32> to vector<8x128xf32>
    %206 = vector.extract_strided_slice %203 {offsets = [0, 256], sizes = [8, 128], strides = [1, 1]} : vector<8x384xf32> to vector<8x128xf32>
    %207 = vector.extract_strided_slice %195 {offsets = [0, 384], sizes = [8, 128], strides = [1, 1]} : vector<8x512xf32> to vector<8x128xf32>
    %208 = math.tanh %207 : vector<8x128xf32>
    %209 = arith.mulf %205, %186 : vector<8x128xf32>
    %210 = arith.mulf %204, %208 : vector<8x128xf32>
    %211 = arith.addf %209, %210 : vector<8x128xf32>
    %212 = math.tanh %211 : vector<8x128xf32>
    %213 = arith.mulf %206, %212 : vector<8x128xf32>
    %c8_i32_63 = arith.constant 8 : i32
    %c0_64 = arith.constant 0 : index
    %c0_65 = arith.constant 0 : index
    %214 = vector.load %arg9[%c0_64, %c0_65] : memref<8x128xf32, #tpu.memory_space<vmem>>, vector<8x128xf32>
    tpu.vector_store %arg9[%c0_64, %c0_65], %213 {strides = array<i32>} : memref<8x128xf32, #tpu.memory_space<vmem>>, vector<8x128xf32>,
    %c0_66 = arith.constant 0 : index
    %c0_67 = arith.constant 0 : index
    %215 = vector.load %arg10[%c0_66, %c0_67] : memref<8x128xf32, #tpu.memory_space<vmem>>, vector<8x128xf32>
    tpu.vector_store %arg10[%c0_66, %c0_67], %211 {strides = array<i32>} : memref<8x128xf32, #tpu.memory_space<vmem>>, vector<8x128xf32>,
    %c0_i32_68 = arith.constant 0 : i32
    %216 = arith.cmpi eq, %arg1, %c0_i32_68 : i32
    %217 = arith.extui %216 : i1 to i32
    %c0_i32_69 = arith.constant 0 : i32
    %218 = arith.cmpi ne, %217, %c0_i32_69 : i32
    scf.if %218 {
      %c0_70 = arith.constant 0 : index
      %c0_71 = arith.constant 0 : index
      %219 = vector.load %arg6[%c0_70, %c0_71] : memref<128x128xf32, #tpu.memory_space<vmem>>, vector<128x128xf32>
      %cst_72 = arith.constant dense<0.000000e+00> : vector<8x128xf32>
      %220 = tpu.matmul %213, %219, %cst_72 {dimension_numbers = #tpu.dot_dimension_numbers<[1], [0], [0], [1], [0, 0, 1, 1], [], []>} : vector<8x128xf32>, vector<128x128xf32>, vector<8x128xf32> -> vector<8x128xf32>
      %c0_73 = arith.constant 0 : index
      %c0_74 = arith.constant 0 : index
      %221 = vector.load %arg7[%c0_73, %c0_74] : memref<1x128xf32, #tpu.memory_space<vmem>>, vector<1x128xf32>
      %222 = vector.broadcast %221 : vector<1x128xf32> to vector<8x128xf32>
      %223 = arith.addf %220, %222 : vector<8x128xf32>
      %c0_75 = arith.constant 0 : index
      %c0_76 = arith.constant 0 : index
      %224 = vector.load %arg8[%c0_75, %c0_76] : memref<8x128xf32, #tpu.memory_space<vmem>>, vector<8x128xf32>
      tpu.vector_store %arg8[%c0_75, %c0_76], %223 {strides = array<i32>} : memref<8x128xf32, #tpu.memory_space<vmem>>, vector<8x128xf32>,
    } else {
    }
    return
  }
  func.func @transform_0(%arg0: i32, %arg1: i32) -> (i32, i32, i32) {
    %c0_i32 = arith.constant 0 : i32
    %c0_i32_0 = arith.constant 0 : i32
    return %arg0, %arg1, %c0_i32 : i32, i32, i32
  }
  func.func @transform_1(%arg0: i32, %arg1: i32) -> (i32, i32) {
    %c0_i32 = arith.constant 0 : i32
    %c0_i32_0 = arith.constant 0 : i32
    %c0_i32_1 = arith.constant 0 : i32
    return %c0_i32, %c0_i32_0 : i32, i32
  }
  func.func @transform_2(%arg0: i32, %arg1: i32) -> (i32, i32) {
    %c0_i32 = arith.constant 0 : i32
    %c0_i32_0 = arith.constant 0 : i32
    %c0_i32_1 = arith.constant 0 : i32
    return %c0_i32, %c0_i32_0 : i32, i32
  }
  func.func @transform_3(%arg0: i32, %arg1: i32) -> (i32, i32) {
    %c0_i32 = arith.constant 0 : i32
    %c0_i32_0 = arith.constant 0 : i32
    %c0_i32_1 = arith.constant 0 : i32
    return %c0_i32, %c0_i32_0 : i32, i32
  }
  func.func @transform_4(%arg0: i32, %arg1: i32) -> (i32, i32) {
    %c0_i32 = arith.constant 0 : i32
    %c0_i32_0 = arith.constant 0 : i32
    %c0_i32_1 = arith.constant 0 : i32
    return %c0_i32, %c0_i32_0 : i32, i32
  }
  func.func @transform_5(%arg0: i32, %arg1: i32) -> (i32, i32) {
    %c0_i32 = arith.constant 0 : i32
    %c0_i32_0 = arith.constant 0 : i32
    %c0_i32_1 = arith.constant 0 : i32
    return %c0_i32, %c0_i32_0 : i32, i32
  }
  func.func @transform_6(%arg0: i32, %arg1: i32) -> (i32, i32) {
    %c0_i32 = arith.constant 0 : i32
    %c0_i32_0 = arith.constant 0 : i32
    return %arg0, %c0_i32 : i32, i32
  }
}

</mosaic_0001>

<bundles_post_ra>
// kernel: tpu_custom_call.1
= control target key start
LH: loop header
LB: loop body
LE: loop exit
PB: predicated region body
PF: predicated region fallthrough
CT: control target
= control target key end

     0   :  { %11 = vsyncpa [#allocation6], 0  ;;  %s2543_s0 = inlined_call_operand.vmem [shape: bf16[1,64,8], index: 0, kind: input, shape index: {}]   ;;  %s2544_s1 = inlined_call_operand.vmem [shape: bf16[8,512], index: 1, kind: input, shape index: {}]   ;;  %s2545_s2 = inlined_call_operand.hbm [shape: bf16[128,512], index: 2, kind: input, shape index: {}]   ;;  %s2546_s3 = inlined_call_operand.vmem [shape: f32[1,512], index: 3, kind: input, shape index: {}]   ;;  %s2547_s4 = inlined_call_operand.hbm [shape: f32[128,128], index: 4, kind: input, shape index: {}]   ;;  %s2548_s5 = inlined_call_operand.vmem [shape: f32[1,128], index: 5, kind: input, shape index: {}]   ;;  %s2549_s6 = inlined_call_operand.hbm [shape: f32[8,128], index: 6, kind: output, shape index: {}]  }
   0x1   :  { %12 = vsyncpa [#allocation9], 0 }
   0x2   :  { %13 = vsyncpa [#allocation7], 0  ;;  %s1915_s21 = smov [#allocation5]   ;;  %s1843_s25 = scalar_lea.hbm %s2545_s2, 4096 }
   0x3   :  { %s23_s22 = sshll.u32 %s1915_s21, 4  ;;  %p1844_p0 = scmp.ne.s32.totalorder %s2545_s2, %s1843_s25  ;;  %s24_s22 = int_to_ptr.vmem [resolvable:$true] %s23_s22 }
   0x4   :  { %p1847_p1 = scmp.lt.u32.totalorder %s1843_s25, %s2545_s2 }
   0x6   :  { %p1849_p2 = pnand %p1847_p1, %p1844_p0 }
   0x8   :  { %1852 = shalt.err (!%p1849_p2)
}
   0x9   :  { %s1853_s30 = scalar_lea.vmem %s24_s22, 4096  ;;  %p1858_p4 = scmp.lt.s32.totalorder %s24_s22, %s24_s22 }
   0xa   :  { %p1854_p3 = scmp.ne.s32.totalorder %s24_s22, %s1853_s30  ;;  %p1859_p5 = scmp.lt.s32.totalorder %s1853_s30, %s1853_s30 }
   0xc   :  { %p1860_p6 = por %p1859_p5, %p1858_p4 }
   0xe   :  { %p1861_p7 = pnand %p1860_p6, %p1854_p3 }
  0x10   :  { %1864 = shalt.err (!%p1861_p7)
}
  0x11   :  { %s1916_s7 = smov 256   ;;  %s1917_s8 = smov 16  }
  0x12   :  { %29 = dma.hbm_to_vmem [thread:$0]  %s2545_s2, 4096, %s24_s22, [#allocation6], %s1916_s7, %s1916_s7, %s1917_s8  }
  0x13   :  { %s1918_s11 = smov [#allocation8]   ;;  %s1865_s15 = scalar_lea.hbm %s2547_s4, 2048 }
  0x14   :  { %s37_s12 = sshll.u32 %s1918_s11, 4  ;;  %p1866_p8 = scmp.ne.s32.totalorder %s2547_s4, %s1865_s15  ;;  %s38_s12 = int_to_ptr.vmem [resolvable:$true] %s37_s12 }
  0x15   :  { %p1869_p9 = scmp.lt.u32.totalorder %s1865_s15, %s2547_s4 }
  0x17   :  { %p1871_p10 = pnand %p1869_p9, %p1866_p8 }
  0x19   :  { %1874 = shalt.err (!%p1871_p10)
}
  0x1a   :  { %s1875_s20 = scalar_lea.vmem %s38_s12, 2048  ;;  %p1880_p12 = scmp.lt.s32.totalorder %s38_s12, %s38_s12 }
  0x1b   :  { %p1876_p11 = scmp.ne.s32.totalorder %s38_s12, %s1875_s20  ;;  %p1881_p13 = scmp.lt.s32.totalorder %s1875_s20, %s1875_s20 }
  0x1d   :  { %p1882_p0 = por %p1881_p13, %p1880_p12 }
  0x1f   :  { %p1883_p1 = pnand %p1882_p0, %p1876_p11 }
  0x21   :  { %1886 = shalt.err (!%p1883_p1)
}
  0x22   :  { %s1919_s2 = smov 128   ;;  %s1920_s21 = smov 8  }
  0x23   :  { %43 = dma.hbm_to_vmem [thread:$0]  %s2547_s4, 2048, %s38_s12, [#allocation9], %s1919_s2, %s1919_s2, %s1920_s21  }
  0x24   :  { %1909 = dma.done.wait [#allocation6], 4096  }
  0x25   :  { %1910 = vsyncadd [#allocation6], 4294963200 }
  0x26   :  { %1911 = dma.done.wait [#allocation9], 2048  }
  0x27   :  { %1912 = vsyncadd [#allocation9], 4294965248  ;;  %v2552_v0 = vmov 0   ;;  %v67_v1 = vld [vmem:[%s2544_s1] sm:$0xff]  ;;  %vm134_vm0 = vcmask 1043456   ;;  %v68_v2 = vld [vmem:[%s2544_s1 + $0x8] sm:$0xff]  ;;  %v71_v46 = vlaneseq }
  0x28   :  { %179 = vmatprep.mubr.bf16.mxu0 %v2552_v0  ;;  %252 = vmatprep.mubr.bf16.mxu1 %v2552_v0  ;;  %v1542_v3 = vcombine.high %v67_v1, %v67_v1  ;;  %v1544_v4 = vcombine.high %v68_v2, %v68_v2  ;;  %v1541_v5 = vcombine.low %v67_v1, %v67_v1  ;;  %v1679_v7 = vld [vmem:[%s2543_s0] sm:$0xff]   ;;  %v1998_v11 = vld [vmem:[#allocation5 + $0xc] ss:$16 sps:$4 sm:$0xff]   ;;  %vm121_vm1 = vcmask 64512   ;;  %v2002_v13 = vld [vmem:[#allocation5 + $0x8] ss:$16 sps:$4 sm:$0xff]  }
  0x29   :  { %v1543_v6 = vcombine.low %v68_v2, %v68_v2  ;;  %v1996_v8 = vld [vmem:[#allocation5 + $0x4] ss:$16 sps:$4 sm:$0xff]   ;;  %v2000_v12 = vld [vmem:[#allocation5] ss:$16 sps:$4 sm:$0xff]   ;;  %v2008_v15 = vld [vmem:[#allocation5 + $0x2c] ss:$16 sps:$4 sm:$0xff]  }
  0x2a   :  { %1545 = vmatprep.subr.msk.bf16.mxu0 %vm134_vm0, %v1542_v3  ;;  %1550 = vmatprep.subr.msk.bf16.mxu1 %vm134_vm0, %v1544_v4  ;;  %v136_v9 = vsel %vm134_vm0, %v1541_v5, 0  ;;  %v2006_v14 = vld [vmem:[#allocation5 + $0x24] ss:$16 sps:$4 sm:$0xff]   ;;  %v2010_v16 = vld [vmem:[#allocation5 + $0x20] ss:$16 sps:$4 sm:$0xff]   ;;  %v1692_v20 = vld [vmem:[%s2543_s0 + $0x8] sm:$0xff]  }
  0x2b   :  { %v142_v10 = vsel %vm134_vm0, %v1543_v6, 0  ;;  %148 = vmatpush1.bf16.msra.mxu0 %v136_v9  ;;  %v2014_v17 = vld [vmem:[#allocation5 + $0x28] ss:$16 sps:$4 sm:$0xff]   ;;  %v2018_v18 = vld [vmem:[#allocation5 + $0x44] ss:$16 sps:$4 sm:$0xff]   ;;  %v2550_v45 = vmov 0.0|0.0  }
  0x2c   :  { %221 = vmatpush1.bf16.msra.mxu1 %v142_v10  ;;  %527 = vmatprep.subr.bf16.mxu0 %v1996_v8  ;;  %v2022_v19 = vld [vmem:[#allocation5 + $0x4c] ss:$16 sps:$4 sm:$0xff]   ;;  %v2029_v21 = vld [vmem:[#allocation5 + $0x40] ss:$16 sps:$4 sm:$0xff]   ;;  %v2033_v22 = vld [vmem:[#allocation5 + $0x48] ss:$16 sps:$4 sm:$0xff]  }
  0x2d   :  { %568 = vmatprep.subr.bf16.mxu1 %v1998_v11  ;;  %v2035_v23 = vld [vmem:[#allocation5 + $0x64] ss:$16 sps:$4 sm:$0xff]   ;;  %v2039_v24 = vld [vmem:[#allocation5 + $0x6c] ss:$16 sps:$4 sm:$0xff]   ;;  %v2045_v25 = vld [vmem:[#allocation5 + $0x60] ss:$16 sps:$4 sm:$0xff]  }
  0x2e   :  { %1546 = vmatmul.mubr.msk.bf16.vlgmr.msra.gmra.mrb[0].mxu0 %vm121_vm1, %v1679_v7  ;;  %v2047_v26 = vld [vmem:[#allocation5 + $0x68] ss:$16 sps:$4 sm:$0xff]   ;;  %v2049_v27 = vld [vmem:[#allocation5 + $0x84] ss:$16 sps:$4 sm:$0xff]   ;;  %v2053_v28 = vld [vmem:[#allocation5 + $0x8c] ss:$16 sps:$4 sm:$0xff]  }
  0x2f   :  { %1551 = vmatmul.mubr.msk.bf16.vlgmr.msra.gmra.mrb[0].mxu1 %vm121_vm1, %v1679_v7  ;;  %528 = vmatpush1.bf16.msra.mxu0 %v2000_v12  ;;  %v1705_v29 = vld [vmem:[%s2543_s0 + $0x10] sm:$0xff]   ;;  %v2062_v31 = vld [vmem:[#allocation5 + $0x88] ss:$16 sps:$4 sm:$0xff]   ;;  %v2070_v33 = vld [vmem:[#allocation5 + $0xac] ss:$16 sps:$4 sm:$0xff]   ;;  %v72_v47 = vshrl.u32 %v71_v46, 7 }
  0x30   :  { %569 = vmatpush1.bf16.msra.mxu1 %v2002_v13  ;;  %529 = vmatprep.subr.bf16.mxu0 %v2006_v14  ;;  %v2060_v30 = vld [vmem:[#allocation5 + $0x80] ss:$16 sps:$4 sm:$0xff]   ;;  %v2066_v32 = vld [vmem:[#allocation5 + $0xa4] ss:$16 sps:$4 sm:$0xff]   ;;  %v2078_v35 = vld [vmem:[#allocation5 + $0xa8] ss:$16 sps:$4 sm:$0xff]  }
  0x31   :  { %570 = vmatprep.subr.bf16.mxu1 %v2008_v15  ;;  %189 = vmatprep.mubr.bf16.mxu0 %v2552_v0  ;;  %v2074_v34 = vld [vmem:[#allocation5 + $0xa0] ss:$16 sps:$4 sm:$0xff]   ;;  %v2082_v36 = vld [vmem:[#allocation5 + $0xc4] ss:$16 sps:$4 sm:$0xff]   ;;  %v2084_v37 = vld [vmem:[#allocation5 + $0xcc] ss:$16 sps:$4 sm:$0xff]  }
  0x32   :  { %262 = vmatprep.mubr.bf16.mxu1 %v2552_v0  ;;  %v1718_v38 = vld [vmem:[%s2543_s0 + $0x18] sm:$0xff]   ;;  %v2093_v39 = vld [vmem:[#allocation5 + $0xc0] ss:$16 sps:$4 sm:$0xff]   ;;  %v2099_v41 = vld [vmem:[#allocation5 + $0xe4] ss:$16 sps:$4 sm:$0xff]   ;;  %v81_v48 = vsub.s32 2, %v72_v47 }
  0x33   :  { %530 = vmatpush1.bf16.msra.mxu0 %v2010_v16  ;;  %v2095_v40 = vld [vmem:[#allocation5 + $0xc8] ss:$16 sps:$4 sm:$0xff]   ;;  %v2101_v42 = vld [vmem:[#allocation5 + $0xec] ss:$16 sps:$4 sm:$0xff]   ;;  %v2107_v43 = vld [vmem:[#allocation5 + $0xe0] ss:$16 sps:$4 sm:$0xff]  }
  0x34   :  { %571 = vmatpush1.bf16.msra.mxu1 %v2014_v17  ;;  %531 = vmatprep.subr.bf16.mxu0 %v2018_v18  ;;  %v2109_v44 = vld [vmem:[#allocation5 + $0xe8] ss:$16 sps:$4 sm:$0xff]   ;;  %v85_v49 = vsub.s32 3, %v72_v47  ;;  %v73_v50 = vsub.s32 0, %v72_v47  ;;  %v69_v51 = vld [vmem:[%s2546_s3] sm:$0xf] }
  0x35   :  { %572 = vmatprep.subr.bf16.mxu1 %v2022_v19  ;;  %v77_v52 = vsub.s32 1, %v72_v47  ;;  %v2158_v53 = vrot.slane %v69_v51, %v81_v48  ;;  %vm1923_vm2 = vmmov 0   ;;  %s1925_s12 = smov [#allocation10]  }
  0x36   :  { %1547 = vmatmul.mubr.msk.bf16.gmra.mrb[4].mxu0 %vm121_vm1, %v1692_v20  ;;  %v2164_v56 = vrot.slane %v69_v51, %v85_v49  ;;  %v74_v57 = vrot.slane %v69_v51, %v73_v50  ;;  %s1520_s13 = sshll.u32 %s1925_s12, 4  ;;  %s1521_s13 = int_to_ptr.vmem [resolvable:$true] %s1520_s13 }
  0x37   :  { %1552 = vmatmul.mubr.msk.bf16.gmra.mrb[4].mxu1 %vm121_vm1, %v1692_v20  ;;  %532 = vmatpush1.bf16.msra.mxu0 %v2029_v21  ;;  %v78_v60 = vrot.slane %v69_v51, %v77_v52  ;;  %s1887_s14 = scalar_lea.vmem %s1521_s13, 128  ;;  %p1892_p3 = scmp.lt.s32.totalorder %s1521_s13, %s1521_s13 }
  0x38   :  { %573 = vmatpush1.bf16.msra.mxu1 %v2033_v22  ;;  %533 = vmatprep.subr.bf16.mxu0 %v2035_v23  ;;  %p1888_p2 = scmp.ne.s32.totalorder %s1521_s13, %s1887_s14  ;;  %p1893_p4 = scmp.lt.s32.totalorder %s1887_s14, %s1887_s14 }
  0x39   :  { %574 = vmatprep.subr.bf16.mxu1 %v2039_v24  ;;  %199 = vmatprep.mubr.bf16.mxu0 %v2552_v0 }
  0x3a   :  { %272 = vmatprep.mubr.bf16.mxu1 %v2552_v0  ;;  %p1894_p5 = por %p1893_p4, %p1892_p3 }
  0x3b   :  { %534 = vmatpush1.bf16.msra.mxu0 %v2045_v25 }
  0x3c   :  { %575 = vmatpush1.bf16.msra.mxu1 %v2047_v26  ;;  %535 = vmatprep.subr.bf16.mxu0 %v2049_v27  ;;  %p1895_p6 = pnand %p1894_p5, %p1888_p2 }
  0x3d   :  { %576 = vmatprep.subr.bf16.mxu1 %v2053_v28 }
  0x3e   :  { %1548 = vmatmul.mubr.msk.bf16.gmra.mrb[8].mxu0 %vm121_vm1, %v1705_v29 }
  0x3f   :  { %1553 = vmatmul.mubr.msk.bf16.gmra.mrb[8].mxu1 %vm121_vm1, %v1705_v29  ;;  %536 = vmatpush1.bf16.msra.mxu0 %v2060_v30 }
  0x40   :  { %577 = vmatpush1.bf16.msra.mxu1 %v2062_v31  ;;  %537 = vmatprep.subr.bf16.mxu0 %v2066_v32 }
  0x41   :  { %578 = vmatprep.subr.bf16.mxu1 %v2070_v33  ;;  %209 = vmatprep.mubr.bf16.mxu0 %v2552_v0 }
  0x42   :  { %282 = vmatprep.mubr.bf16.mxu1 %v2552_v0 }
  0x43   :  { %538 = vmatpush1.bf16.msra.mxu0 %v2074_v34 }
  0x44   :  { %579 = vmatpush1.bf16.msra.mxu1 %v2078_v35  ;;  %539 = vmatprep.subr.bf16.mxu0 %v2082_v36 }
  0x45   :  { %580 = vmatprep.subr.bf16.mxu1 %v2084_v37 }
  0x46   :  { %1549 = vmatmul.mubr.msk.bf16.gmra.mrb[12].mxu0 %vm121_vm1, %v1718_v38 }
  0x47   :  { %1554 = vmatmul.mubr.msk.bf16.gmra.mrb[12].mxu1 %vm121_vm1, %v1718_v38  ;;  %540 = vmatpush1.bf16.msra.mxu0 %v2093_v39 }
  0x48   :  { %581 = vmatpush1.bf16.msra.mxu1 %v2095_v40  ;;  %541 = vmatprep.subr.bf16.mxu0 %v2099_v41 }
  0x49   :  { %582 = vmatprep.subr.bf16.mxu1 %v2101_v42  ;;  %559 = vmatprep.mubr.bf16.mxu0 %v2552_v0 }
  0x4a   :  { %600 = vmatprep.mubr.bf16.mxu1 %v2552_v0 }
  0x4b   :  { %542 = vmatpush1.bf16.msra.mxu0 %v2107_v43 }
  0x4c   :  { %583 = vmatpush1.bf16.msra.mxu1 %v2109_v44  ;;  %639 = vmatprep.subr.bf16.mxu0 %v1996_v8 }
  0x4d   :  { %680 = vmatprep.subr.bf16.mxu1 %v1998_v11 }
  0x4e   :  { %560 = vmatmul.mubr.bf16.vlgmr.msra.gmra.mrb[16].mxu0 %v2550_v45 }
  0x4f   :  { %601 = vmatmul.mubr.bf16.vlgmr.msra.gmra.mrb[16].mxu1 %v2550_v45  ;;  %640 = vmatpush1.bf16.msra.mxu0 %v2000_v12 }
  0x50   :  { %681 = vmatpush1.bf16.msra.mxu1 %v2002_v13  ;;  %641 = vmatprep.subr.bf16.mxu0 %v2006_v14 }
  0x51   :  { %682 = vmatprep.subr.bf16.mxu1 %v2008_v15  ;;  %671 = vmatprep.mubr.bf16.mxu0 %v2552_v0 }
  0x52   :  { %712 = vmatprep.mubr.bf16.mxu1 %v2552_v0 }
  0x53   :  { %642 = vmatpush1.bf16.msra.mxu0 %v2010_v16 }
  0x54   :  { %683 = vmatpush1.bf16.msra.mxu1 %v2014_v17  ;;  %643 = vmatprep.subr.bf16.mxu0 %v2018_v18 }
  0x55   :  { %684 = vmatprep.subr.bf16.mxu1 %v2022_v19 }
  0x57   :  { %644 = vmatpush1.bf16.msra.mxu0 %v2029_v21 }
  0x58   :  { %685 = vmatpush1.bf16.msra.mxu1 %v2033_v22  ;;  %645 = vmatprep.subr.bf16.mxu0 %v2035_v23 }
  0x59   :  { %686 = vmatprep.subr.bf16.mxu1 %v2039_v24 }
  0x5b   :  { %646 = vmatpush1.bf16.msra.mxu0 %v2045_v25 }
  0x5c   :  { %687 = vmatpush1.bf16.msra.mxu1 %v2047_v26  ;;  %647 = vmatprep.subr.bf16.mxu0 %v2049_v27 }
  0x5d   :  { %688 = vmatprep.subr.bf16.mxu1 %v2053_v28 }
  0x5f   :  { %648 = vmatpush1.bf16.msra.mxu0 %v2060_v30 }
  0x60   :  { %689 = vmatpush1.bf16.msra.mxu1 %v2062_v31  ;;  %649 = vmatprep.subr.bf16.mxu0 %v2066_v32 }
  0x61   :  { %690 = vmatprep.subr.bf16.mxu1 %v2070_v33 }
  0x63   :  { %650 = vmatpush1.bf16.msra.mxu0 %v2074_v34 }
  0x64   :  { %691 = vmatpush1.bf16.msra.mxu1 %v2078_v35  ;;  %651 = vmatprep.subr.bf16.mxu0 %v2082_v36 }
  0x65   :  { %692 = vmatprep.subr.bf16.mxu1 %v2084_v37 }
  0x67   :  { %652 = vmatpush1.bf16.msra.mxu0 %v2093_v39 }
  0x68   :  { %693 = vmatpush1.bf16.msra.mxu1 %v2095_v40  ;;  %653 = vmatprep.subr.bf16.mxu0 %v2099_v41 }
  0x69   :  { %694 = vmatprep.subr.bf16.mxu1 %v2101_v42 }
  0x6b   :  { %654 = vmatpush1.bf16.msra.mxu0 %v2107_v43 }
  0x6c   :  { %695 = vmatpush1.bf16.msra.mxu1 %v2109_v44  ;;  %751 = vmatprep.subr.bf16.mxu0 %v1996_v8 }
  0x6d   :  { %792 = vmatprep.subr.bf16.mxu1 %v1998_v11 }
 0x101   :  { %v2160_v54 = vpop.f32.mrb[0].mxu0 }
 0x102   :  { %v2162_v55 = vpop.f32.mrb[0].mxu1  ;;  %v183_v58 = vpop.f32.mrb[1].mxu0 }
 0x103   :  { %v256_v59 = vpop.f32.mrb[1].mxu1  ;;  %v185_v61 = vpop.f32.mrb[2].mxu0 }
 0x104   :  { %v258_v62 = vpop.f32.mrb[2].mxu1  ;;  %v2166_v63 = vadd.f32 %v185_v61, %v74_v57  ;;  %v187_v1 = vpop.f32.mrb[3].mxu0 }
 0x105   :  { %v2169_v2 = vadd.f32 %v258_v62, %v2158_v53  ;;  %v260_v3 = vpop.f32.mrb[3].mxu1  ;;  %v2171_v4 = vadd.f32 %v187_v1, %v78_v60 }
 0x106   :  { %v2174_v5 = vadd.f32 %v260_v3, %v2164_v56 }
 0x109   :  { %v191_v6 = vpop.f32.mrb[4].mxu0 }
 0x10a   :  { %v264_v7 = vpop.f32.mrb[4].mxu1  ;;  %v2176_v9 = vadd.f32 %v191_v6, %v74_v57  ;;  %v193_v10 = vpop.f32.mrb[5].mxu0 }
 0x10b   :  { %v2179_v20 = vadd.f32 %v264_v7, %v2158_v53  ;;  %v266_v29 = vpop.f32.mrb[5].mxu1  ;;  %v2181_v38 = vadd.f32 %v193_v10, %v78_v60  ;;  %v195_v46 = vpop.f32.mrb[6].mxu0 }
 0x10c   :  { %v2184_v47 = vadd.f32 %v266_v29, %v2164_v56  ;;  %v268_v48 = vpop.f32.mrb[6].mxu1  ;;  %v2186_v49 = vadd.f32 %v195_v46, %v74_v57  ;;  %v197_v50 = vpop.f32.mrb[7].mxu0 }
 0x10d   :  { %v2189_v51 = vadd.f32 %v268_v48, %v2158_v53  ;;  %v270_v52 = vpop.f32.mrb[7].mxu1  ;;  %v2191_v61 = vadd.f32 %v197_v50, %v78_v60 }
 0x10e   :  { %2554 = vst [vmem:[#allocation14_spill] sm:$0xff] %v2184_v47  ;;  %2555 = vst [vmem:[#allocation15_spill] sm:$0xff] %v2186_v49  ;;  %v2194_v62 = vadd.f32 %v270_v52, %v2164_v56 }
 0x10f   :  { %2556 = vst [vmem:[#allocation16_spill] sm:$0xff] %v2189_v51  ;;  %2557 = vst [vmem:[#allocation17_spill] sm:$0xff] %v2191_v61 }
 0x110   :  { %2558 = vst [vmem:[#allocation18_spill] sm:$0xff] %v2194_v62 }
 0x111   :  { %v201_v1 = vpop.f32.mrb[8].mxu0 }
 0x112   :  { %v274_v3 = vpop.f32.mrb[8].mxu1  ;;  %v2196_v6 = vadd.f32 %v201_v1, %v74_v57  ;;  %v203_v7 = vpop.f32.mrb[9].mxu0 }
 0x113   :  { %v2199_v10 = vadd.f32 %v274_v3, %v2158_v53  ;;  %v276_v29 = vpop.f32.mrb[9].mxu1  ;;  %v2201_v46 = vadd.f32 %v203_v7, %v78_v60  ;;  %v205_v45 = vpop.f32.mrb[10].mxu0 }
 0x114   :  { %2559 = vst [vmem:[#allocation19_spill] sm:$0xff] %v2196_v6  ;;  %v2204_v48 = vadd.f32 %v276_v29, %v2164_v56  ;;  %v278_v50 = vpop.f32.mrb[10].mxu1  ;;  %v2206_v0 = vadd.f32 %v205_v45, %v74_v57  ;;  %v207_v52 = vpop.f32.mrb[11].mxu0 }
 0x115   :  { %2560 = vst [vmem:[#allocation20_spill] sm:$0xff] %v2199_v10  ;;  %2561 = vst [vmem:[#allocation21_spill] sm:$0xff] %v2201_v46  ;;  %v2209_v62 = vadd.f32 %v278_v50, %v2158_v53  ;;  %v280_v1 = vpop.f32.mrb[11].mxu1  ;;  %v2211_v6 = vadd.f32 %v207_v52, %v78_v60 }
 0x116   :  { %2562 = vst [vmem:[#allocation22_spill] sm:$0xff] %v2204_v48  ;;  %2563 = vst [vmem:[#allocation23_spill] sm:$0xff] %v2206_v0  ;;  %v2214_v3 = vadd.f32 %v280_v1, %v2164_v56 }
 0x117   :  { %2564 = vst [vmem:[#allocation24_spill] sm:$0xff] %v2209_v62  ;;  %2565 = vst [vmem:[#allocation25_spill] sm:$0xff] %v2211_v6 }
 0x118   :  { %2566 = vst [vmem:[#allocation26_spill] sm:$0xff] %v2214_v3 }
 0x119   :  { %v211_v10 = vpop.f32.mrb[12].mxu0 }
 0x11a   :  { %v284_v7 = vpop.f32.mrb[12].mxu1  ;;  %v2216_v46 = vadd.f32 %v211_v10, %v74_v57  ;;  %v213_v61 = vpop.f32.mrb[13].mxu0 }
 0x11b   :  { %v2219_v29 = vadd.f32 %v284_v7, %v2158_v53  ;;  %v286_v45 = vpop.f32.mrb[13].mxu1  ;;  %v2221_v0 = vadd.f32 %v213_v61, %v78_v60  ;;  %v215_v48 = vpop.f32.mrb[14].mxu0  ;;  %v182_v61 = vadd.f32 %v2160_v54, %v74_v57 }
 0x11c   :  { %2567 = vst [vmem:[#allocation27_spill] sm:$0xff] %v2216_v46  ;;  %v2224_v50 = vadd.f32 %v286_v45, %v2164_v56  ;;  %v288_v52 = vpop.f32.mrb[14].mxu1  ;;  %v2226_v6 = vadd.f32 %v215_v48, %v74_v57  ;;  %v217_v1 = vpop.f32.mrb[15].mxu0  ;;  %v184_v45 = vadd.f32 %v183_v58, %v78_v60 }
 0x11d   :  { %2568 = vst [vmem:[#allocation28_spill] sm:$0xff] %v2219_v29  ;;  %2569 = vst [vmem:[#allocation29_spill] sm:$0xff] %v2221_v0  ;;  %v2229_v3 = vadd.f32 %v288_v52, %v2158_v53  ;;  %v290_v10 = vpop.f32.mrb[15].mxu1  ;;  %v2231_v46 = vadd.f32 %v217_v1, %v78_v60  ;;  %v255_v0 = vadd.f32 %v2162_v55, %v2158_v53 }
 0x11e   :  { %2570 = vst [vmem:[#allocation30_spill] sm:$0xff] %v2224_v50  ;;  %2571 = vst [vmem:[#allocation31_spill] sm:$0xff] %v2226_v6  ;;  %v2234_v7 = vadd.f32 %v290_v10, %v2164_v56  ;;  %v257_v50 = vadd.f32 %v256_v59, %v2164_v56 }
 0x11f   :  { %2572 = vst [vmem:[#allocation32_spill] sm:$0xff] %v2229_v3  ;;  %2573 = vst [vmem:[#allocation33_spill] sm:$0xff] %v2231_v46 }
 0x120   :  { %2574 = vst [vmem:[#allocation34_spill] sm:$0xff] %v2234_v7 }
 0x121   :  { %v561_v48 = vpop.f32.mrb[16].mxu0 }
 0x122   :  { %v602_v6 = vpop.f32.mrb[16].mxu1  ;;  %v609_v29 = vadd.f32 %v561_v48, %v182_v61  ;;  %v563_v52 = vpop.f32.mrb[17].mxu0 }
 0x123   :  { %v611_v62 = vadd.f32 %v602_v6, %v255_v0  ;;  %v604_v3 = vpop.f32.mrb[17].mxu1  ;;  %v610_v51 = vadd.f32 %v563_v52, %v184_v45  ;;  %v565_v46 = vpop.f32.mrb[18].mxu0 }
 0x124   :  { %v612_v1 = vadd.f32 %v604_v3, %v257_v50  ;;  %v606_v49 = vpop.f32.mrb[18].mxu1  ;;  %v613_v10 = vmul.f32 0.5, %v609_v29  ;;  %v566_v7 = vpop.f32.mrb[19].mxu0 }
 0x125   :  { %v607_v47 = vpop.f32.mrb[19].mxu1  ;;  %v614_v54 = vmul.f32 0.5, %v610_v51  ;;  %v615_v53 = vmul.f32 0.5, %v611_v62  ;;  %v2575_v7 = vmov 0  }
 0x126   :  { %1731 = vtanh.f32 %v613_v10 }
 0x127   :  { %1733 = vtanh.f32 %v614_v54 }
 0x128   :  { %1735 = vtanh.f32 %v612_v1 }
 0x129   :  { %1737 = vtanh.f32 %v615_v53 }
 0x130   :  { %v1732_v55 = vpop.eup %1731 }
 0x131   :  { %v619_v56 = vadd.f32 1.0, %v1732_v55  ;;  %v1734_v57 = vpop.eup %1733 }
 0x132   :  { %v620_v0 = vadd.f32 1.0, %v1734_v57  ;;  %v1736_v59 = vpop.eup %1735 }
 0x133   :  { %v622_v58 = vmul.f32 0.5, %v619_v56  ;;  %v1738_v47 = vpop.eup %1737 }
 0x134   :  { %v623_v60 = vmul.f32 0.5, %v620_v0  ;;  %v621_v49 = vadd.f32 1.0, %v1738_v47 }
 0x135   :  { %v627_v6 = vmul.f32 %v1736_v59, %v622_v58 }
 0x136   :  { %v626_v3 = vmul.f32 0.0, %v623_v60  ;;  %v624_v51 = vmul.f32 0.5, %v621_v49 }
 0x138   :  { %v2240_v46 = vadd.f32 %v627_v6, %v626_v3 }
 0x13a   :  { %1739 = vtanh.f32 %v2240_v46 }
 0x144   :  { %v1740_v29 = vpop.eup %1739 }
 0x145   :  { %v630_v50 = vmul.f32 %v1740_v29, %v624_v51 }
 0x147   :  { %v638_v62 = vpack.c.bf16 %v630_v50, %v630_v50 }
 0x149   :  { %672 = vmatmul.mubr.bf16.vlgmr.msra.gmra.mrb[20].mxu0 %v638_v62  ;;  %713 = vmatmul.mubr.bf16.vlgmr.msra.gmra.mrb[20].mxu1 %v638_v62 }
 0x14a   :  { %752 = vmatpush1.bf16.msra.mxu0 %v2000_v12  ;;  %793 = vmatpush1.bf16.msra.mxu1 %v2002_v13 }
 0x14b   :  { %753 = vmatprep.subr.bf16.mxu0 %v2006_v14  ;;  %794 = vmatprep.subr.bf16.mxu1 %v2008_v15 }
 0x14c   :  { %783 = vmatprep.mubr.bf16.mxu0 %v2575_v7  ;;  %824 = vmatprep.mubr.bf16.mxu1 %v2575_v7 }
 0x14e   :  { %754 = vmatpush1.bf16.msra.mxu0 %v2010_v16  ;;  %795 = vmatpush1.bf16.msra.mxu1 %v2014_v17 }
 0x14f   :  { %755 = vmatprep.subr.bf16.mxu0 %v2018_v18  ;;  %796 = vmatprep.subr.bf16.mxu1 %v2022_v19 }
 0x152   :  { %756 = vmatpush1.bf16.msra.mxu0 %v2029_v21  ;;  %797 = vmatpush1.bf16.msra.mxu1 %v2033_v22 }
 0x153   :  { %757 = vmatprep.subr.bf16.mxu0 %v2035_v23  ;;  %798 = vmatprep.subr.bf16.mxu1 %v2039_v24 }
 0x156   :  { %758 = vmatpush1.bf16.msra.mxu0 %v2045_v25  ;;  %799 = vmatpush1.bf16.msra.mxu1 %v2047_v26 }
 0x157   :  { %759 = vmatprep.subr.bf16.mxu0 %v2049_v27  ;;  %800 = vmatprep.subr.bf16.mxu1 %v2053_v28 }
 0x15a   :  { %760 = vmatpush1.bf16.msra.mxu0 %v2060_v30  ;;  %801 = vmatpush1.bf16.msra.mxu1 %v2062_v31 }
 0x15b   :  { %761 = vmatprep.subr.bf16.mxu0 %v2066_v32  ;;  %802 = vmatprep.subr.bf16.mxu1 %v2070_v33 }
 0x15e   :  { %762 = vmatpush1.bf16.msra.mxu0 %v2074_v34  ;;  %803 = vmatpush1.bf16.msra.mxu1 %v2078_v35 }
 0x15f   :  { %763 = vmatprep.subr.bf16.mxu0 %v2082_v36  ;;  %804 = vmatprep.subr.bf16.mxu1 %v2084_v37 }
 0x162   :  { %764 = vmatpush1.bf16.msra.mxu0 %v2093_v39  ;;  %805 = vmatpush1.bf16.msra.mxu1 %v2095_v40 }
 0x163   :  { %765 = vmatprep.subr.bf16.mxu0 %v2099_v41  ;;  %806 = vmatprep.subr.bf16.mxu1 %v2101_v42 }
 0x166   :  { %766 = vmatpush1.bf16.msra.mxu0 %v2107_v43  ;;  %807 = vmatpush1.bf16.msra.mxu1 %v2109_v44 }
 0x167   :  { %863 = vmatprep.subr.bf16.mxu0 %v1996_v8  ;;  %904 = vmatprep.subr.bf16.mxu1 %v1998_v11 }
 0x21c   :  { %v673_v61 = vpop.f32.mrb[20].mxu0  ;;  %v714_v45 = vpop.f32.mrb[20].mxu1 }
 0x21d   :  { %v721_v48 = vadd.f32 %v673_v61, %v2166_v63  ;;  %v723_v52 = vadd.f32 %v714_v45, %v2169_v2  ;;  %v675_v1 = vpop.f32.mrb[21].mxu0  ;;  %v716_v10 = vpop.f32.mrb[21].mxu1 }
 0x21e   :  { %v722_v54 = vadd.f32 %v675_v1, %v2171_v4  ;;  %v724_v53 = vadd.f32 %v716_v10, %v2174_v5  ;;  %v677_v55 = vpop.f32.mrb[22].mxu0  ;;  %v718_v56 = vpop.f32.mrb[22].mxu1 }
 0x21f   :  { %v725_v57 = vmul.f32 0.5, %v721_v48  ;;  %v678_v58 = vpop.f32.mrb[23].mxu0  ;;  %v719_v0 = vpop.f32.mrb[23].mxu1  ;;  %v727_v60 = vmul.f32 0.5, %v723_v52 }
 0x220   :  { %v726_v59 = vmul.f32 0.5, %v722_v54 }
 0x221   :  { %1741 = vtanh.f32 %v725_v57  ;;  %v2576_v57 = vld [vmem:[#allocation14_spill] sm:$0xff] }
 0x222   :  { %1743 = vtanh.f32 %v726_v59 }
 0x223   :  { %1745 = vtanh.f32 %v724_v53 }
 0x224   :  { %1747 = vtanh.f32 %v727_v60 }
 0x22b   :  { %v1742_v6 = vpop.eup %1741 }
 0x22c   :  { %v731_v63 = vadd.f32 1.0, %v1742_v6  ;;  %v1744_v3 = vpop.eup %1743 }
 0x22d   :  { %v732_v47 = vadd.f32 1.0, %v1744_v3  ;;  %v1746_v49 = vpop.eup %1745 }
 0x22e   :  { %v734_v2 = vmul.f32 0.5, %v731_v63  ;;  %v1748_v50 = vpop.eup %1747 }
 0x22f   :  { %v735_v4 = vmul.f32 0.5, %v732_v47  ;;  %v733_v62 = vadd.f32 1.0, %v1748_v50 }
 0x230   :  { %v739_v51 = vmul.f32 %v1746_v49, %v734_v2 }
 0x231   :  { %v738_v5 = vmul.f32 %v735_v4, %v2240_v46  ;;  %v736_v61 = vmul.f32 0.5, %v733_v62 }
 0x233   :  { %v2282_v29 = vadd.f32 %v739_v51, %v738_v5 }
 0x235   :  { %1749 = vtanh.f32 %v2282_v29 }
 0x23f   :  { %v1750_v45 = vpop.eup %1749 }
 0x240   :  { %v742_v48 = vmul.f32 %v1750_v45, %v736_v61 }
 0x242   :  { %v750_v52 = vpack.c.bf16 %v742_v48, %v742_v48 }
 0x244   :  { %784 = vmatmul.mubr.bf16.vlgmr.msra.gmra.mrb[24].mxu0 %v750_v52  ;;  %825 = vmatmul.mubr.bf16.vlgmr.msra.gmra.mrb[24].mxu1 %v750_v52 }
 0x245   :  { %864 = vmatpush1.bf16.msra.mxu0 %v2000_v12  ;;  %905 = vmatpush1.bf16.msra.mxu1 %v2002_v13 }
 0x246   :  { %865 = vmatprep.subr.bf16.mxu0 %v2006_v14  ;;  %906 = vmatprep.subr.bf16.mxu1 %v2008_v15 }
 0x247   :  { %895 = vmatprep.mubr.bf16.mxu0 %v2575_v7  ;;  %936 = vmatprep.mubr.bf16.mxu1 %v2575_v7 }
 0x249   :  { %866 = vmatpush1.bf16.msra.mxu0 %v2010_v16  ;;  %907 = vmatpush1.bf16.msra.mxu1 %v2014_v17 }
 0x24a   :  { %867 = vmatprep.subr.bf16.mxu0 %v2018_v18  ;;  %908 = vmatprep.subr.bf16.mxu1 %v2022_v19 }
 0x24d   :  { %868 = vmatpush1.bf16.msra.mxu0 %v2029_v21  ;;  %909 = vmatpush1.bf16.msra.mxu1 %v2033_v22 }
 0x24e   :  { %869 = vmatprep.subr.bf16.mxu0 %v2035_v23  ;;  %910 = vmatprep.subr.bf16.mxu1 %v2039_v24 }
 0x251   :  { %870 = vmatpush1.bf16.msra.mxu0 %v2045_v25  ;;  %911 = vmatpush1.bf16.msra.mxu1 %v2047_v26 }
 0x252   :  { %871 = vmatprep.subr.bf16.mxu0 %v2049_v27  ;;  %912 = vmatprep.subr.bf16.mxu1 %v2053_v28 }
 0x255   :  { %872 = vmatpush1.bf16.msra.mxu0 %v2060_v30  ;;  %913 = vmatpush1.bf16.msra.mxu1 %v2062_v31 }
 0x256   :  { %873 = vmatprep.subr.bf16.mxu0 %v2066_v32  ;;  %914 = vmatprep.subr.bf16.mxu1 %v2070_v33 }
 0x259   :  { %874 = vmatpush1.bf16.msra.mxu0 %v2074_v34  ;;  %915 = vmatpush1.bf16.msra.mxu1 %v2078_v35 }
 0x25a   :  { %875 = vmatprep.subr.bf16.mxu0 %v2082_v36  ;;  %916 = vmatprep.subr.bf16.mxu1 %v2084_v37 }
 0x25d   :  { %876 = vmatpush1.bf16.msra.mxu0 %v2093_v39  ;;  %917 = vmatpush1.bf16.msra.mxu1 %v2095_v40 }
 0x25e   :  { %877 = vmatprep.subr.bf16.mxu0 %v2099_v41  ;;  %918 = vmatprep.subr.bf16.mxu1 %v2101_v42 }
 0x261   :  { %878 = vmatpush1.bf16.msra.mxu0 %v2107_v43  ;;  %919 = vmatpush1.bf16.msra.mxu1 %v2109_v44 }
 0x262   :  { %975 = vmatprep.subr.bf16.mxu0 %v1996_v8  ;;  %1016 = vmatprep.subr.bf16.mxu1 %v1998_v11 }
 0x317   :  { %v785_v46 = vpop.f32.mrb[24].mxu0  ;;  %v826_v1 = vpop.f32.mrb[24].mxu1 }
 0x318   :  { %v833_v10 = vadd.f32 %v785_v46, %v2176_v9  ;;  %v835_v54 = vadd.f32 %v826_v1, %v2179_v20  ;;  %v787_v53 = vpop.f32.mrb[25].mxu0  ;;  %v828_v55 = vpop.f32.mrb[25].mxu1 }
 0x319   :  { %v834_v56 = vadd.f32 %v787_v53, %v2181_v38  ;;  %v836_v58 = vadd.f32 %v828_v55, %v2576_v57  ;;  %v789_v0 = vpop.f32.mrb[26].mxu0  ;;  %v830_v59 = vpop.f32.mrb[26].mxu1  ;;  %v2578_v55 = vld [vmem:[#allocation16_spill] sm:$0xff] }
 0x31a   :  { %v837_v60 = vmul.f32 0.5, %v833_v10  ;;  %v790_v6 = vpop.f32.mrb[27].mxu0  ;;  %v831_v63 = vpop.f32.mrb[27].mxu1  ;;  %v839_v2 = vmul.f32 0.5, %v835_v54  ;;  %v2577_v54 = vld [vmem:[#allocation15_spill] sm:$0xff]  ;;  %v2579_v0 = vld [vmem:[#allocation17_spill] sm:$0xff] }
 0x31b   :  { %v838_v3 = vmul.f32 0.5, %v834_v56 }
 0x31c   :  { %1751 = vtanh.f32 %v837_v60  ;;  %v2580_v60 = vld [vmem:[#allocation18_spill] sm:$0xff] }
 0x31d   :  { %1753 = vtanh.f32 %v838_v3 }
 0x31e   :  { %1755 = vtanh.f32 %v836_v58 }
 0x31f   :  { %1757 = vtanh.f32 %v839_v2 }
 0x326   :  { %v1752_v47 = vpop.eup %1751 }
 0x327   :  { %v843_v9 = vadd.f32 1.0, %v1752_v47  ;;  %v1754_v49 = vpop.eup %1753 }
 0x328   :  { %v844_v4 = vadd.f32 1.0, %v1754_v49  ;;  %v1756_v51 = vpop.eup %1755 }
 0x329   :  { %v846_v20 = vmul.f32 0.5, %v843_v9  ;;  %v1758_v61 = vpop.eup %1757 }
 0x32a   :  { %v847_v38 = vmul.f32 0.5, %v844_v4  ;;  %v845_v45 = vadd.f32 1.0, %v1758_v61 }
 0x32b   :  { %v851_v5 = vmul.f32 %v1756_v51, %v846_v20 }
 0x32c   :  { %v850_v50 = vmul.f32 %v847_v38, %v2282_v29  ;;  %v848_v48 = vmul.f32 0.5, %v845_v45 }
 0x32e   :  { %v2324_v62 = vadd.f32 %v851_v5, %v850_v50 }
 0x330   :  { %1759 = vtanh.f32 %v2324_v62 }
 0x33a   :  { %v1760_v52 = vpop.eup %1759 }
 0x33b   :  { %v854_v46 = vmul.f32 %v1760_v52, %v848_v48 }
 0x33d   :  { %v862_v1 = vpack.c.bf16 %v854_v46, %v854_v46 }
 0x33f   :  { %896 = vmatmul.mubr.bf16.vlgmr.msra.gmra.mrb[28].mxu0 %v862_v1  ;;  %937 = vmatmul.mubr.bf16.vlgmr.msra.gmra.mrb[28].mxu1 %v862_v1 }
 0x340   :  { %976 = vmatpush1.bf16.msra.mxu0 %v2000_v12  ;;  %1017 = vmatpush1.bf16.msra.mxu1 %v2002_v13 }
 0x341   :  { %977 = vmatprep.subr.bf16.mxu0 %v2006_v14  ;;  %1018 = vmatprep.subr.bf16.mxu1 %v2008_v15 }
 0x342   :  { %1007 = vmatprep.mubr.bf16.mxu0 %v2575_v7  ;;  %1048 = vmatprep.mubr.bf16.mxu1 %v2575_v7 }
 0x344   :  { %978 = vmatpush1.bf16.msra.mxu0 %v2010_v16  ;;  %1019 = vmatpush1.bf16.msra.mxu1 %v2014_v17 }
 0x345   :  { %979 = vmatprep.subr.bf16.mxu0 %v2018_v18  ;;  %1020 = vmatprep.subr.bf16.mxu1 %v2022_v19 }
 0x348   :  { %980 = vmatpush1.bf16.msra.mxu0 %v2029_v21  ;;  %1021 = vmatpush1.bf16.msra.mxu1 %v2033_v22 }
 0x349   :  { %981 = vmatprep.subr.bf16.mxu0 %v2035_v23  ;;  %1022 = vmatprep.subr.bf16.mxu1 %v2039_v24 }
 0x34c   :  { %982 = vmatpush1.bf16.msra.mxu0 %v2045_v25  ;;  %1023 = vmatpush1.bf16.msra.mxu1 %v2047_v26 }
 0x34d   :  { %983 = vmatprep.subr.bf16.mxu0 %v2049_v27  ;;  %1024 = vmatprep.subr.bf16.mxu1 %v2053_v28 }
 0x350   :  { %984 = vmatpush1.bf16.msra.mxu0 %v2060_v30  ;;  %1025 = vmatpush1.bf16.msra.mxu1 %v2062_v31 }
 0x351   :  { %985 = vmatprep.subr.bf16.mxu0 %v2066_v32  ;;  %1026 = vmatprep.subr.bf16.mxu1 %v2070_v33 }
 0x354   :  { %986 = vmatpush1.bf16.msra.mxu0 %v2074_v34  ;;  %1027 = vmatpush1.bf16.msra.mxu1 %v2078_v35 }
 0x355   :  { %987 = vmatprep.subr.bf16.mxu0 %v2082_v36  ;;  %1028 = vmatprep.subr.bf16.mxu1 %v2084_v37 }
 0x358   :  { %988 = vmatpush1.bf16.msra.mxu0 %v2093_v39  ;;  %1029 = vmatpush1.bf16.msra.mxu1 %v2095_v40 }
 0x359   :  { %989 = vmatprep.subr.bf16.mxu0 %v2099_v41  ;;  %1030 = vmatprep.subr.bf16.mxu1 %v2101_v42 }
 0x35c   :  { %990 = vmatpush1.bf16.msra.mxu0 %v2107_v43  ;;  %1031 = vmatpush1.bf16.msra.mxu1 %v2109_v44 }
 0x35d   :  { %1087 = vmatprep.subr.bf16.mxu0 %v1996_v8  ;;  %1128 = vmatprep.subr.bf16.mxu1 %v1998_v11 }
 0x412   :  { %v897_v29 = vpop.f32.mrb[28].mxu0  ;;  %v938_v10 = vpop.f32.mrb[28].mxu1 }
 0x413   :  { %v945_v53 = vadd.f32 %v897_v29, %v2577_v54  ;;  %v947_v56 = vadd.f32 %v938_v10, %v2578_v55  ;;  %v899_v57 = vpop.f32.mrb[29].mxu0  ;;  %v940_v58 = vpop.f32.mrb[29].mxu1 }
 0x414   :  { %v946_v59 = vadd.f32 %v899_v57, %v2579_v0  ;;  %v948_v6 = vadd.f32 %v940_v58, %v2580_v60  ;;  %v901_v63 = vpop.f32.mrb[30].mxu0  ;;  %v942_v3 = vpop.f32.mrb[30].mxu1 }
 0x415   :  { %v949_v2 = vmul.f32 0.5, %v945_v53  ;;  %v902_v47 = vpop.f32.mrb[31].mxu0  ;;  %v943_v9 = vpop.f32.mrb[31].mxu1  ;;  %v951_v11 = vmul.f32 0.5, %v947_v56 }
 0x416   :  { %v950_v8 = vmul.f32 0.5, %v946_v59 }
 0x417   :  { %1761 = vtanh.f32 %v949_v2 }
 0x418   :  { %1763 = vtanh.f32 %v950_v8 }
 0x419   :  { %1765 = vtanh.f32 %v948_v6 }
 0x41a   :  { %1767 = vtanh.f32 %v951_v11 }
 0x421   :  { %v1762_v49 = vpop.eup %1761 }
 0x422   :  { %v955_v20 = vadd.f32 1.0, %v1762_v49  ;;  %v1764_v4 = vpop.eup %1763 }
 0x423   :  { %v956_v38 = vadd.f32 1.0, %v1764_v4  ;;  %v1766_v5 = vpop.eup %1765 }
 0x424   :  { %v958_v51 = vmul.f32 0.5, %v955_v20  ;;  %v1768_v52 = vpop.eup %1767 }
 0x425   :  { %v959_v50 = vmul.f32 0.5, %v956_v38  ;;  %v957_v46 = vadd.f32 1.0, %v1768_v52  ;;  %v2415_v38 = vld [vmem:[#allocation5] ss:$16 sps:$4 sm:$0xff]   ;;  %v2435_v52 = vld [vmem:[#allocation5 + $0x44] ss:$16 sps:$4 sm:$0xff]  }
 0x426   :  { %v963_v61 = vmul.f32 %v1766_v5, %v958_v51  ;;  %v2418_v5 = vld [vmem:[#allocation5 + $0x8] ss:$16 sps:$4 sm:$0xff]  }
 0x427   :  { %v962_v45 = vmul.f32 %v959_v50, %v2324_v62  ;;  %v960_v1 = vmul.f32 0.5, %v957_v46  ;;  %v2421_v50 = vld [vmem:[#allocation5 + $0x24] ss:$16 sps:$4 sm:$0xff]   ;;  %v2438_v46 = vld [vmem:[#allocation5 + $0x4c] ss:$16 sps:$4 sm:$0xff]  }
 0x429   :  { %v2366_v48 = vadd.f32 %v963_v61, %v962_v45  ;;  %v2424_v61 = vld [vmem:[#allocation5 + $0x2c] ss:$16 sps:$4 sm:$0xff]   ;;  %v2429_v45 = vld [vmem:[#allocation5 + $0x20] ss:$16 sps:$4 sm:$0xff]  }
 0x42b   :  { %1769 = vtanh.f32 %v2366_v48 }
 0x435   :  { %v1770_v29 = vpop.eup %1769 }
 0x436   :  { %v966_v10 = vmul.f32 %v1770_v29, %v960_v1  ;;  %v2441_v1 = vld [vmem:[#allocation5 + $0x40] ss:$16 sps:$4 sm:$0xff]   ;;  %v2444_v29 = vld [vmem:[#allocation5 + $0x48] ss:$16 sps:$4 sm:$0xff]  }
 0x438   :  { %v974_v54 = vpack.c.bf16 %v966_v10, %v966_v10  ;;  %v2447_v10 = vld [vmem:[#allocation5 + $0x64] ss:$16 sps:$4 sm:$0xff]  }
 0x43a   :  { %1008 = vmatmul.mubr.bf16.vlgmr.msra.gmra.mrb[32].mxu0 %v974_v54  ;;  %1049 = vmatmul.mubr.bf16.vlgmr.msra.gmra.mrb[32].mxu1 %v974_v54  ;;  %v2450_v54 = vld [vmem:[#allocation5 + $0x6c] ss:$16 sps:$4 sm:$0xff]  }
 0x43b   :  { %1088 = vmatpush1.bf16.msra.mxu0 %v2000_v12  ;;  %1129 = vmatpush1.bf16.msra.mxu1 %v2002_v13  ;;  %v2401_v12 = vld [vmem:[#allocation5 + $0x4] ss:$16 sps:$4 sm:$0xff]   ;;  %v2404_v13 = vld [vmem:[#allocation5 + $0xc] ss:$16 sps:$4 sm:$0xff]  }
 0x43c   :  { %1089 = vmatprep.subr.bf16.mxu0 %v2006_v14  ;;  %1130 = vmatprep.subr.bf16.mxu1 %v2008_v15 }
 0x43d   :  { %1119 = vmatprep.mubr.bf16.mxu0 %v2575_v7  ;;  %1160 = vmatprep.mubr.bf16.mxu1 %v2575_v7 }
 0x43f   :  { %1090 = vmatpush1.bf16.msra.mxu0 %v2010_v16  ;;  %1131 = vmatpush1.bf16.msra.mxu1 %v2014_v17  ;;  %v2581_v16 = vld [vmem:[#allocation19_spill] sm:$0xff] }
 0x440   :  { %1091 = vmatprep.subr.bf16.mxu0 %v2018_v18  ;;  %1132 = vmatprep.subr.bf16.mxu1 %v2022_v19  ;;  %v2582_v18 = vld [vmem:[#allocation20_spill] sm:$0xff] }
 0x443   :  { %1092 = vmatpush1.bf16.msra.mxu0 %v2029_v21  ;;  %1133 = vmatpush1.bf16.msra.mxu1 %v2033_v22 }
 0x444   :  { %1093 = vmatprep.subr.bf16.mxu0 %v2035_v23  ;;  %1134 = vmatprep.subr.bf16.mxu1 %v2039_v24  ;;  %v2583_v23 = vld [vmem:[#allocation21_spill] sm:$0xff] }
 0x447   :  { %1094 = vmatpush1.bf16.msra.mxu0 %v2045_v25  ;;  %1135 = vmatpush1.bf16.msra.mxu1 %v2047_v26  ;;  %v2584_v25 = vld [vmem:[#allocation22_spill] sm:$0xff] }
 0x448   :  { %1095 = vmatprep.subr.bf16.mxu0 %v2049_v27  ;;  %1136 = vmatprep.subr.bf16.mxu1 %v2053_v28 }
 0x44b   :  { %1096 = vmatpush1.bf16.msra.mxu0 %v2060_v30  ;;  %1137 = vmatpush1.bf16.msra.mxu1 %v2062_v31 }
 0x44c   :  { %1097 = vmatprep.subr.bf16.mxu0 %v2066_v32  ;;  %1138 = vmatprep.subr.bf16.mxu1 %v2070_v33 }
 0x44f   :  { %1098 = vmatpush1.bf16.msra.mxu0 %v2074_v34  ;;  %1139 = vmatpush1.bf16.msra.mxu1 %v2078_v35 }
 0x450   :  { %1099 = vmatprep.subr.bf16.mxu0 %v2082_v36  ;;  %1140 = vmatprep.subr.bf16.mxu1 %v2084_v37 }
 0x453   :  { %1100 = vmatpush1.bf16.msra.mxu0 %v2093_v39  ;;  %1141 = vmatpush1.bf16.msra.mxu1 %v2095_v40 }
 0x454   :  { %1101 = vmatprep.subr.bf16.mxu0 %v2099_v41  ;;  %1142 = vmatprep.subr.bf16.mxu1 %v2101_v42 }
 0x457   :  { %1102 = vmatpush1.bf16.msra.mxu0 %v2107_v43  ;;  %1143 = vmatpush1.bf16.msra.mxu1 %v2109_v44 }
 0x458   :  { %1199 = vmatprep.subr.bf16.mxu0 %v2401_v12  ;;  %1240 = vmatprep.subr.bf16.mxu1 %v2404_v13 }
 0x50d   :  { %v1009_v14 = vpop.f32.mrb[32].mxu0  ;;  %v1050_v15 = vpop.f32.mrb[32].mxu1 }
 0x50e   :  { %v1057_v17 = vadd.f32 %v1009_v14, %v2581_v16  ;;  %v1059_v19 = vadd.f32 %v1050_v15, %v2582_v18  ;;  %v1011_v21 = vpop.f32.mrb[33].mxu0  ;;  %v1052_v22 = vpop.f32.mrb[33].mxu1  ;;  %v2453_v14 = vld [vmem:[#allocation5 + $0x60] ss:$16 sps:$4 sm:$0xff]   ;;  %v2456_v15 = vld [vmem:[#allocation5 + $0x68] ss:$16 sps:$4 sm:$0xff]  }
 0x50f   :  { %v1058_v24 = vadd.f32 %v1011_v21, %v2583_v23  ;;  %v1060_v26 = vadd.f32 %v1052_v22, %v2584_v25  ;;  %v1013_v27 = vpop.f32.mrb[34].mxu0  ;;  %v1054_v28 = vpop.f32.mrb[34].mxu1  ;;  %v2459_v16 = vld [vmem:[#allocation5 + $0x84] ss:$16 sps:$4 sm:$0xff]  }
 0x510   :  { %v1061_v62 = vmul.f32 0.5, %v1057_v17  ;;  %v1014_v53 = vpop.f32.mrb[35].mxu0  ;;  %v1055_v55 = vpop.f32.mrb[35].mxu1  ;;  %v1063_v57 = vmul.f32 0.5, %v1059_v19  ;;  %v2462_v17 = vld [vmem:[#allocation5 + $0x8c] ss:$16 sps:$4 sm:$0xff]  }
 0x511   :  { %v1062_v56 = vmul.f32 0.5, %v1058_v24 }
 0x512   :  { %1771 = vtanh.f32 %v1061_v62 }
 0x513   :  { %1773 = vtanh.f32 %v1062_v56 }
 0x514   :  { %1775 = vtanh.f32 %v1060_v26 }
 0x515   :  { %1777 = vtanh.f32 %v1063_v57 }
 0x51c   :  { %v1772_v58 = vpop.eup %1771 }
 0x51d   :  { %v1067_v0 = vadd.f32 1.0, %v1772_v58  ;;  %v1774_v59 = vpop.eup %1773 }
 0x51e   :  { %v1068_v6 = vadd.f32 1.0, %v1774_v59  ;;  %v1776_v63 = vpop.eup %1775 }
 0x51f   :  { %v1070_v60 = vmul.f32 0.5, %v1067_v0  ;;  %v1778_v8 = vpop.eup %1777 }
 0x520   :  { %v1071_v3 = vmul.f32 0.5, %v1068_v6  ;;  %v1069_v11 = vadd.f32 1.0, %v1778_v8  ;;  %v1830_v6 = vld [vmem:[#allocation5 + $0x88] ss:$16 sps:$4 sm:$0xff]   ;;  %v1836_v8 = vld [vmem:[#allocation5 + $0xcc] ss:$16 sps:$4 sm:$0xff]  }
 0x521   :  { %v1075_v2 = vmul.f32 %v1776_v63, %v1070_v60  ;;  %v1831_v63 = vld [vmem:[#allocation5 + $0xa4] ss:$16 sps:$4 sm:$0xff]  }
 0x522   :  { %v1074_v47 = vmul.f32 %v1071_v3, %v2366_v48  ;;  %v1072_v49 = vmul.f32 0.5, %v1069_v11  ;;  %v2432_v48 = vld [vmem:[#allocation5 + $0x28] ss:$16 sps:$4 sm:$0xff]   ;;  %v1832_v3 = vld [vmem:[#allocation5 + $0xac] ss:$16 sps:$4 sm:$0xff]  }
 0x523   :  { %v1837_v11 = vld [vmem:[#allocation5 + $0xc0] ss:$16 sps:$4 sm:$0xff]  }
 0x524   :  { %v2412_v9 = vadd.f32 %v1075_v2, %v1074_v47  ;;  %v1833_v2 = vld [vmem:[#allocation5 + $0xa0] ss:$16 sps:$4 sm:$0xff]   ;;  %v1834_v47 = vld [vmem:[#allocation5 + $0xa8] ss:$16 sps:$4 sm:$0xff]  }
 0x526   :  { %1779 = vtanh.f32 %v2412_v9 }
 0x530   :  { %v1780_v20 = vpop.eup %1779 }
 0x531   :  { %v1078_v4 = vmul.f32 %v1780_v20, %v1072_v49  ;;  %v1838_v49 = vld [vmem:[#allocation5 + $0xc8] ss:$16 sps:$4 sm:$0xff]   ;;  %v1839_v20 = vld [vmem:[#allocation5 + $0xe4] ss:$16 sps:$4 sm:$0xff]  }
 0x533   :  { %v1086_v51 = vpack.c.bf16 %v1078_v4, %v1078_v4  ;;  %v1840_v4 = vld [vmem:[#allocation5 + $0xec] ss:$16 sps:$4 sm:$0xff]  }
 0x535   :  { %1120 = vmatmul.mubr.bf16.vlgmr.msra.gmra.mrb[36].mxu0 %v1086_v51  ;;  %1161 = vmatmul.mubr.bf16.vlgmr.msra.gmra.mrb[36].mxu1 %v1086_v51  ;;  %v1841_v51 = vld [vmem:[#allocation5 + $0xe0] ss:$16 sps:$4 sm:$0xff]  }
 0x536   :  { %1200 = vmatpush1.bf16.msra.mxu0 %v2415_v38  ;;  %1241 = vmatpush1.bf16.msra.mxu1 %v2418_v5 }
 0x537   :  { %1201 = vmatprep.subr.bf16.mxu0 %v2421_v50  ;;  %1242 = vmatprep.subr.bf16.mxu1 %v2424_v61 }
 0x538   :  { %1231 = vmatprep.mubr.bf16.mxu0 %v2575_v7  ;;  %1272 = vmatprep.mubr.bf16.mxu1 %v2575_v7 }
 0x53a   :  { %1202 = vmatpush1.bf16.msra.mxu0 %v2429_v45  ;;  %1243 = vmatpush1.bf16.msra.mxu1 %v2432_v48 }
 0x53b   :  { %1203 = vmatprep.subr.bf16.mxu0 %v2435_v52  ;;  %1244 = vmatprep.subr.bf16.mxu1 %v2438_v46 }
 0x53e   :  { %1204 = vmatpush1.bf16.msra.mxu0 %v2441_v1  ;;  %1245 = vmatpush1.bf16.msra.mxu1 %v2444_v29 }
 0x53f   :  { %1205 = vmatprep.subr.bf16.mxu0 %v2447_v10  ;;  %1246 = vmatprep.subr.bf16.mxu1 %v2450_v54 }
 0x542   :  { %1206 = vmatpush1.bf16.msra.mxu0 %v2453_v14  ;;  %1247 = vmatpush1.bf16.msra.mxu1 %v2456_v15 }
 0x543   :  { %1207 = vmatprep.subr.bf16.mxu0 %v2459_v16  ;;  %1248 = vmatprep.subr.bf16.mxu1 %v2462_v17 }
 0x546   :  { %1208 = vmatpush1.bf16.msra.mxu0 %v2060_v30  ;;  %1249 = vmatpush1.bf16.msra.mxu1 %v2062_v31 }
 0x547   :  { %1209 = vmatprep.subr.bf16.mxu0 %v2066_v32  ;;  %1250 = vmatprep.subr.bf16.mxu1 %v2070_v33  ;;  %v2585_v32 = vld [vmem:[#allocation23_spill] sm:$0xff] }
 0x54a   :  { %1210 = vmatpush1.bf16.msra.mxu0 %v2074_v34  ;;  %1251 = vmatpush1.bf16.msra.mxu1 %v2078_v35  ;;  %v2586_v34 = vld [vmem:[#allocation24_spill] sm:$0xff] }
 0x54b   :  { %1211 = vmatprep.subr.bf16.mxu0 %v2082_v36  ;;  %1252 = vmatprep.subr.bf16.mxu1 %v2084_v37 }
 0x54e   :  { %1212 = vmatpush1.bf16.msra.mxu0 %v2093_v39  ;;  %1253 = vmatpush1.bf16.msra.mxu1 %v2095_v40  ;;  %v2587_v39 = vld [vmem:[#allocation25_spill] sm:$0xff] }
 0x54f   :  { %1213 = vmatprep.subr.bf16.mxu0 %v2099_v41  ;;  %1254 = vmatprep.subr.bf16.mxu1 %v2101_v42  ;;  %v2588_v41 = vld [vmem:[#allocation26_spill] sm:$0xff] }
 0x552   :  { %1214 = vmatpush1.bf16.msra.mxu0 %v2107_v43  ;;  %1255 = vmatpush1.bf16.msra.mxu1 %v2109_v44 }
 0x553   :  { %1311 = vmatprep.subr.bf16.mxu0 %v2401_v12  ;;  %1352 = vmatprep.subr.bf16.mxu1 %v2404_v13 }
 0x608   :  { %v1121_v30 = vpop.f32.mrb[36].mxu0  ;;  %v1162_v31 = vpop.f32.mrb[36].mxu1 }
 0x609   :  { %v1169_v33 = vadd.f32 %v1121_v30, %v2585_v32  ;;  %v1171_v35 = vadd.f32 %v1162_v31, %v2586_v34  ;;  %v1123_v36 = vpop.f32.mrb[37].mxu0  ;;  %v1164_v37 = vpop.f32.mrb[37].mxu1 }
 0x60a   :  { %v1170_v40 = vadd.f32 %v1123_v36, %v2587_v39  ;;  %v1172_v42 = vadd.f32 %v1164_v37, %v2588_v41  ;;  %v1125_v18 = vpop.f32.mrb[38].mxu0  ;;  %v1166_v43 = vpop.f32.mrb[38].mxu1 }
 0x60b   :  { %v1173_v19 = vmul.f32 0.5, %v1169_v33  ;;  %v1126_v44 = vpop.f32.mrb[39].mxu0  ;;  %v1167_v21 = vpop.f32.mrb[39].mxu1  ;;  %v1175_v13 = vmul.f32 0.5, %v1171_v35 }
 0x60c   :  { %v1174_v12 = vmul.f32 0.5, %v1170_v40 }
 0x60d   :  { %1781 = vtanh.f32 %v1173_v19 }
 0x60e   :  { %1783 = vtanh.f32 %v1174_v12 }
 0x60f   :  { %1785 = vtanh.f32 %v1172_v42 }
 0x610   :  { %1787 = vtanh.f32 %v1175_v13 }
 0x617   :  { %v1782_v22 = vpop.eup %1781 }
 0x618   :  { %v1179_v23 = vadd.f32 1.0, %v1782_v22  ;;  %v1784_v24 = vpop.eup %1783 }
 0x619   :  { %v1180_v26 = vadd.f32 1.0, %v1784_v24  ;;  %v1786_v27 = vpop.eup %1785  ;;  %v1420_v24 = vld [vmem:[#allocation8] sm:$0xff] }
 0x61a   :  { %v1182_v25 = vmul.f32 0.5, %v1179_v23  ;;  %v1788_v56 = vpop.eup %1787 }
 0x61b   :  { %v1183_v28 = vmul.f32 0.5, %v1180_v26  ;;  %v1181_v57 = vadd.f32 1.0, %v1788_v56 }
 0x61c   :  { %v1187_v62 = vmul.f32 %v1786_v27, %v1182_v25  ;;  %v1421_v25 = vld [vmem:[#allocation8 + $0x8] sm:$0xff]  ;;  %v1422_v27 = vld [vmem:[#allocation8 + $0x10] sm:$0xff] }
 0x61d   :  { %v1186_v53 = vmul.f32 %v1183_v28, %v2412_v9  ;;  %v1184_v58 = vmul.f32 0.5, %v1181_v57  ;;  %v1835_v9 = vld [vmem:[#allocation5 + $0xc4] ss:$16 sps:$4 sm:$0xff]   ;;  %v1641_v26 = vpack.c.bf16 %v1421_v25, %v1420_v24  ;;  %v1423_v28 = vld [vmem:[#allocation8 + $0x18] sm:$0xff] }
 0x61e   :  { %v1426_v57 = vld [vmem:[#allocation8 + $0x30] sm:$0xff] }
 0x61f   :  { %v2486_v55 = vadd.f32 %v1187_v62, %v1186_v53  ;;  %v1644_v62 = vpack.c.bf16 %v1423_v28, %v1422_v27  ;;  %v1424_v53 = vld [vmem:[#allocation8 + $0x20] sm:$0xff] }
 0x621   :  { %1789 = vtanh.f32 %v2486_v55 }
 0x62b   :  { %v1790_v0 = vpop.eup %1789 }
 0x62c   :  { %v1190_v59 = vmul.f32 %v1790_v0, %v1184_v58  ;;  %v1427_v58 = vld [vmem:[#allocation8 + $0x38] sm:$0xff] }
 0x62d   :  { %v1650_v0 = vpack.c.bf16 %v1427_v58, %v1426_v57 }
 0x62e   :  { %v1198_v60 = vpack.c.bf16 %v1190_v59, %v1190_v59  ;;  %v1428_v59 = vld [vmem:[#allocation8 + $0x40] sm:$0xff] }
 0x630   :  { %1232 = vmatmul.mubr.bf16.vlgmr.msra.gmra.mrb[40].mxu0 %v1198_v60  ;;  %1273 = vmatmul.mubr.bf16.vlgmr.msra.gmra.mrb[40].mxu1 %v1198_v60  ;;  %v1429_v60 = vld [vmem:[#allocation8 + $0x48] sm:$0xff] }
 0x631   :  { %1312 = vmatpush1.bf16.msra.mxu0 %v2415_v38  ;;  %1353 = vmatpush1.bf16.msra.mxu1 %v2418_v5  ;;  %v1842_v38 = vld [vmem:[#allocation5 + $0xe8] ss:$16 sps:$4 sm:$0xff]   ;;  %v2589_v5 = vmov 0.0|0.0  }
 0x632   :  { %1313 = vmatprep.subr.bf16.mxu0 %v2421_v50  ;;  %1354 = vmatprep.subr.bf16.mxu1 %v2424_v61 }
 0x633   :  { %1343 = vmatprep.mubr.bf16.mxu0 %v2575_v7  ;;  %1384 = vmatprep.mubr.bf16.mxu1 %v2575_v7  ;;  %v1829_v7 = vld [vmem:[#allocation5 + $0x80] ss:$16 sps:$4 sm:$0xff]  }
 0x635   :  { %1314 = vmatpush1.bf16.msra.mxu0 %v2429_v45  ;;  %1355 = vmatpush1.bf16.msra.mxu1 %v2432_v48  ;;  %v2590_v45 = vld [vmem:[#allocation27_spill] sm:$0xff] }
 0x636   :  { %1315 = vmatprep.subr.bf16.mxu0 %v2435_v52  ;;  %1356 = vmatprep.subr.bf16.mxu1 %v2438_v46  ;;  %v2591_v52 = vld [vmem:[#allocation28_spill] sm:$0xff] }
 0x639   :  { %1316 = vmatpush1.bf16.msra.mxu0 %v2441_v1  ;;  %1357 = vmatpush1.bf16.msra.mxu1 %v2444_v29 }
 0x63a   :  { %1317 = vmatprep.subr.bf16.mxu0 %v2447_v10  ;;  %1358 = vmatprep.subr.bf16.mxu1 %v2450_v54  ;;  %v2592_v10 = vld [vmem:[#allocation29_spill] sm:$0xff] }
 0x63d   :  { %1318 = vmatpush1.bf16.msra.mxu0 %v2453_v14  ;;  %1359 = vmatpush1.bf16.msra.mxu1 %v2456_v15  ;;  %v2593_v14 = vld [vmem:[#allocation30_spill] sm:$0xff] }
 0x63e   :  { %1319 = vmatprep.subr.bf16.mxu0 %v2459_v16  ;;  %1360 = vmatprep.subr.bf16.mxu1 %v2462_v17 }
 0x641   :  { %1320 = vmatpush1.bf16.msra.mxu0 %v1829_v7  ;;  %1361 = vmatpush1.bf16.msra.mxu1 %v1830_v6  ;;  %v1653_v7 = vpack.c.bf16 %v1429_v60, %v1428_v59  ;;  %v1430_v6 = vld [vmem:[#allocation8 + $0x50] sm:$0xff] }
 0x642   :  { %1321 = vmatprep.subr.bf16.mxu0 %v1831_v63  ;;  %1362 = vmatprep.subr.bf16.mxu1 %v1832_v3  ;;  %v1431_v63 = vld [vmem:[#allocation8 + $0x58] sm:$0xff] }
 0x643   :  { %v1656_v3 = vpack.c.bf16 %v1431_v63, %v1430_v6 }
 0x645   :  { %1322 = vmatpush1.bf16.msra.mxu0 %v1833_v2  ;;  %1363 = vmatpush1.bf16.msra.mxu1 %v1834_v47  ;;  %v1432_v2 = vld [vmem:[#allocation8 + $0x60] sm:$0xff]  ;;  %v1433_v47 = vld [vmem:[#allocation8 + $0x68] sm:$0xff] }
 0x646   :  { %1323 = vmatprep.subr.bf16.mxu0 %v1835_v9  ;;  %1364 = vmatprep.subr.bf16.mxu1 %v1836_v8  ;;  %v1924_v9 = vmov 0.0   ;;  %v1659_v8 = vpack.c.bf16 %v1433_v47, %v1432_v2 }
 0x649   :  { %1324 = vmatpush1.bf16.msra.mxu0 %v1837_v11  ;;  %1365 = vmatpush1.bf16.msra.mxu1 %v1838_v49  ;;  %v1434_v11 = vld [vmem:[#allocation8 + $0x70] sm:$0xff]  ;;  %v1435_v49 = vld [vmem:[#allocation8 + $0x78] sm:$0xff] }
 0x64a   :  { %1325 = vmatprep.subr.bf16.mxu0 %v1839_v20  ;;  %1366 = vmatprep.subr.bf16.mxu1 %v1840_v4  ;;  %v1662_v20 = vpack.c.bf16 %v1435_v49, %v1434_v11 }
 0x64d   :  { %1326 = vmatpush1.bf16.msra.mxu0 %v1841_v51  ;;  %1367 = vmatpush1.bf16.msra.mxu1 %v1842_v38  ;;  %v2594_v38 = vld [vmem:[#allocation31_spill] sm:$0xff] }
 0x64e   :  { %1640 = vmatprep.subr.bf16.mxu0 %v2589_v5 }
 0x703   :  { %v1233_v50 = vpop.f32.mrb[40].mxu0  ;;  %v1274_v61 = vpop.f32.mrb[40].mxu1 }
 0x704   :  { %v1281_v48 = vadd.f32 %v1233_v50, %v2590_v45  ;;  %v1283_v46 = vadd.f32 %v1274_v61, %v2591_v52  ;;  %v1235_v1 = vpop.f32.mrb[41].mxu0  ;;  %v1276_v29 = vpop.f32.mrb[41].mxu1  ;;  %v2595_v61 = vld [vmem:[#allocation32_spill] sm:$0xff] }
 0x705   :  { %v1282_v54 = vadd.f32 %v1235_v1, %v2592_v10  ;;  %v1284_v15 = vadd.f32 %v1276_v29, %v2593_v14  ;;  %v1237_v16 = vpop.f32.mrb[42].mxu0  ;;  %v1278_v17 = vpop.f32.mrb[42].mxu1  ;;  %v2597_v29 = vld [vmem:[#allocation34_spill] sm:$0xff] }
 0x706   :  { %v1285_v30 = vmul.f32 0.5, %v1281_v48  ;;  %v1238_v31 = vpop.f32.mrb[43].mxu0  ;;  %v1279_v32 = vpop.f32.mrb[43].mxu1  ;;  %v1287_v34 = vmul.f32 0.5, %v1283_v46  ;;  %v2596_v46 = vld [vmem:[#allocation33_spill] sm:$0xff] }
 0x707   :  { %v1286_v33 = vmul.f32 0.5, %v1282_v54 }
 0x708   :  { %1791 = vtanh.f32 %v1285_v30 }
 0x709   :  { %1793 = vtanh.f32 %v1286_v33 }
 0x70a   :  { %1795 = vtanh.f32 %v1284_v15 }
 0x70b   :  { %1797 = vtanh.f32 %v1287_v34 }
 0x712   :  { %v1792_v35 = vpop.eup %1791 }
 0x713   :  { %v1291_v36 = vadd.f32 1.0, %v1792_v35  ;;  %v1794_v37 = vpop.eup %1793 }
 0x714   :  { %v1292_v40 = vadd.f32 1.0, %v1794_v37  ;;  %v1796_v41 = vpop.eup %1795 }
 0x715   :  { %v1294_v39 = vmul.f32 0.5, %v1291_v36  ;;  %v1798_v44 = vpop.eup %1797 }
 0x716   :  { %v1295_v42 = vmul.f32 0.5, %v1292_v40  ;;  %v1293_v21 = vadd.f32 1.0, %v1798_v44 }
 0x717   :  { %v1299_v18 = vmul.f32 %v1796_v41, %v1294_v39 }
 0x718   :  { %v1298_v43 = vmul.f32 %v1295_v42, %v2486_v55  ;;  %v1296_v12 = vmul.f32 0.5, %v1293_v21  ;;  %v1425_v55 = vld [vmem:[#allocation8 + $0x28] sm:$0xff] }
 0x719   :  { %v1647_v56 = vpack.c.bf16 %v1425_v55, %v1424_v53 }
 0x71a   :  { %v2513_v19 = vadd.f32 %v1299_v18, %v1298_v43 }
 0x71c   :  { %1799 = vtanh.f32 %v2513_v19 }
 0x726   :  { %v1800_v13 = vpop.eup %1799 }
 0x727   :  { %v1302_v22 = vmul.f32 %v1800_v13, %v1296_v12  ;;  %v1587_v12 = vld [vmem:[%s2548_s5] ss:$0 sm:$0xff] }
 0x729   :  { %v1310_v23 = vpack.c.bf16 %v1302_v22, %v1302_v22 }
 0x72b   :  { %1344 = vmatmul.mubr.bf16.vlgmr.msra.gmra.mrb[44].mxu0 %v1310_v23  ;;  %1385 = vmatmul.mubr.bf16.vlgmr.msra.gmra.mrb[44].mxu1 %v1310_v23 }
 0x72c   :  { %1642 = vmatpush3.bf16.msra.mxu0 %v1641_v26  ;;  %1637 = vmatprep.mubr.msk.f32.mxu0 %vm1923_vm2, %v1924_v9 }
 0x72d   :  { %1643 = vmatprep.subr.bf16.mxu0 %v2589_v5 }
 0x730   :  { %1645 = vmatpush3.bf16.msra.mxu0 %v1644_v62 }
 0x731   :  { %1646 = vmatprep.subr.bf16.mxu0 %v2589_v5 }
 0x734   :  { %1648 = vmatpush3.bf16.msra.mxu0 %v1647_v56 }
 0x735   :  { %1649 = vmatprep.subr.bf16.mxu0 %v2589_v5 }
 0x738   :  { %1651 = vmatpush3.bf16.msra.mxu0 %v1650_v0 }
 0x739   :  { %1652 = vmatprep.subr.bf16.mxu0 %v2589_v5 }
 0x73c   :  { %1654 = vmatpush3.bf16.msra.mxu0 %v1653_v7 }
 0x73d   :  { %1655 = vmatprep.subr.bf16.mxu0 %v2589_v5 }
 0x740   :  { %1657 = vmatpush3.bf16.msra.mxu0 %v1656_v3 }
 0x741   :  { %1658 = vmatprep.subr.bf16.mxu0 %v2589_v5 }
 0x744   :  { %1660 = vmatpush3.bf16.msra.mxu0 %v1659_v8 }
 0x745   :  { %1661 = vmatprep.subr.bf16.mxu0 %v2589_v5 }
 0x748   :  { %1663 = vmatpush3.bf16.msra.mxu0 %v1662_v20 }
 0x7fe   :  { %v1345_v4 = vpop.f32.mrb[44].mxu0  ;;  %v1386_v51 = vpop.f32.mrb[44].mxu1 }
 0x7ff   :  { %v1393_v50 = vadd.f32 %v1345_v4, %v2594_v38  ;;  %v1395_v45 = vadd.f32 %v1386_v51, %v2595_v61  ;;  %v1347_v48 = vpop.f32.mrb[45].mxu0  ;;  %v1388_v52 = vpop.f32.mrb[45].mxu1 }
 0x800   :  { %v1394_v1 = vadd.f32 %v1347_v48, %v2596_v46  ;;  %v1396_v10 = vadd.f32 %v1388_v52, %v2597_v29  ;;  %v1349_v54 = vpop.f32.mrb[46].mxu0  ;;  %v1390_v14 = vpop.f32.mrb[46].mxu1 }
 0x801   :  { %v1397_v15 = vmul.f32 0.5, %v1393_v50  ;;  %v1350_v16 = vpop.f32.mrb[47].mxu0  ;;  %v1391_v17 = vpop.f32.mrb[47].mxu1  ;;  %v1399_v5 = vmul.f32 0.5, %v1395_v45 }
 0x802   :  { %v1398_v30 = vmul.f32 0.5, %v1394_v1 }
 0x803   :  { %1801 = vtanh.f32 %v1397_v15 }
 0x804   :  { %1803 = vtanh.f32 %v1398_v30 }
 0x805   :  { %1805 = vtanh.f32 %v1396_v10 }
 0x806   :  { %1807 = vtanh.f32 %v1399_v5 }
 0x80d   :  { %v1802_v31 = vpop.eup %1801 }
 0x80e   :  { %v1403_v32 = vadd.f32 1.0, %v1802_v31  ;;  %v1804_v33 = vpop.eup %1803 }
 0x80f   :  { %v1404_v35 = vadd.f32 1.0, %v1804_v33  ;;  %v1806_v36 = vpop.eup %1805 }
 0x810   :  { %v1406_v34 = vmul.f32 0.5, %v1403_v32  ;;  %v1808_v42 = vpop.eup %1807 }
 0x811   :  { %v1407_v37 = vmul.f32 0.5, %v1404_v35  ;;  %v1405_v18 = vadd.f32 1.0, %v1808_v42 }
 0x812   :  { %v1411_v39 = vmul.f32 %v1806_v36, %v1406_v34 }
 0x813   :  { %v1410_v40 = vmul.f32 %v1407_v37, %v2513_v19  ;;  %v1408_v43 = vmul.f32 0.5, %v1405_v18 }
 0x815   :  { %v1412_v41 = vadd.f32 %v1411_v39, %v1410_v40 }
 0x817   :  { %1809 = vtanh.f32 %v1412_v41 }
 0x821   :  { %v1810_v44 = vpop.eup %1809 }
 0x822   :  { %v1414_v21 = vmul.f32 %v1810_v44, %v1408_v43 }
 0x824   :  { %1638 = vmatmul.mubr.f32.vlgmr.msra.gmra.mrb[48].mxu0 %v1414_v21 }
 0x8f7   :  { %v1509_v13 = vpop.f32.mrb[48].mxu0 }
 0x8f8   :  { %v1510_v22 = vadd.f32 %v1587_v12, %v1509_v13  ;;  %v1639_v23 = vpop.f32.mrb[49].mxu0 }
 0x8fa   :  { %1513 = vst [vmem:[#allocation10] sm:$0xff] %v1510_v22 }
 0x8fb   :  { %1898 = shalt.err (!%p1895_p6)
}
 0x8fc   :  { %s1899_s17 = scalar_lea.hbm %s2549_s6, 128 }
 0x8fd   :  { %p1900_p7 = scmp.ne.s32.totalorder %s2549_s6, %s1899_s17  ;;  %p1903_p8 = scmp.lt.u32.totalorder %s1899_s17, %s2549_s6 }
 0x8ff   :  { %p1905_p9 = pnand %p1903_p8, %p1900_p7 }
 0x901   :  { %1908 = shalt.err (!%p1905_p9)
}
 0x902   :  { %1523 = dma.vmem_to_hbm [thread:$0]  %s1521_s13, 128, %s2549_s6, [#allocation7]  }
 0x903   :  { %1913 = dma.done.wait [#allocation7], 128  }
 0x904   :  { %1914 = vsyncadd [#allocation7], 4294967168 }
 0x905   :  { %1527 = vsyncpa [#allocation6], 1 }
 0x906   :  { %1528 = vsyncpa [#allocation9], 1 }
 0x907   :  { %1529 = vsyncpa [#allocation7], 1 }

// kernel: tpu_custom_call.1
= control target key start
LH: loop header
LB: loop body
LE: loop exit
PB: predicated region body
PF: predicated region fallthrough
CT: control target
= control target key end

     0   :  { %11 = vsyncpa [#allocation6], 0  ;;  %s2543_s0 = inlined_call_operand.vmem [shape: bf16[1,64,8], index: 0, kind: input, shape index: {}]   ;;  %s2544_s1 = inlined_call_operand.vmem [shape: bf16[8,512], index: 1, kind: input, shape index: {}]   ;;  %s2545_s2 = inlined_call_operand.hbm [shape: bf16[128,512], index: 2, kind: input, shape index: {}]   ;;  %s2546_s3 = inlined_call_operand.vmem [shape: f32[1,512], index: 3, kind: input, shape index: {}]   ;;  %s2547_s4 = inlined_call_operand.hbm [shape: f32[128,128], index: 4, kind: input, shape index: {}]   ;;  %s2548_s5 = inlined_call_operand.vmem [shape: f32[1,128], index: 5, kind: input, shape index: {}]   ;;  %s2549_s6 = inlined_call_operand.hbm [shape: f32[8,128], index: 6, kind: output, shape index: {}]  }
   0x1   :  { %12 = vsyncpa [#allocation9], 0 }
   0x2   :  { %13 = vsyncpa [#allocation7], 0  ;;  %s1915_s21 = smov [#allocation5]   ;;  %s1843_s25 = scalar_lea.hbm %s2545_s2, 4096 }
   0x3   :  { %s23_s22 = sshll.u32 %s1915_s21, 4  ;;  %p1844_p0 = scmp.ne.s32.totalorder %s2545_s2, %s1843_s25  ;;  %s24_s22 = int_to_ptr.vmem [resolvable:$true] %s23_s22 }
   0x4   :  { %p1847_p1 = scmp.lt.u32.totalorder %s1843_s25, %s2545_s2 }
   0x6   :  { %p1849_p2 = pnand %p1847_p1, %p1844_p0 }
   0x8   :  { %1852 = shalt.err (!%p1849_p2)
}
   0x9   :  { %s1853_s30 = scalar_lea.vmem %s24_s22, 4096  ;;  %p1858_p4 = scmp.lt.s32.totalorder %s24_s22, %s24_s22 }
   0xa   :  { %p1854_p3 = scmp.ne.s32.totalorder %s24_s22, %s1853_s30  ;;  %p1859_p5 = scmp.lt.s32.totalorder %s1853_s30, %s1853_s30 }
   0xc   :  { %p1860_p6 = por %p1859_p5, %p1858_p4 }
   0xe   :  { %p1861_p7 = pnand %p1860_p6, %p1854_p3 }
  0x10   :  { %1864 = shalt.err (!%p1861_p7)
}
  0x11   :  { %s1916_s7 = smov 256   ;;  %s1917_s8 = smov 16  }
  0x12   :  { %29 = dma.hbm_to_vmem [thread:$0]  %s2545_s2, 4096, %s24_s22, [#allocation6], %s1916_s7, %s1916_s7, %s1917_s8  }
  0x13   :  { %s1918_s11 = smov [#allocation8]   ;;  %s1865_s15 = scalar_lea.hbm %s2547_s4, 2048 }
  0x14   :  { %s37_s12 = sshll.u32 %s1918_s11, 4  ;;  %p1866_p8 = scmp.ne.s32.totalorder %s2547_s4, %s1865_s15  ;;  %s38_s12 = int_to_ptr.vmem [resolvable:$true] %s37_s12 }
  0x15   :  { %p1869_p9 = scmp.lt.u32.totalorder %s1865_s15, %s2547_s4 }
  0x17   :  { %p1871_p10 = pnand %p1869_p9, %p1866_p8 }
  0x19   :  { %1874 = shalt.err (!%p1871_p10)
}
  0x1a   :  { %s1875_s20 = scalar_lea.vmem %s38_s12, 2048  ;;  %p1880_p12 = scmp.lt.s32.totalorder %s38_s12, %s38_s12 }
  0x1b   :  { %p1876_p11 = scmp.ne.s32.totalorder %s38_s12, %s1875_s20  ;;  %p1881_p13 = scmp.lt.s32.totalorder %s1875_s20, %s1875_s20 }
  0x1d   :  { %p1882_p0 = por %p1881_p13, %p1880_p12 }
  0x1f   :  { %p1883_p1 = pnand %p1882_p0, %p1876_p11 }
  0x21   :  { %1886 = shalt.err (!%p1883_p1)
}
  0x22   :  { %s1919_s2 = smov 128   ;;  %s1920_s21 = smov 8  }
  0x23   :  { %43 = dma.hbm_to_vmem [thread:$0]  %s2547_s4, 2048, %s38_s12, [#allocation9], %s1919_s2, %s1919_s2, %s1920_s21  }
  0x24   :  { %1909 = dma.done.wait [#allocation6], 4096  }
  0x25   :  { %1910 = vsyncadd [#allocation6], 4294963200 }
  0x26   :  { %1911 = dma.done.wait [#allocation9], 2048  }
  0x27   :  { %1912 = vsyncadd [#allocation9], 4294965248  ;;  %v2552_v0 = vmov 0   ;;  %v67_v1 = vld [vmem:[%s2544_s1] sm:$0xff]  ;;  %vm134_vm0 = vcmask 1043456   ;;  %v68_v2 = vld [vmem:[%s2544_s1 + $0x8] sm:$0xff]  ;;  %v71_v46 = vlaneseq }
  0x28   :  { %179 = vmatprep.mubr.bf16.mxu0 %v2552_v0  ;;  %252 = vmatprep.mubr.bf16.mxu1 %v2552_v0  ;;  %v1542_v3 = vcombine.high %v67_v1, %v67_v1  ;;  %v1544_v4 = vcombine.high %v68_v2, %v68_v2  ;;  %v1541_v5 = vcombine.low %v67_v1, %v67_v1  ;;  %v1679_v7 = vld [vmem:[%s2543_s0] sm:$0xff]   ;;  %v1998_v11 = vld [vmem:[#allocation5 + $0xc] ss:$16 sps:$4 sm:$0xff]   ;;  %vm121_vm1 = vcmask 64512   ;;  %v2002_v13 = vld [vmem:[#allocation5 + $0x8] ss:$16 sps:$4 sm:$0xff]  }
  0x29   :  { %v1543_v6 = vcombine.low %v68_v2, %v68_v2  ;;  %v1996_v8 = vld [vmem:[#allocation5 + $0x4] ss:$16 sps:$4 sm:$0xff]   ;;  %v2000_v12 = vld [vmem:[#allocation5] ss:$16 sps:$4 sm:$0xff]   ;;  %v2008_v15 = vld [vmem:[#allocation5 + $0x2c] ss:$16 sps:$4 sm:$0xff]  }
  0x2a   :  { %1545 = vmatprep.subr.msk.bf16.mxu0 %vm134_vm0, %v1542_v3  ;;  %1550 = vmatprep.subr.msk.bf16.mxu1 %vm134_vm0, %v1544_v4  ;;  %v136_v9 = vsel %vm134_vm0, %v1541_v5, 0  ;;  %v2006_v14 = vld [vmem:[#allocation5 + $0x24] ss:$16 sps:$4 sm:$0xff]   ;;  %v2010_v16 = vld [vmem:[#allocation5 + $0x20] ss:$16 sps:$4 sm:$0xff]   ;;  %v1692_v20 = vld [vmem:[%s2543_s0 + $0x8] sm:$0xff]  }
  0x2b   :  { %v142_v10 = vsel %vm134_vm0, %v1543_v6, 0  ;;  %148 = vmatpush1.bf16.msra.mxu0 %v136_v9  ;;  %v2014_v17 = vld [vmem:[#allocation5 + $0x28] ss:$16 sps:$4 sm:$0xff]   ;;  %v2018_v18 = vld [vmem:[#allocation5 + $0x44] ss:$16 sps:$4 sm:$0xff]   ;;  %v2550_v45 = vmov 0.0|0.0  }
  0x2c   :  { %221 = vmatpush1.bf16.msra.mxu1 %v142_v10  ;;  %527 = vmatprep.subr.bf16.mxu0 %v1996_v8  ;;  %v2022_v19 = vld [vmem:[#allocation5 + $0x4c] ss:$16 sps:$4 sm:$0xff]   ;;  %v2029_v21 = vld [vmem:[#allocation5 + $0x40] ss:$16 sps:$4 sm:$0xff]   ;;  %v2033_v22 = vld [vmem:[#allocation5 + $0x48] ss:$16 sps:$4 sm:$0xff]  }
  0x2d   :  { %568 = vmatprep.subr.bf16.mxu1 %v1998_v11  ;;  %v2035_v23 = vld [vmem:[#allocation5 + $0x64] ss:$16 sps:$4 sm:$0xff]   ;;  %v2039_v24 = vld [vmem:[#allocation5 + $0x6c] ss:$16 sps:$4 sm:$0xff]   ;;  %v2045_v25 = vld [vmem:[#allocation5 + $0x60] ss:$16 sps:$4 sm:$0xff]  }
  0x2e   :  { %1546 = vmatmul.mubr.msk.bf16.vlgmr.msra.gmra.mrb[0].mxu0 %vm121_vm1, %v1679_v7  ;;  %v2047_v26 = vld [vmem:[#allocation5 + $0x68] ss:$16 sps:$4 sm:$0xff]   ;;  %v2049_v27 = vld [vmem:[#allocation5 + $0x84] ss:$16 sps:$4 sm:$0xff]   ;;  %v2053_v28 = vld [vmem:[#allocation5 + $0x8c] ss:$16 sps:$4 sm:$0xff]  }
  0x2f   :  { %1551 = vmatmul.mubr.msk.bf16.vlgmr.msra.gmra.mrb[0].mxu1 %vm121_vm1, %v1679_v7  ;;  %528 = vmatpush1.bf16.msra.mxu0 %v2000_v12  ;;  %v1705_v29 = vld [vmem:[%s2543_s0 + $0x10] sm:$0xff]   ;;  %v2062_v31 = vld [vmem:[#allocation5 + $0x88] ss:$16 sps:$4 sm:$0xff]   ;;  %v2070_v33 = vld [vmem:[#allocation5 + $0xac] ss:$16 sps:$4 sm:$0xff]   ;;  %v72_v47 = vshrl.u32 %v71_v46, 7 }
  0x30   :  { %569 = vmatpush1.bf16.msra.mxu1 %v2002_v13  ;;  %529 = vmatprep.subr.bf16.mxu0 %v2006_v14  ;;  %v2060_v30 = vld [vmem:[#allocation5 + $0x80] ss:$16 sps:$4 sm:$0xff]   ;;  %v2066_v32 = vld [vmem:[#allocation5 + $0xa4] ss:$16 sps:$4 sm:$0xff]   ;;  %v2078_v35 = vld [vmem:[#allocation5 + $0xa8] ss:$16 sps:$4 sm:$0xff]  }
  0x31   :  { %570 = vmatprep.subr.bf16.mxu1 %v2008_v15  ;;  %189 = vmatprep.mubr.bf16.mxu0 %v2552_v0  ;;  %v2074_v34 = vld [vmem:[#allocation5 + $0xa0] ss:$16 sps:$4 sm:$0xff]   ;;  %v2082_v36 = vld [vmem:[#allocation5 + $0xc4] ss:$16 sps:$4 sm:$0xff]   ;;  %v2084_v37 = vld [vmem:[#allocation5 + $0xcc] ss:$16 sps:$4 sm:$0xff]  }
  0x32   :  { %262 = vmatprep.mubr.bf16.mxu1 %v2552_v0  ;;  %v1718_v38 = vld [vmem:[%s2543_s0 + $0x18] sm:$0xff]   ;;  %v2093_v39 = vld [vmem:[#allocation5 + $0xc0] ss:$16 sps:$4 sm:$0xff]   ;;  %v2099_v41 = vld [vmem:[#allocation5 + $0xe4] ss:$16 sps:$4 sm:$0xff]   ;;  %v81_v48 = vsub.s32 2, %v72_v47 }
  0x33   :  { %530 = vmatpush1.bf16.msra.mxu0 %v2010_v16  ;;  %v2095_v40 = vld [vmem:[#allocation5 + $0xc8] ss:$16 sps:$4 sm:$0xff]   ;;  %v2101_v42 = vld [vmem:[#allocation5 + $0xec] ss:$16 sps:$4 sm:$0xff]   ;;  %v2107_v43 = vld [vmem:[#allocation5 + $0xe0] ss:$16 sps:$4 sm:$0xff]  }
  0x34   :  { %571 = vmatpush1.bf16.msra.mxu1 %v2014_v17  ;;  %531 = vmatprep.subr.bf16.mxu0 %v2018_v18  ;;  %v2109_v44 = vld [vmem:[#allocation5 + $0xe8] ss:$16 sps:$4 sm:$0xff]   ;;  %v85_v49 = vsub.s32 3, %v72_v47  ;;  %v73_v50 = vsub.s32 0, %v72_v47  ;;  %v69_v51 = vld [vmem:[%s2546_s3] sm:$0xf] }
  0x35   :  { %572 = vmatprep.subr.bf16.mxu1 %v2022_v19  ;;  %v77_v52 = vsub.s32 1, %v72_v47  ;;  %v2158_v53 = vrot.slane %v69_v51, %v81_v48  ;;  %vm1923_vm2 = vmmov 0   ;;  %s1925_s12 = smov [#allocation10]  }
  0x36   :  { %1547 = vmatmul.mubr.msk.bf16.gmra.mrb[4].mxu0 %vm121_vm1, %v1692_v20  ;;  %v2164_v56 = vrot.slane %v69_v51, %v85_v49  ;;  %v74_v57 = vrot.slane %v69_v51, %v73_v50  ;;  %s1520_s13 = sshll.u32 %s1925_s12, 4  ;;  %s1521_s13 = int_to_ptr.vmem [resolvable:$true] %s1520_s13 }
  0x37   :  { %1552 = vmatmul.mubr.msk.bf16.gmra.mrb[4].mxu1 %vm121_vm1, %v1692_v20  ;;  %532 = vmatpush1.bf16.msra.mxu0 %v2029_v21  ;;  %v78_v60 = vrot.slane %v69_v51, %v77_v52  ;;  %s1887_s14 = scalar_lea.vmem %s1521_s13, 128  ;;  %p1892_p3 = scmp.lt.s32.totalorder %s1521_s13, %s1521_s13 }
  0x38   :  { %573 = vmatpush1.bf16.msra.mxu1 %v2033_v22  ;;  %533 = vmatprep.subr.bf16.mxu0 %v2035_v23  ;;  %p1888_p2 = scmp.ne.s32.totalorder %s1521_s13, %s1887_s14  ;;  %p1893_p4 = scmp.lt.s32.totalorder %s1887_s14, %s1887_s14 }
  0x39   :  { %574 = vmatprep.subr.bf16.mxu1 %v2039_v24  ;;  %199 = vmatprep.mubr.bf16.mxu0 %v2552_v0 }
  0x3a   :  { %272 = vmatprep.mubr.bf16.mxu1 %v2552_v0  ;;  %p1894_p5 = por %p1893_p4, %p1892_p3 }
  0x3b   :  { %534 = vmatpush1.bf16.msra.mxu0 %v2045_v25 }
  0x3c   :  { %575 = vmatpush1.bf16.msra.mxu1 %v2047_v26  ;;  %535 = vmatprep.subr.bf16.mxu0 %v2049_v27  ;;  %p1895_p6 = pnand %p1894_p5, %p1888_p2 }
  0x3d   :  { %576 = vmatprep.subr.bf16.mxu1 %v2053_v28 }
  0x3e   :  { %1548 = vmatmul.mubr.msk.bf16.gmra.mrb[8].mxu0 %vm121_vm1, %v1705_v29 }
  0x3f   :  { %1553 = vmatmul.mubr.msk.bf16.gmra.mrb[8].mxu1 %vm121_vm1, %v1705_v29  ;;  %536 = vmatpush1.bf16.msra.mxu0 %v2060_v30 }
  0x40   :  { %577 = vmatpush1.bf16.msra.mxu1 %v2062_v31  ;;  %537 = vmatprep.subr.bf16.mxu0 %v2066_v32 }
  0x41   :  { %578 = vmatprep.subr.bf16.mxu1 %v2070_v33  ;;  %209 = vmatprep.mubr.bf16.mxu0 %v2552_v0 }
  0x42   :  { %282 = vmatprep.mubr.bf16.mxu1 %v2552_v0 }
  0x43   :  { %538 = vmatpush1.bf16.msra.mxu0 %v2074_v34 }
  0x44   :  { %579 = vmatpush1.bf16.msra.mxu1 %v2078_v35  ;;  %539 = vmatprep.subr.bf16.mxu0 %v2082_v36 }
  0x45   :  { %580 = vmatprep.subr.bf16.mxu1 %v2084_v37 }
  0x46   :  { %1549 = vmatmul.mubr.msk.bf16.gmra.mrb[12].mxu0 %vm121_vm1, %v1718_v38 }
  0x47   :  { %1554 = vmatmul.mubr.msk.bf16.gmra.mrb[12].mxu1 %vm121_vm1, %v1718_v38  ;;  %540 = vmatpush1.bf16.msra.mxu0 %v2093_v39 }
  0x48   :  { %581 = vmatpush1.bf16.msra.mxu1 %v2095_v40  ;;  %541 = vmatprep.subr.bf16.mxu0 %v2099_v41 }
  0x49   :  { %582 = vmatprep.subr.bf16.mxu1 %v2101_v42  ;;  %559 = vmatprep.mubr.bf16.mxu0 %v2552_v0 }
  0x4a   :  { %600 = vmatprep.mubr.bf16.mxu1 %v2552_v0 }
  0x4b   :  { %542 = vmatpush1.bf16.msra.mxu0 %v2107_v43 }
  0x4c   :  { %583 = vmatpush1.bf16.msra.mxu1 %v2109_v44  ;;  %639 = vmatprep.subr.bf16.mxu0 %v1996_v8 }
  0x4d   :  { %680 = vmatprep.subr.bf16.mxu1 %v1998_v11 }
  0x4e   :  { %560 = vmatmul.mubr.bf16.vlgmr.msra.gmra.mrb[16].mxu0 %v2550_v45 }
  0x4f   :  { %601 = vmatmul.mubr.bf16.vlgmr.msra.gmra.mrb[16].mxu1 %v2550_v45  ;;  %640 = vmatpush1.bf16.msra.mxu0 %v2000_v12 }
  0x50   :  { %681 = vmatpush1.bf16.msra.mxu1 %v2002_v13  ;;  %641 = vmatprep.subr.bf16.mxu0 %v2006_v14 }
  0x51   :  { %682 = vmatprep.subr.bf16.mxu1 %v2008_v15  ;;  %671 = vmatprep.mubr.bf16.mxu0 %v2552_v0 }
  0x52   :  { %712 = vmatprep.mubr.bf16.mxu1 %v2552_v0 }
  0x53   :  { %642 = vmatpush1.bf16.msra.mxu0 %v2010_v16 }
  0x54   :  { %683 = vmatpush1.bf16.msra.mxu1 %v2014_v17  ;;  %643 = vmatprep.subr.bf16.mxu0 %v2018_v18 }
  0x55   :  { %684 = vmatprep.subr.bf16.mxu1 %v2022_v19 }
  0x57   :  { %644 = vmatpush1.bf16.msra.mxu0 %v2029_v21 }
  0x58   :  { %685 = vmatpush1.bf16.msra.mxu1 %v2033_v22  ;;  %645 = vmatprep.subr.bf16.mxu0 %v2035_v23 }
  0x59   :  { %686 = vmatprep.subr.bf16.mxu1 %v2039_v24 }
  0x5b   :  { %646 = vmatpush1.bf16.msra.mxu0 %v2045_v25 }
  0x5c   :  { %687 = vmatpush1.bf16.msra.mxu1 %v2047_v26  ;;  %647 = vmatprep.subr.bf16.mxu0 %v2049_v27 }
  0x5d   :  { %688 = vmatprep.subr.bf16.mxu1 %v2053_v28 }
  0x5f   :  { %648 = vmatpush1.bf16.msra.mxu0 %v2060_v30 }
  0x60   :  { %689 = vmatpush1.bf16.msra.mxu1 %v2062_v31  ;;  %649 = vmatprep.subr.bf16.mxu0 %v2066_v32 }
  0x61   :  { %690 = vmatprep.subr.bf16.mxu1 %v2070_v33 }
  0x63   :  { %650 = vmatpush1.bf16.msra.mxu0 %v2074_v34 }
  0x64   :  { %691 = vmatpush1.bf16.msra.mxu1 %v2078_v35  ;;  %651 = vmatprep.subr.bf16.mxu0 %v2082_v36 }
  0x65   :  { %692 = vmatprep.subr.bf16.mxu1 %v2084_v37 }
  0x67   :  { %652 = vmatpush1.bf16.msra.mxu0 %v2093_v39 }
  0x68   :  { %693 = vmatpush1.bf16.msra.mxu1 %v2095_v40  ;;  %653 = vmatprep.subr.bf16.mxu0 %v2099_v41 }
  0x69   :  { %694 = vmatprep.subr.bf16.mxu1 %v2101_v42 }
  0x6b   :  { %654 = vmatpush1.bf16.msra.mxu0 %v2107_v43 }
  0x6c   :  { %695 = vmatpush1.bf16.msra.mxu1 %v2109_v44  ;;  %751 = vmatprep.subr.bf16.mxu0 %v1996_v8 }
  0x6d   :  { %792 = vmatprep.subr.bf16.mxu1 %v1998_v11 }
 0x101   :  { %v2160_v54 = vpop.f32.mrb[0].mxu0 }
 0x102   :  { %v2162_v55 = vpop.f32.mrb[0].mxu1  ;;  %v183_v58 = vpop.f32.mrb[1].mxu0 }
 0x103   :  { %v256_v59 = vpop.f32.mrb[1].mxu1  ;;  %v185_v61 = vpop.f32.mrb[2].mxu0 }
 0x104   :  { %v258_v62 = vpop.f32.mrb[2].mxu1  ;;  %v2166_v63 = vadd.f32 %v185_v61, %v74_v57  ;;  %v187_v1 = vpop.f32.mrb[3].mxu0 }
 0x105   :  { %v2169_v2 = vadd.f32 %v258_v62, %v2158_v53  ;;  %v260_v3 = vpop.f32.mrb[3].mxu1  ;;  %v2171_v4 = vadd.f32 %v187_v1, %v78_v60 }
 0x106   :  { %v2174_v5 = vadd.f32 %v260_v3, %v2164_v56 }
 0x109   :  { %v191_v6 = vpop.f32.mrb[4].mxu0 }
 0x10a   :  { %v264_v7 = vpop.f32.mrb[4].mxu1  ;;  %v2176_v9 = vadd.f32 %v191_v6, %v74_v57  ;;  %v193_v10 = vpop.f32.mrb[5].mxu0 }
 0x10b   :  { %v2179_v20 = vadd.f32 %v264_v7, %v2158_v53  ;;  %v266_v29 = vpop.f32.mrb[5].mxu1  ;;  %v2181_v38 = vadd.f32 %v193_v10, %v78_v60  ;;  %v195_v46 = vpop.f32.mrb[6].mxu0 }
 0x10c   :  { %v2184_v47 = vadd.f32 %v266_v29, %v2164_v56  ;;  %v268_v48 = vpop.f32.mrb[6].mxu1  ;;  %v2186_v49 = vadd.f32 %v195_v46, %v74_v57  ;;  %v197_v50 = vpop.f32.mrb[7].mxu0 }
 0x10d   :  { %v2189_v51 = vadd.f32 %v268_v48, %v2158_v53  ;;  %v270_v52 = vpop.f32.mrb[7].mxu1  ;;  %v2191_v61 = vadd.f32 %v197_v50, %v78_v60 }
 0x10e   :  { %2554 = vst [vmem:[#allocation14_spill] sm:$0xff] %v2184_v47  ;;  %2555 = vst [vmem:[#allocation15_spill] sm:$0xff] %v2186_v49  ;;  %v2194_v62 = vadd.f32 %v270_v52, %v2164_v56 }
 0x10f   :  { %2556 = vst [vmem:[#allocation16_spill] sm:$0xff] %v2189_v51  ;;  %2557 = vst [vmem:[#allocation17_spill] sm:$0xff] %v2191_v61 }
 0x110   :  { %2558 = vst [vmem:[#allocation18_spill] sm:$0xff] %v2194_v62 }
 0x111   :  { %v201_v1 = vpop.f32.mrb[8].mxu0 }
 0x112   :  { %v274_v3 = vpop.f32.mrb[8].mxu1  ;;  %v2196_v6 = vadd.f32 %v201_v1, %v74_v57  ;;  %v203_v7 = vpop.f32.mrb[9].mxu0 }
 0x113   :  { %v2199_v10 = vadd.f32 %v274_v3, %v2158_v53  ;;  %v276_v29 = vpop.f32.mrb[9].mxu1  ;;  %v2201_v46 = vadd.f32 %v203_v7, %v78_v60  ;;  %v205_v45 = vpop.f32.mrb[10].mxu0 }
 0x114   :  { %2559 = vst [vmem:[#allocation19_spill] sm:$0xff] %v2196_v6  ;;  %v2204_v48 = vadd.f32 %v276_v29, %v2164_v56  ;;  %v278_v50 = vpop.f32.mrb[10].mxu1  ;;  %v2206_v0 = vadd.f32 %v205_v45, %v74_v57  ;;  %v207_v52 = vpop.f32.mrb[11].mxu0 }
 0x115   :  { %2560 = vst [vmem:[#allocation20_spill] sm:$0xff] %v2199_v10  ;;  %2561 = vst [vmem:[#allocation21_spill] sm:$0xff] %v2201_v46  ;;  %v2209_v62 = vadd.f32 %v278_v50, %v2158_v53  ;;  %v280_v1 = vpop.f32.mrb[11].mxu1  ;;  %v2211_v6 = vadd.f32 %v207_v52, %v78_v60 }
 0x116   :  { %2562 = vst [vmem:[#allocation22_spill] sm:$0xff] %v2204_v48  ;;  %2563 = vst [vmem:[#allocation23_spill] sm:$0xff] %v2206_v0  ;;  %v2214_v3 = vadd.f32 %v280_v1, %v2164_v56 }
 0x117   :  { %2564 = vst [vmem:[#allocation24_spill] sm:$0xff] %v2209_v62  ;;  %2565 = vst [vmem:[#allocation25_spill] sm:$0xff] %v2211_v6 }
 0x118   :  { %2566 = vst [vmem:[#allocation26_spill] sm:$0xff] %v2214_v3 }
 0x119   :  { %v211_v10 = vpop.f32.mrb[12].mxu0 }
 0x11a   :  { %v284_v7 = vpop.f32.mrb[12].mxu1  ;;  %v2216_v46 = vadd.f32 %v211_v10, %v74_v57  ;;  %v213_v61 = vpop.f32.mrb[13].mxu0 }
 0x11b   :  { %v2219_v29 = vadd.f32 %v284_v7, %v2158_v53  ;;  %v286_v45 = vpop.f32.mrb[13].mxu1  ;;  %v2221_v0 = vadd.f32 %v213_v61, %v78_v60  ;;  %v215_v48 = vpop.f32.mrb[14].mxu0  ;;  %v182_v61 = vadd.f32 %v2160_v54, %v74_v57 }
 0x11c   :  { %2567 = vst [vmem:[#allocation27_spill] sm:$0xff] %v2216_v46  ;;  %v2224_v50 = vadd.f32 %v286_v45, %v2164_v56  ;;  %v288_v52 = vpop.f32.mrb[14].mxu1  ;;  %v2226_v6 = vadd.f32 %v215_v48, %v74_v57  ;;  %v217_v1 = vpop.f32.mrb[15].mxu0  ;;  %v184_v45 = vadd.f32 %v183_v58, %v78_v60 }
 0x11d   :  { %2568 = vst [vmem:[#allocation28_spill] sm:$0xff] %v2219_v29  ;;  %2569 = vst [vmem:[#allocation29_spill] sm:$0xff] %v2221_v0  ;;  %v2229_v3 = vadd.f32 %v288_v52, %v2158_v53  ;;  %v290_v10 = vpop.f32.mrb[15].mxu1  ;;  %v2231_v46 = vadd.f32 %v217_v1, %v78_v60  ;;  %v255_v0 = vadd.f32 %v2162_v55, %v2158_v53 }
 0x11e   :  { %2570 = vst [vmem:[#allocation30_spill] sm:$0xff] %v2224_v50  ;;  %2571 = vst [vmem:[#allocation31_spill] sm:$0xff] %v2226_v6  ;;  %v2234_v7 = vadd.f32 %v290_v10, %v2164_v56  ;;  %v257_v50 = vadd.f32 %v256_v59, %v2164_v56 }
 0x11f   :  { %2572 = vst [vmem:[#allocation32_spill] sm:$0xff] %v2229_v3  ;;  %2573 = vst [vmem:[#allocation33_spill] sm:$0xff] %v2231_v46 }
 0x120   :  { %2574 = vst [vmem:[#allocation34_spill] sm:$0xff] %v2234_v7 }
 0x121   :  { %v561_v48 = vpop.f32.mrb[16].mxu0 }
 0x122   :  { %v602_v6 = vpop.f32.mrb[16].mxu1  ;;  %v609_v29 = vadd.f32 %v561_v48, %v182_v61  ;;  %v563_v52 = vpop.f32.mrb[17].mxu0 }
 0x123   :  { %v611_v62 = vadd.f32 %v602_v6, %v255_v0  ;;  %v604_v3 = vpop.f32.mrb[17].mxu1  ;;  %v610_v51 = vadd.f32 %v563_v52, %v184_v45  ;;  %v565_v46 = vpop.f32.mrb[18].mxu0 }
 0x124   :  { %v612_v1 = vadd.f32 %v604_v3, %v257_v50  ;;  %v606_v49 = vpop.f32.mrb[18].mxu1  ;;  %v613_v10 = vmul.f32 0.5, %v609_v29  ;;  %v566_v7 = vpop.f32.mrb[19].mxu0 }
 0x125   :  { %v607_v47 = vpop.f32.mrb[19].mxu1  ;;  %v614_v54 = vmul.f32 0.5, %v610_v51  ;;  %v615_v53 = vmul.f32 0.5, %v611_v62  ;;  %v2575_v7 = vmov 0  }
 0x126   :  { %1731 = vtanh.f32 %v613_v10 }
 0x127   :  { %1733 = vtanh.f32 %v614_v54 }
 0x128   :  { %1735 = vtanh.f32 %v612_v1 }
 0x129   :  { %1737 = vtanh.f32 %v615_v53 }
 0x130   :  { %v1732_v55 = vpop.eup %1731 }
 0x131   :  { %v619_v56 = vadd.f32 1.0, %v1732_v55  ;;  %v1734_v57 = vpop.eup %1733 }
 0x132   :  { %v620_v0 = vadd.f32 1.0, %v1734_v57  ;;  %v1736_v59 = vpop.eup %1735 }
 0x133   :  { %v622_v58 = vmul.f32 0.5, %v619_v56  ;;  %v1738_v47 = vpop.eup %1737 }
 0x134   :  { %v623_v60 = vmul.f32 0.5, %v620_v0  ;;  %v621_v49 = vadd.f32 1.0, %v1738_v47 }
 0x135   :  { %v627_v6 = vmul.f32 %v1736_v59, %v622_v58 }
 0x136   :  { %v626_v3 = vmul.f32 0.0, %v623_v60  ;;  %v624_v51 = vmul.f32 0.5, %v621_v49 }
 0x138   :  { %v2240_v46 = vadd.f32 %v627_v6, %v626_v3 }
 0x13a   :  { %1739 = vtanh.f32 %v2240_v46 }
 0x144   :  { %v1740_v29 = vpop.eup %1739 }
 0x145   :  { %v630_v50 = vmul.f32 %v1740_v29, %v624_v51 }
 0x147   :  { %v638_v62 = vpack.c.bf16 %v630_v50, %v630_v50 }
 0x149   :  { %672 = vmatmul.mubr.bf16.vlgmr.msra.gmra.mrb[20].mxu0 %v638_v62  ;;  %713 = vmatmul.mubr.bf16.vlgmr.msra.gmra.mrb[20].mxu1 %v638_v62 }
 0x14a   :  { %752 = vmatpush1.bf16.msra.mxu0 %v2000_v12  ;;  %793 = vmatpush1.bf16.msra.mxu1 %v2002_v13 }
 0x14b   :  { %753 = vmatprep.subr.bf16.mxu0 %v2006_v14  ;;  %794 = vmatprep.subr.bf16.mxu1 %v2008_v15 }
 0x14c   :  { %783 = vmatprep.mubr.bf16.mxu0 %v2575_v7  ;;  %824 = vmatprep.mubr.bf16.mxu1 %v2575_v7 }
 0x14e   :  { %754 = vmatpush1.bf16.msra.mxu0 %v2010_v16  ;;  %795 = vmatpush1.bf16.msra.mxu1 %v2014_v17 }
 0x14f   :  { %755 = vmatprep.subr.bf16.mxu0 %v2018_v18  ;;  %796 = vmatprep.subr.bf16.mxu1 %v2022_v19 }
 0x152   :  { %756 = vmatpush1.bf16.msra.mxu0 %v2029_v21  ;;  %797 = vmatpush1.bf16.msra.mxu1 %v2033_v22 }
 0x153   :  { %757 = vmatprep.subr.bf16.mxu0 %v2035_v23  ;;  %798 = vmatprep.subr.bf16.mxu1 %v2039_v24 }
 0x156   :  { %758 = vmatpush1.bf16.msra.mxu0 %v2045_v25  ;;  %799 = vmatpush1.bf16.msra.mxu1 %v2047_v26 }
 0x157   :  { %759 = vmatprep.subr.bf16.mxu0 %v2049_v27  ;;  %800 = vmatprep.subr.bf16.mxu1 %v2053_v28 }
 0x15a   :  { %760 = vmatpush1.bf16.msra.mxu0 %v2060_v30  ;;  %801 = vmatpush1.bf16.msra.mxu1 %v2062_v31 }
 0x15b   :  { %761 = vmatprep.subr.bf16.mxu0 %v2066_v32  ;;  %802 = vmatprep.subr.bf16.mxu1 %v2070_v33 }
 0x15e   :  { %762 = vmatpush1.bf16.msra.mxu0 %v2074_v34  ;;  %803 = vmatpush1.bf16.msra.mxu1 %v2078_v35 }
 0x15f   :  { %763 = vmatprep.subr.bf16.mxu0 %v2082_v36  ;;  %804 = vmatprep.subr.bf16.mxu1 %v2084_v37 }
 0x162   :  { %764 = vmatpush1.bf16.msra.mxu0 %v2093_v39  ;;  %805 = vmatpush1.bf16.msra.mxu1 %v2095_v40 }
 0x163   :  { %765 = vmatprep.subr.bf16.mxu0 %v2099_v41  ;;  %806 = vmatprep.subr.bf16.mxu1 %v2101_v42 }
 0x166   :  { %766 = vmatpush1.bf16.msra.mxu0 %v2107_v43  ;;  %807 = vmatpush1.bf16.msra.mxu1 %v2109_v44 }
 0x167   :  { %863 = vmatprep.subr.bf16.mxu0 %v1996_v8  ;;  %904 = vmatprep.subr.bf16.mxu1 %v1998_v11 }
 0x21c   :  { %v673_v61 = vpop.f32.mrb[20].mxu0  ;;  %v714_v45 = vpop.f32.mrb[20].mxu1 }
 0x21d   :  { %v721_v48 = vadd.f32 %v673_v61, %v2166_v63  ;;  %v723_v52 = vadd.f32 %v714_v45, %v2169_v2  ;;  %v675_v1 = vpop.f32.mrb[21].mxu0  ;;  %v716_v10 = vpop.f32.mrb[21].mxu1 }
 0x21e   :  { %v722_v54 = vadd.f32 %v675_v1, %v2171_v4  ;;  %v724_v53 = vadd.f32 %v716_v10, %v2174_v5  ;;  %v677_v55 = vpop.f32.mrb[22].mxu0  ;;  %v718_v56 = vpop.f32.mrb[22].mxu1 }
 0x21f   :  { %v725_v57 = vmul.f32 0.5, %v721_v48  ;;  %v678_v58 = vpop.f32.mrb[23].mxu0  ;;  %v719_v0 = vpop.f32.mrb[23].mxu1  ;;  %v727_v60 = vmul.f32 0.5, %v723_v52 }
 0x220   :  { %v726_v59 = vmul.f32 0.5, %v722_v54 }
 0x221   :  { %1741 = vtanh.f32 %v725_v57  ;;  %v2576_v57 = vld [vmem:[#allocation14_spill] sm:$0xff] }
 0x222   :  { %1743 = vtanh.f32 %v726_v59 }
 0x223   :  { %1745 = vtanh.f32 %v724_v53 }
 0x224   :  { %1747 = vtanh.f32 %v727_v60 }
 0x22b   :  { %v1742_v6 = vpop.eup %1741 }
 0x22c   :  { %v731_v63 = vadd.f32 1.0, %v1742_v6  ;;  %v1744_v3 = vpop.eup %1743 }
 0x22d   :  { %v732_v47 = vadd.f32 1.0, %v1744_v3  ;;  %v1746_v49 = vpop.eup %1745 }
 0x22e   :  { %v734_v2 = vmul.f32 0.5, %v731_v63  ;;  %v1748_v50 = vpop.eup %1747 }
 0x22f   :  { %v735_v4 = vmul.f32 0.5, %v732_v47  ;;  %v733_v62 = vadd.f32 1.0, %v1748_v50 }
 0x230   :  { %v739_v51 = vmul.f32 %v1746_v49, %v734_v2 }
 0x231   :  { %v738_v5 = vmul.f32 %v735_v4, %v2240_v46  ;;  %v736_v61 = vmul.f32 0.5, %v733_v62 }
 0x233   :  { %v2282_v29 = vadd.f32 %v739_v51, %v738_v5 }
 0x235   :  { %1749 = vtanh.f32 %v2282_v29 }
 0x23f   :  { %v1750_v45 = vpop.eup %1749 }
 0x240   :  { %v742_v48 = vmul.f32 %v1750_v45, %v736_v61 }
 0x242   :  { %v750_v52 = vpack.c.bf16 %v742_v48, %v742_v48 }
 0x244   :  { %784 = vmatmul.mubr.bf16.vlgmr.msra.gmra.mrb[24].mxu0 %v750_v52  ;;  %825 = vmatmul.mubr.bf16.vlgmr.msra.gmra.mrb[24].mxu1 %v750_v52 }
 0x245   :  { %864 = vmatpush1.bf16.msra.mxu0 %v2000_v12  ;;  %905 = vmatpush1.bf16.msra.mxu1 %v2002_v13 }
 0x246   :  { %865 = vmatprep.subr.bf16.mxu0 %v2006_v14  ;;  %906 = vmatprep.subr.bf16.mxu1 %v2008_v15 }
 0x247   :  { %895 = vmatprep.mubr.bf16.mxu0 %v2575_v7  ;;  %936 = vmatprep.mubr.bf16.mxu1 %v2575_v7 }
 0x249   :  { %866 = vmatpush1.bf16.msra.mxu0 %v2010_v16  ;;  %907 = vmatpush1.bf16.msra.mxu1 %v2014_v17 }
 0x24a   :  { %867 = vmatprep.subr.bf16.mxu0 %v2018_v18  ;;  %908 = vmatprep.subr.bf16.mxu1 %v2022_v19 }
 0x24d   :  { %868 = vmatpush1.bf16.msra.mxu0 %v2029_v21  ;;  %909 = vmatpush1.bf16.msra.mxu1 %v2033_v22 }
 0x24e   :  { %869 = vmatprep.subr.bf16.mxu0 %v2035_v23  ;;  %910 = vmatprep.subr.bf16.mxu1 %v2039_v24 }
 0x251   :  { %870 = vmatpush1.bf16.msra.mxu0 %v2045_v25  ;;  %911 = vmatpush1.bf16.msra.mxu1 %v2047_v26 }
 0x252   :  { %871 = vmatprep.subr.bf16.mxu0 %v2049_v27  ;;  %912 = vmatprep.subr.bf16.mxu1 %v2053_v28 }
 0x255   :  { %872 = vmatpush1.bf16.msra.mxu0 %v2060_v30  ;;  %913 = vmatpush1.bf16.msra.mxu1 %v2062_v31 }
 0x256   :  { %873 = vmatprep.subr.bf16.mxu0 %v2066_v32  ;;  %914 = vmatprep.subr.bf16.mxu1 %v2070_v33 }
 0x259   :  { %874 = vmatpush1.bf16.msra.mxu0 %v2074_v34  ;;  %915 = vmatpush1.bf16.msra.mxu1 %v2078_v35 }
 0x25a   :  { %875 = vmatprep.subr.bf16.mxu0 %v2082_v36  ;;  %916 = vmatprep.subr.bf16.mxu1 %v2084_v37 }
 0x25d   :  { %876 = vmatpush1.bf16.msra.mxu0 %v2093_v39  ;;  %917 = vmatpush1.bf16.msra.mxu1 %v2095_v40 }
 0x25e   :  { %877 = vmatprep.subr.bf16.mxu0 %v2099_v41  ;;  %918 = vmatprep.subr.bf16.mxu1 %v2101_v42 }
 0x261   :  { %878 = vmatpush1.bf16.msra.mxu0 %v2107_v43  ;;  %919 = vmatpush1.bf16.msra.mxu1 %v2109_v44 }
 0x262   :  { %975 = vmatprep.subr.bf16.mxu0 %v1996_v8  ;;  %1016 = vmatprep.subr.bf16.mxu1 %v1998_v11 }
 0x317   :  { %v785_v46 = vpop.f32.mrb[24].mxu0  ;;  %v826_v1 = vpop.f32.mrb[24].mxu1 }
 0x318   :  { %v833_v10 = vadd.f32 %v785_v46, %v2176_v9  ;;  %v835_v54 = vadd.f32 %v826_v1, %v2179_v20  ;;  %v787_v53 = vpop.f32.mrb[25].mxu0  ;;  %v828_v55 = vpop.f32.mrb[25].mxu1 }
 0x319   :  { %v834_v56 = vadd.f32 %v787_v53, %v2181_v38  ;;  %v836_v58 = vadd.f32 %v828_v55, %v2576_v57  ;;  %v789_v0 = vpop.f32.mrb[26].mxu0  ;;  %v830_v59 = vpop.f32.mrb[26].mxu1  ;;  %v2578_v55 = vld [vmem:[#allocation16_spill] sm:$0xff] }
 0x31a   :  { %v837_v60 = vmul.f32 0.5, %v833_v10  ;;  %v790_v6 = vpop.f32.mrb[27].mxu0  ;;  %v831_v63 = vpop.f32.mrb[27].mxu1  ;;  %v839_v2 = vmul.f32 0.5, %v835_v54  ;;  %v2577_v54 = vld [vmem:[#allocation15_spill] sm:$0xff]  ;;  %v2579_v0 = vld [vmem:[#allocation17_spill] sm:$0xff] }
 0x31b   :  { %v838_v3 = vmul.f32 0.5, %v834_v56 }
 0x31c   :  { %1751 = vtanh.f32 %v837_v60  ;;  %v2580_v60 = vld [vmem:[#allocation18_spill] sm:$0xff] }
 0x31d   :  { %1753 = vtanh.f32 %v838_v3 }
 0x31e   :  { %1755 = vtanh.f32 %v836_v58 }
 0x31f   :  { %1757 = vtanh.f32 %v839_v2 }
 0x326   :  { %v1752_v47 = vpop.eup %1751 }
 0x327   :  { %v843_v9 = vadd.f32 1.0, %v1752_v47  ;;  %v1754_v49 = vpop.eup %1753 }
 0x328   :  { %v844_v4 = vadd.f32 1.0, %v1754_v49  ;;  %v1756_v51 = vpop.eup %1755 }
 0x329   :  { %v846_v20 = vmul.f32 0.5, %v843_v9  ;;  %v1758_v61 = vpop.eup %1757 }
 0x32a   :  { %v847_v38 = vmul.f32 0.5, %v844_v4  ;;  %v845_v45 = vadd.f32 1.0, %v1758_v61 }
 0x32b   :  { %v851_v5 = vmul.f32 %v1756_v51, %v846_v20 }
 0x32c   :  { %v850_v50 = vmul.f32 %v847_v38, %v2282_v29  ;;  %v848_v48 = vmul.f32 0.5, %v845_v45 }
 0x32e   :  { %v2324_v62 = vadd.f32 %v851_v5, %v850_v50 }
 0x330   :  { %1759 = vtanh.f32 %v2324_v62 }
 0x33a   :  { %v1760_v52 = vpop.eup %1759 }
 0x33b   :  { %v854_v46 = vmul.f32 %v1760_v52, %v848_v48 }
 0x33d   :  { %v862_v1 = vpack.c.bf16 %v854_v46, %v854_v46 }
 0x33f   :  { %896 = vmatmul.mubr.bf16.vlgmr.msra.gmra.mrb[28].mxu0 %v862_v1  ;;  %937 = vmatmul.mubr.bf16.vlgmr.msra.gmra.mrb[28].mxu1 %v862_v1 }
 0x340   :  { %976 = vmatpush1.bf16.msra.mxu0 %v2000_v12  ;;  %1017 = vmatpush1.bf16.msra.mxu1 %v2002_v13 }
 0x341   :  { %977 = vmatprep.subr.bf16.mxu0 %v2006_v14  ;;  %1018 = vmatprep.subr.bf16.mxu1 %v2008_v15 }
 0x342   :  { %1007 = vmatprep.mubr.bf16.mxu0 %v2575_v7  ;;  %1048 = vmatprep.mubr.bf16.mxu1 %v2575_v7 }
 0x344   :  { %978 = vmatpush1.bf16.msra.mxu0 %v2010_v16  ;;  %1019 = vmatpush1.bf16.msra.mxu1 %v2014_v17 }
 0x345   :  { %979 = vmatprep.subr.bf16.mxu0 %v2018_v18  ;;  %1020 = vmatprep.subr.bf16.mxu1 %v2022_v19 }
 0x348   :  { %980 = vmatpush1.bf16.msra.mxu0 %v2029_v21  ;;  %1021 = vmatpush1.bf16.msra.mxu1 %v2033_v22 }
 0x349   :  { %981 = vmatprep.subr.bf16.mxu0 %v2035_v23  ;;  %1022 = vmatprep.subr.bf16.mxu1 %v2039_v24 }
 0x34c   :  { %982 = vmatpush1.bf16.msra.mxu0 %v2045_v25  ;;  %1023 = vmatpush1.bf16.msra.mxu1 %v2047_v26 }
 0x34d   :  { %983 = vmatprep.subr.bf16.mxu0 %v2049_v27  ;;  %1024 = vmatprep.subr.bf16.mxu1 %v2053_v28 }
 0x350   :  { %984 = vmatpush1.bf16.msra.mxu0 %v2060_v30  ;;  %1025 = vmatpush1.bf16.msra.mxu1 %v2062_v31 }
 0x351   :  { %985 = vmatprep.subr.bf16.mxu0 %v2066_v32  ;;  %1026 = vmatprep.subr.bf16.mxu1 %v2070_v33 }
 0x354   :  { %986 = vmatpush1.bf16.msra.mxu0 %v2074_v34  ;;  %1027 = vmatpush1.bf16.msra.mxu1 %v2078_v35 }
 0x355   :  { %987 = vmatprep.subr.bf16.mxu0 %v2082_v36  ;;  %1028 = vmatprep.subr.bf16.mxu1 %v2084_v37 }
 0x358   :  { %988 = vmatpush1.bf16.msra.mxu0 %v2093_v39  ;;  %1029 = vmatpush1.bf16.msra.mxu1 %v2095_v40 }
 0x359   :  { %989 = vmatprep.subr.bf16.mxu0 %v2099_v41  ;;  %1030 = vmatprep.subr.bf16.mxu1 %v2101_v42 }
 0x35c   :  { %990 = vmatpush1.bf16.msra.mxu0 %v2107_v43  ;;  %1031 = vmatpush1.bf16.msra.mxu1 %v2109_v44 }
 0x35d   :  { %1087 = vmatprep.subr.bf16.mxu0 %v1996_v8  ;;  %1128 = vmatprep.subr.bf16.mxu1 %v1998_v11 }
 0x412   :  { %v897_v29 = vpop.f32.mrb[28].mxu0  ;;  %v938_v10 = vpop.f32.mrb[28].mxu1 }
 0x413   :  { %v945_v53 = vadd.f32 %v897_v29, %v2577_v54  ;;  %v947_v56 = vadd.f32 %v938_v10, %v2578_v55  ;;  %v899_v57 = vpop.f32.mrb[29].mxu0  ;;  %v940_v58 = vpop.f32.mrb[29].mxu1 }
 0x414   :  { %v946_v59 = vadd.f32 %v899_v57, %v2579_v0  ;;  %v948_v6 = vadd.f32 %v940_v58, %v2580_v60  ;;  %v901_v63 = vpop.f32.mrb[30].mxu0  ;;  %v942_v3 = vpop.f32.mrb[30].mxu1 }
 0x415   :  { %v949_v2 = vmul.f32 0.5, %v945_v53  ;;  %v902_v47 = vpop.f32.mrb[31].mxu0  ;;  %v943_v9 = vpop.f32.mrb[31].mxu1  ;;  %v951_v11 = vmul.f32 0.5, %v947_v56 }
 0x416   :  { %v950_v8 = vmul.f32 0.5, %v946_v59 }
 0x417   :  { %1761 = vtanh.f32 %v949_v2 }
 0x418   :  { %1763 = vtanh.f32 %v950_v8 }
 0x419   :  { %1765 = vtanh.f32 %v948_v6 }
 0x41a   :  { %1767 = vtanh.f32 %v951_v11 }
 0x421   :  { %v1762_v49 = vpop.eup %1761 }
 0x422   :  { %v955_v20 = vadd.f32 1.0, %v1762_v49  ;;  %v1764_v4 = vpop.eup %1763 }
 0x423   :  { %v956_v38 = vadd.f32 1.0, %v1764_v4  ;;  %v1766_v5 = vpop.eup %1765 }
 0x424   :  { %v958_v51 = vmul.f32 0.5, %v955_v20  ;;  %v1768_v52 = vpop.eup %1767 }
 0x425   :  { %v959_v50 = vmul.f32 0.5, %v956_v38  ;;  %v957_v46 = vadd.f32 1.0, %v1768_v52  ;;  %v2415_v38 = vld [vmem:[#allocation5] ss:$16 sps:$4 sm:$0xff]   ;;  %v2435_v52 = vld [vmem:[#allocation5 + $0x44] ss:$16 sps:$4 sm:$0xff]  }
 0x426   :  { %v963_v61 = vmul.f32 %v1766_v5, %v958_v51  ;;  %v2418_v5 = vld [vmem:[#allocation5 + $0x8] ss:$16 sps:$4 sm:$0xff]  }
 0x427   :  { %v962_v45 = vmul.f32 %v959_v50, %v2324_v62  ;;  %v960_v1 = vmul.f32 0.5, %v957_v46  ;;  %v2421_v50 = vld [vmem:[#allocation5 + $0x24] ss:$16 sps:$4 sm:$0xff]   ;;  %v2438_v46 = vld [vmem:[#allocation5 + $0x4c] ss:$16 sps:$4 sm:$0xff]  }
 0x429   :  { %v2366_v48 = vadd.f32 %v963_v61, %v962_v45  ;;  %v2424_v61 = vld [vmem:[#allocation5 + $0x2c] ss:$16 sps:$4 sm:$0xff]   ;;  %v2429_v45 = vld [vmem:[#allocation5 + $0x20] ss:$16 sps:$4 sm:$0xff]  }
 0x42b   :  { %1769 = vtanh.f32 %v2366_v48 }
 0x435   :  { %v1770_v29 = vpop.eup %1769 }
 0x436   :  { %v966_v10 = vmul.f32 %v1770_v29, %v960_v1  ;;  %v2441_v1 = vld [vmem:[#allocation5 + $0x40] ss:$16 sps:$4 sm:$0xff]   ;;  %v2444_v29 = vld [vmem:[#allocation5 + $0x48] ss:$16 sps:$4 sm:$0xff]  }
 0x438   :  { %v974_v54 = vpack.c.bf16 %v966_v10, %v966_v10  ;;  %v2447_v10 = vld [vmem:[#allocation5 + $0x64] ss:$16 sps:$4 sm:$0xff]  }
 0x43a   :  { %1008 = vmatmul.mubr.bf16.vlgmr.msra.gmra.mrb[32].mxu0 %v974_v54  ;;  %1049 = vmatmul.mubr.bf16.vlgmr.msra.gmra.mrb[32].mxu1 %v974_v54  ;;  %v2450_v54 = vld [vmem:[#allocation5 + $0x6c] ss:$16 sps:$4 sm:$0xff]  }
 0x43b   :  { %1088 = vmatpush1.bf16.msra.mxu0 %v2000_v12  ;;  %1129 = vmatpush1.bf16.msra.mxu1 %v2002_v13  ;;  %v2401_v12 = vld [vmem:[#allocation5 + $0x4] ss:$16 sps:$4 sm:$0xff]   ;;  %v2404_v13 = vld [vmem:[#allocation5 + $0xc] ss:$16 sps:$4 sm:$0xff]  }
 0x43c   :  { %1089 = vmatprep.subr.bf16.mxu0 %v2006_v14  ;;  %1130 = vmatprep.subr.bf16.mxu1 %v2008_v15 }
 0x43d   :  { %1119 = vmatprep.mubr.bf16.mxu0 %v2575_v7  ;;  %1160 = vmatprep.mubr.bf16.mxu1 %v2575_v7 }
 0x43f   :  { %1090 = vmatpush1.bf16.msra.mxu0 %v2010_v16  ;;  %1131 = vmatpush1.bf16.msra.mxu1 %v2014_v17  ;;  %v2581_v16 = vld [vmem:[#allocation19_spill] sm:$0xff] }
 0x440   :  { %1091 = vmatprep.subr.bf16.mxu0 %v2018_v18  ;;  %1132 = vmatprep.subr.bf16.mxu1 %v2022_v19  ;;  %v2582_v18 = vld [vmem:[#allocation20_spill] sm:$0xff] }
 0x443   :  { %1092 = vmatpush1.bf16.msra.mxu0 %v2029_v21  ;;  %1133 = vmatpush1.bf16.msra.mxu1 %v2033_v22 }
 0x444   :  { %1093 = vmatprep.subr.bf16.mxu0 %v2035_v23  ;;  %1134 = vmatprep.subr.bf16.mxu1 %v2039_v24  ;;  %v2583_v23 = vld [vmem:[#allocation21_spill] sm:$0xff] }
 0x447   :  { %1094 = vmatpush1.bf16.msra.mxu0 %v2045_v25  ;;  %1135 = vmatpush1.bf16.msra.mxu1 %v2047_v26  ;;  %v2584_v25 = vld [vmem:[#allocation22_spill] sm:$0xff] }
 0x448   :  { %1095 = vmatprep.subr.bf16.mxu0 %v2049_v27  ;;  %1136 = vmatprep.subr.bf16.mxu1 %v2053_v28 }
 0x44b   :  { %1096 = vmatpush1.bf16.msra.mxu0 %v2060_v30  ;;  %1137 = vmatpush1.bf16.msra.mxu1 %v2062_v31 }
 0x44c   :  { %1097 = vmatprep.subr.bf16.mxu0 %v2066_v32  ;;  %1138 = vmatprep.subr.bf16.mxu1 %v2070_v33 }
 0x44f   :  { %1098 = vmatpush1.bf16.msra.mxu0 %v2074_v34  ;;  %1139 = vmatpush1.bf16.msra.mxu1 %v2078_v35 }
 0x450   :  { %1099 = vmatprep.subr.bf16.mxu0 %v2082_v36  ;;  %1140 = vmatprep.subr.bf16.mxu1 %v2084_v37 }
 0x453   :  { %1100 = vmatpush1.bf16.msra.mxu0 %v2093_v39  ;;  %1141 = vmatpush1.bf16.msra.mxu1 %v2095_v40 }
 0x454   :  { %1101 = vmatprep.subr.bf16.mxu0 %v2099_v41  ;;  %1142 = vmatprep.subr.bf16.mxu1 %v2101_v42 }
 0x457   :  { %1102 = vmatpush1.bf16.msra.mxu0 %v2107_v43  ;;  %1143 = vmatpush1.bf16.msra.mxu1 %v2109_v44 }
 0x458   :  { %1199 = vmatprep.subr.bf16.mxu0 %v2401_v12  ;;  %1240 = vmatprep.subr.bf16.mxu1 %v2404_v13 }
 0x50d   :  { %v1009_v14 = vpop.f32.mrb[32].mxu0  ;;  %v1050_v15 = vpop.f32.mrb[32].mxu1 }
 0x50e   :  { %v1057_v17 = vadd.f32 %v1009_v14, %v2581_v16  ;;  %v1059_v19 = vadd.f32 %v1050_v15, %v2582_v18  ;;  %v1011_v21 = vpop.f32.mrb[33].mxu0  ;;  %v1052_v22 = vpop.f32.mrb[33].mxu1  ;;  %v2453_v14 = vld [vmem:[#allocation5 + $0x60] ss:$16 sps:$4 sm:$0xff]   ;;  %v2456_v15 = vld [vmem:[#allocation5 + $0x68] ss:$16 sps:$4 sm:$0xff]  }
 0x50f   :  { %v1058_v24 = vadd.f32 %v1011_v21, %v2583_v23  ;;  %v1060_v26 = vadd.f32 %v1052_v22, %v2584_v25  ;;  %v1013_v27 = vpop.f32.mrb[34].mxu0  ;;  %v1054_v28 = vpop.f32.mrb[34].mxu1  ;;  %v2459_v16 = vld [vmem:[#allocation5 + $0x84] ss:$16 sps:$4 sm:$0xff]  }
 0x510   :  { %v1061_v62 = vmul.f32 0.5, %v1057_v17  ;;  %v1014_v53 = vpop.f32.mrb[35].mxu0  ;;  %v1055_v55 = vpop.f32.mrb[35].mxu1  ;;  %v1063_v57 = vmul.f32 0.5, %v1059_v19  ;;  %v2462_v17 = vld [vmem:[#allocation5 + $0x8c] ss:$16 sps:$4 sm:$0xff]  }
 0x511   :  { %v1062_v56 = vmul.f32 0.5, %v1058_v24 }
 0x512   :  { %1771 = vtanh.f32 %v1061_v62 }
 0x513   :  { %1773 = vtanh.f32 %v1062_v56 }
 0x514   :  { %1775 = vtanh.f32 %v1060_v26 }
 0x515   :  { %1777 = vtanh.f32 %v1063_v57 }
 0x51c   :  { %v1772_v58 = vpop.eup %1771 }
 0x51d   :  { %v1067_v0 = vadd.f32 1.0, %v1772_v58  ;;  %v1774_v59 = vpop.eup %1773 }
 0x51e   :  { %v1068_v6 = vadd.f32 1.0, %v1774_v59  ;;  %v1776_v63 = vpop.eup %1775 }
 0x51f   :  { %v1070_v60 = vmul.f32 0.5, %v1067_v0  ;;  %v1778_v8 = vpop.eup %1777 }
 0x520   :  { %v1071_v3 = vmul.f32 0.5, %v1068_v6  ;;  %v1069_v11 = vadd.f32 1.0, %v1778_v8  ;;  %v1830_v6 = vld [vmem:[#allocation5 + $0x88] ss:$16 sps:$4 sm:$0xff]   ;;  %v1836_v8 = vld [vmem:[#allocation5 + $0xcc] ss:$16 sps:$4 sm:$0xff]  }
 0x521   :  { %v1075_v2 = vmul.f32 %v1776_v63, %v1070_v60  ;;  %v1831_v63 = vld [vmem:[#allocation5 + $0xa4] ss:$16 sps:$4 sm:$0xff]  }
 0x522   :  { %v1074_v47 = vmul.f32 %v1071_v3, %v2366_v48  ;;  %v1072_v49 = vmul.f32 0.5, %v1069_v11  ;;  %v2432_v48 = vld [vmem:[#allocation5 + $0x28] ss:$16 sps:$4 sm:$0xff]   ;;  %v1832_v3 = vld [vmem:[#allocation5 + $0xac] ss:$16 sps:$4 sm:$0xff]  }
 0x523   :  { %v1837_v11 = vld [vmem:[#allocation5 + $0xc0] ss:$16 sps:$4 sm:$0xff]  }
 0x524   :  { %v2412_v9 = vadd.f32 %v1075_v2, %v1074_v47  ;;  %v1833_v2 = vld [vmem:[#allocation5 + $0xa0] ss:$16 sps:$4 sm:$0xff]   ;;  %v1834_v47 = vld [vmem:[#allocation5 + $0xa8] ss:$16 sps:$4 sm:$0xff]  }
 0x526   :  { %1779 = vtanh.f32 %v2412_v9 }
 0x530   :  { %v1780_v20 = vpop.eup %1779 }
 0x531   :  { %v1078_v4 = vmul.f32 %v1780_v20, %v1072_v49  ;;  %v1838_v49 = vld [vmem:[#allocation5 + $0xc8] ss:$16 sps:$4 sm:$0xff]   ;;  %v1839_v20 = vld [vmem:[#allocation5 + $0xe4] ss:$16 sps:$4 sm:$0xff]  }
 0x533   :  { %v1086_v51 = vpack.c.bf16 %v1078_v4, %v1078_v4  ;;  %v1840_v4 = vld [vmem:[#allocation5 + $0xec] ss:$16 sps:$4 sm:$0xff]  }
 0x535   :  { %1120 = vmatmul.mubr.bf16.vlgmr.msra.gmra.mrb[36].mxu0 %v1086_v51  ;;  %1161 = vmatmul.mubr.bf16.vlgmr.msra.gmra.mrb[36].mxu1 %v1086_v51  ;;  %v1841_v51 = vld [vmem:[#allocation5 + $0xe0] ss:$16 sps:$4 sm:$0xff]  }
 0x536   :  { %1200 = vmatpush1.bf16.msra.mxu0 %v2415_v38  ;;  %1241 = vmatpush1.bf16.msra.mxu1 %v2418_v5 }
 0x537   :  { %1201 = vmatprep.subr.bf16.mxu0 %v2421_v50  ;;  %1242 = vmatprep.subr.bf16.mxu1 %v2424_v61 }
 0x538   :  { %1231 = vmatprep.mubr.bf16.mxu0 %v2575_v7  ;;  %1272 = vmatprep.mubr.bf16.mxu1 %v2575_v7 }
 0x53a   :  { %1202 = vmatpush1.bf16.msra.mxu0 %v2429_v45  ;;  %1243 = vmatpush1.bf16.msra.mxu1 %v2432_v48 }
 0x53b   :  { %1203 = vmatprep.subr.bf16.mxu0 %v2435_v52  ;;  %1244 = vmatprep.subr.bf16.mxu1 %v2438_v46 }
 0x53e   :  { %1204 = vmatpush1.bf16.msra.mxu0 %v2441_v1  ;;  %1245 = vmatpush1.bf16.msra.mxu1 %v2444_v29 }
 0x53f   :  { %1205 = vmatprep.subr.bf16.mxu0 %v2447_v10  ;;  %1246 = vmatprep.subr.bf16.mxu1 %v2450_v54 }
 0x542   :  { %1206 = vmatpush1.bf16.msra.mxu0 %v2453_v14  ;;  %1247 = vmatpush1.bf16.msra.mxu1 %v2456_v15 }
 0x543   :  { %1207 = vmatprep.subr.bf16.mxu0 %v2459_v16  ;;  %1248 = vmatprep.subr.bf16.mxu1 %v2462_v17 }
 0x546   :  { %1208 = vmatpush1.bf16.msra.mxu0 %v2060_v30  ;;  %1249 = vmatpush1.bf16.msra.mxu1 %v2062_v31 }
 0x547   :  { %1209 = vmatprep.subr.bf16.mxu0 %v2066_v32  ;;  %1250 = vmatprep.subr.bf16.mxu1 %v2070_v33  ;;  %v2585_v32 = vld [vmem:[#allocation23_spill] sm:$0xff] }
 0x54a   :  { %1210 = vmatpush1.bf16.msra.mxu0 %v2074_v34  ;;  %1251 = vmatpush1.bf16.msra.mxu1 %v2078_v35  ;;  %v2586_v34 = vld [vmem:[#allocation24_spill] sm:$0xff] }
 0x54b   :  { %1211 = vmatprep.subr.bf16.mxu0 %v2082_v36  ;;  %1252 = vmatprep.subr.bf16.mxu1 %v2084_v37 }
 0x54e   :  { %1212 = vmatpush1.bf16.msra.mxu0 %v2093_v39  ;;  %1253 = vmatpush1.bf16.msra.mxu1 %v2095_v40  ;;  %v2587_v39 = vld [vmem:[#allocation25_spill] sm:$0xff] }
 0x54f   :  { %1213 = vmatprep.subr.bf16.mxu0 %v2099_v41  ;;  %1254 = vmatprep.subr.bf16.mxu1 %v2101_v42  ;;  %v2588_v41 = vld [vmem:[#allocation26_spill] sm:$0xff] }
 0x552   :  { %1214 = vmatpush1.bf16.msra.mxu0 %v2107_v43  ;;  %1255 = vmatpush1.bf16.msra.mxu1 %v2109_v44 }
 0x553   :  { %1311 = vmatprep.subr.bf16.mxu0 %v2401_v12  ;;  %1352 = vmatprep.subr.bf16.mxu1 %v2404_v13 }
 0x608   :  { %v1121_v30 = vpop.f32.mrb[36].mxu0  ;;  %v1162_v31 = vpop.f32.mrb[36].mxu1 }
 0x609   :  { %v1169_v33 = vadd.f32 %v1121_v30, %v2585_v32  ;;  %v1171_v35 = vadd.f32 %v1162_v31, %v2586_v34  ;;  %v1123_v36 = vpop.f32.mrb[37].mxu0  ;;  %v1164_v37 = vpop.f32.mrb[37].mxu1 }
 0x60a   :  { %v1170_v40 = vadd.f32 %v1123_v36, %v2587_v39  ;;  %v1172_v42 = vadd.f32 %v1164_v37, %v2588_v41  ;;  %v1125_v18 = vpop.f32.mrb[38].mxu0  ;;  %v1166_v43 = vpop.f32.mrb[38].mxu1 }
 0x60b   :  { %v1173_v19 = vmul.f32 0.5, %v1169_v33  ;;  %v1126_v44 = vpop.f32.mrb[39].mxu0  ;;  %v1167_v21 = vpop.f32.mrb[39].mxu1  ;;  %v1175_v13 = vmul.f32 0.5, %v1171_v35 }
 0x60c   :  { %v1174_v12 = vmul.f32 0.5, %v1170_v40 }
 0x60d   :  { %1781 = vtanh.f32 %v1173_v19 }
 0x60e   :  { %1783 = vtanh.f32 %v1174_v12 }
 0x60f   :  { %1785 = vtanh.f32 %v1172_v42 }
 0x610   :  { %1787 = vtanh.f32 %v1175_v13 }
 0x617   :  { %v1782_v22 = vpop.eup %1781 }
 0x618   :  { %v1179_v23 = vadd.f32 1.0, %v1782_v22  ;;  %v1784_v24 = vpop.eup %1783 }
 0x619   :  { %v1180_v26 = vadd.f32 1.0, %v1784_v24  ;;  %v1786_v27 = vpop.eup %1785  ;;  %v1420_v24 = vld [vmem:[#allocation8] sm:$0xff] }
 0x61a   :  { %v1182_v25 = vmul.f32 0.5, %v1179_v23  ;;  %v1788_v56 = vpop.eup %1787 }
 0x61b   :  { %v1183_v28 = vmul.f32 0.5, %v1180_v26  ;;  %v1181_v57 = vadd.f32 1.0, %v1788_v56 }
 0x61c   :  { %v1187_v62 = vmul.f32 %v1786_v27, %v1182_v25  ;;  %v1421_v25 = vld [vmem:[#allocation8 + $0x8] sm:$0xff]  ;;  %v1422_v27 = vld [vmem:[#allocation8 + $0x10] sm:$0xff] }
 0x61d   :  { %v1186_v53 = vmul.f32 %v1183_v28, %v2412_v9  ;;  %v1184_v58 = vmul.f32 0.5, %v1181_v57  ;;  %v1835_v9 = vld [vmem:[#allocation5 + $0xc4] ss:$16 sps:$4 sm:$0xff]   ;;  %v1641_v26 = vpack.c.bf16 %v1421_v25, %v1420_v24  ;;  %v1423_v28 = vld [vmem:[#allocation8 + $0x18] sm:$0xff] }
 0x61e   :  { %v1426_v57 = vld [vmem:[#allocation8 + $0x30] sm:$0xff] }
 0x61f   :  { %v2486_v55 = vadd.f32 %v1187_v62, %v1186_v53  ;;  %v1644_v62 = vpack.c.bf16 %v1423_v28, %v1422_v27  ;;  %v1424_v53 = vld [vmem:[#allocation8 + $0x20] sm:$0xff] }
 0x621   :  { %1789 = vtanh.f32 %v2486_v55 }
 0x62b   :  { %v1790_v0 = vpop.eup %1789 }
 0x62c   :  { %v1190_v59 = vmul.f32 %v1790_v0, %v1184_v58  ;;  %v1427_v58 = vld [vmem:[#allocation8 + $0x38] sm:$0xff] }
 0x62d   :  { %v1650_v0 = vpack.c.bf16 %v1427_v58, %v1426_v57 }
 0x62e   :  { %v1198_v60 = vpack.c.bf16 %v1190_v59, %v1190_v59  ;;  %v1428_v59 = vld [vmem:[#allocation8 + $0x40] sm:$0xff] }
 0x630   :  { %1232 = vmatmul.mubr.bf16.vlgmr.msra.gmra.mrb[40].mxu0 %v1198_v60  ;;  %1273 = vmatmul.mubr.bf16.vlgmr.msra.gmra.mrb[40].mxu1 %v1198_v60  ;;  %v1429_v60 = vld [vmem:[#allocation8 + $0x48] sm:$0xff] }
 0x631   :  { %1312 = vmatpush1.bf16.msra.mxu0 %v2415_v38  ;;  %1353 = vmatpush1.bf16.msra.mxu1 %v2418_v5  ;;  %v1842_v38 = vld [vmem:[#allocation5 + $0xe8] ss:$16 sps:$4 sm:$0xff]   ;;  %v2589_v5 = vmov 0.0|0.0  }
 0x632   :  { %1313 = vmatprep.subr.bf16.mxu0 %v2421_v50  ;;  %1354 = vmatprep.subr.bf16.mxu1 %v2424_v61 }
 0x633   :  { %1343 = vmatprep.mubr.bf16.mxu0 %v2575_v7  ;;  %1384 = vmatprep.mubr.bf16.mxu1 %v2575_v7  ;;  %v1829_v7 = vld [vmem:[#allocation5 + $0x80] ss:$16 sps:$4 sm:$0xff]  }
 0x635   :  { %1314 = vmatpush1.bf16.msra.mxu0 %v2429_v45  ;;  %1355 = vmatpush1.bf16.msra.mxu1 %v2432_v48  ;;  %v2590_v45 = vld [vmem:[#allocation27_spill] sm:$0xff] }
 0x636   :  { %1315 = vmatprep.subr.bf16.mxu0 %v2435_v52  ;;  %1356 = vmatprep.subr.bf16.mxu1 %v2438_v46  ;;  %v2591_v52 = vld [vmem:[#allocation28_spill] sm:$0xff] }
 0x639   :  { %1316 = vmatpush1.bf16.msra.mxu0 %v2441_v1  ;;  %1357 = vmatpush1.bf16.msra.mxu1 %v2444_v29 }
 0x63a   :  { %1317 = vmatprep.subr.bf16.mxu0 %v2447_v10  ;;  %1358 = vmatprep.subr.bf16.mxu1 %v2450_v54  ;;  %v2592_v10 = vld [vmem:[#allocation29_spill] sm:$0xff] }
 0x63d   :  { %1318 = vmatpush1.bf16.msra.mxu0 %v2453_v14  ;;  %1359 = vmatpush1.bf16.msra.mxu1 %v2456_v15  ;;  %v2593_v14 = vld [vmem:[#allocation30_spill] sm:$0xff] }
 0x63e   :  { %1319 = vmatprep.subr.bf16.mxu0 %v2459_v16  ;;  %1360 = vmatprep.subr.bf16.mxu1 %v2462_v17 }
 0x641   :  { %1320 = vmatpush1.bf16.msra.mxu0 %v1829_v7  ;;  %1361 = vmatpush1.bf16.msra.mxu1 %v1830_v6  ;;  %v1653_v7 = vpack.c.bf16 %v1429_v60, %v1428_v59  ;;  %v1430_v6 = vld [vmem:[#allocation8 + $0x50] sm:$0xff] }
 0x642   :  { %1321 = vmatprep.subr.bf16.mxu0 %v1831_v63  ;;  %1362 = vmatprep.subr.bf16.mxu1 %v1832_v3  ;;  %v1431_v63 = vld [vmem:[#allocation8 + $0x58] sm:$0xff] }
 0x643   :  { %v1656_v3 = vpack.c.bf16 %v1431_v63, %v1430_v6 }
 0x645   :  { %1322 = vmatpush1.bf16.msra.mxu0 %v1833_v2  ;;  %1363 = vmatpush1.bf16.msra.mxu1 %v1834_v47  ;;  %v1432_v2 = vld [vmem:[#allocation8 + $0x60] sm:$0xff]  ;;  %v1433_v47 = vld [vmem:[#allocation8 + $0x68] sm:$0xff] }
 0x646   :  { %1323 = vmatprep.subr.bf16.mxu0 %v1835_v9  ;;  %1364 = vmatprep.subr.bf16.mxu1 %v1836_v8  ;;  %v1924_v9 = vmov 0.0   ;;  %v1659_v8 = vpack.c.bf16 %v1433_v47, %v1432_v2 }
 0x649   :  { %1324 = vmatpush1.bf16.msra.mxu0 %v1837_v11  ;;  %1365 = vmatpush1.bf16.msra.mxu1 %v1838_v49  ;;  %v1434_v11 = vld [vmem:[#allocation8 + $0x70] sm:$0xff]  ;;  %v1435_v49 = vld [vmem:[#allocation8 + $0x78] sm:$0xff] }
 0x64a   :  { %1325 = vmatprep.subr.bf16.mxu0 %v1839_v20  ;;  %1366 = vmatprep.subr.bf16.mxu1 %v1840_v4  ;;  %v1662_v20 = vpack.c.bf16 %v1435_v49, %v1434_v11 }
 0x64d   :  { %1326 = vmatpush1.bf16.msra.mxu0 %v1841_v51  ;;  %1367 = vmatpush1.bf16.msra.mxu1 %v1842_v38  ;;  %v2594_v38 = vld [vmem:[#allocation31_spill] sm:$0xff] }
 0x64e   :  { %1640 = vmatprep.subr.bf16.mxu0 %v2589_v5 }
 0x703   :  { %v1233_v50 = vpop.f32.mrb[40].mxu0  ;;  %v1274_v61 = vpop.f32.mrb[40].mxu1 }
 0x704   :  { %v1281_v48 = vadd.f32 %v1233_v50, %v2590_v45  ;;  %v1283_v46 = vadd.f32 %v1274_v61, %v2591_v52  ;;  %v1235_v1 = vpop.f32.mrb[41].mxu0  ;;  %v1276_v29 = vpop.f32.mrb[41].mxu1  ;;  %v2595_v61 = vld [vmem:[#allocation32_spill] sm:$0xff] }
 0x705   :  { %v1282_v54 = vadd.f32 %v1235_v1, %v2592_v10  ;;  %v1284_v15 = vadd.f32 %v1276_v29, %v2593_v14  ;;  %v1237_v16 = vpop.f32.mrb[42].mxu0  ;;  %v1278_v17 = vpop.f32.mrb[42].mxu1  ;;  %v2597_v29 = vld [vmem:[#allocation34_spill] sm:$0xff] }
 0x706   :  { %v1285_v30 = vmul.f32 0.5, %v1281_v48  ;;  %v1238_v31 = vpop.f32.mrb[43].mxu0  ;;  %v1279_v32 = vpop.f32.mrb[43].mxu1  ;;  %v1287_v34 = vmul.f32 0.5, %v1283_v46  ;;  %v2596_v46 = vld [vmem:[#allocation33_spill] sm:$0xff] }
 0x707   :  { %v1286_v33 = vmul.f32 0.5, %v1282_v54 }
 0x708   :  { %1791 = vtanh.f32 %v1285_v30 }
 0x709   :  { %1793 = vtanh.f32 %v1286_v33 }
 0x70a   :  { %1795 = vtanh.f32 %v1284_v15 }
 0x70b   :  { %1797 = vtanh.f32 %v1287_v34 }
 0x712   :  { %v1792_v35 = vpop.eup %1791 }
 0x713   :  { %v1291_v36 = vadd.f32 1.0, %v1792_v35  ;;  %v1794_v37 = vpop.eup %1793 }
 0x714   :  { %v1292_v40 = vadd.f32 1.0, %v1794_v37  ;;  %v1796_v41 = vpop.eup %1795 }
 0x715   :  { %v1294_v39 = vmul.f32 0.5, %v1291_v36  ;;  %v1798_v44 = vpop.eup %1797 }
 0x716   :  { %v1295_v42 = vmul.f32 0.5, %v1292_v40  ;;  %v1293_v21 = vadd.f32 1.0, %v1798_v44 }
 0x717   :  { %v1299_v18 = vmul.f32 %v1796_v41, %v1294_v39 }
 0x718   :  { %v1298_v43 = vmul.f32 %v1295_v42, %v2486_v55  ;;  %v1296_v12 = vmul.f32 0.5, %v1293_v21  ;;  %v1425_v55 = vld [vmem:[#allocation8 + $0x28] sm:$0xff] }
 0x719   :  { %v1647_v56 = vpack.c.bf16 %v1425_v55, %v1424_v53 }
 0x71a   :  { %v2513_v19 = vadd.f32 %v1299_v18, %v1298_v43 }
 0x71c   :  { %1799 = vtanh.f32 %v2513_v19 }
 0x726   :  { %v1800_v13 = vpop.eup %1799 }
 0x727   :  { %v1302_v22 = vmul.f32 %v1800_v13, %v1296_v12  ;;  %v1587_v12 = vld [vmem:[%s2548_s5] ss:$0 sm:$0xff] }
 0x729   :  { %v1310_v23 = vpack.c.bf16 %v1302_v22, %v1302_v22 }
 0x72b   :  { %1344 = vmatmul.mubr.bf16.vlgmr.msra.gmra.mrb[44].mxu0 %v1310_v23  ;;  %1385 = vmatmul.mubr.bf16.vlgmr.msra.gmra.mrb[44].mxu1 %v1310_v23 }
 0x72c   :  { %1642 = vmatpush3.bf16.msra.mxu0 %v1641_v26  ;;  %1637 = vmatprep.mubr.msk.f32.mxu0 %vm1923_vm2, %v1924_v9 }
 0x72d   :  { %1643 = vmatprep.subr.bf16.mxu0 %v2589_v5 }
 0x730   :  { %1645 = vmatpush3.bf16.msra.mxu0 %v1644_v62 }
 0x731   :  { %1646 = vmatprep.subr.bf16.mxu0 %v2589_v5 }
 0x734   :  { %1648 = vmatpush3.bf16.msra.mxu0 %v1647_v56 }
 0x735   :  { %1649 = vmatprep.subr.bf16.mxu0 %v2589_v5 }
 0x738   :  { %1651 = vmatpush3.bf16.msra.mxu0 %v1650_v0 }
 0x739   :  { %1652 = vmatprep.subr.bf16.mxu0 %v2589_v5 }
 0x73c   :  { %1654 = vmatpush3.bf16.msra.mxu0 %v1653_v7 }
 0x73d   :  { %1655 = vmatprep.subr.bf16.mxu0 %v2589_v5 }
 0x740   :  { %1657 = vmatpush3.bf16.msra.mxu0 %v1656_v3 }
 0x741   :  { %1658 = vmatprep.subr.bf16.mxu0 %v2589_v5 }
 0x744   :  { %1660 = vmatpush3.bf16.msra.mxu0 %v1659_v8 }
 0x745   :  { %1661 = vmatprep.subr.bf16.mxu0 %v2589_v5 }
 0x748   :  { %1663 = vmatpush3.bf16.msra.mxu0 %v1662_v20 }
 0x7fe   :  { %v1345_v4 = vpop.f32.mrb[44].mxu0  ;;  %v1386_v51 = vpop.f32.mrb[44].mxu1 }
 0x7ff   :  { %v1393_v50 = vadd.f32 %v1345_v4, %v2594_v38  ;;  %v1395_v45 = vadd.f32 %v1386_v51, %v2595_v61  ;;  %v1347_v48 = vpop.f32.mrb[45].mxu0  ;;  %v1388_v52 = vpop.f32.mrb[45].mxu1 }
 0x800   :  { %v1394_v1 = vadd.f32 %v1347_v48, %v2596_v46  ;;  %v1396_v10 = vadd.f32 %v1388_v52, %v2597_v29  ;;  %v1349_v54 = vpop.f32.mrb[46].mxu0  ;;  %v1390_v14 = vpop.f32.mrb[46].mxu1 }
 0x801   :  { %v1397_v15 = vmul.f32 0.5, %v1393_v50  ;;  %v1350_v16 = vpop.f32.mrb[47].mxu0  ;;  %v1391_v17 = vpop.f32.mrb[47].mxu1  ;;  %v1399_v5 = vmul.f32 0.5, %v1395_v45 }
 0x802   :  { %v1398_v30 = vmul.f32 0.5, %v1394_v1 }
 0x803   :  { %1801 = vtanh.f32 %v1397_v15 }
 0x804   :  { %1803 = vtanh.f32 %v1398_v30 }
 0x805   :  { %1805 = vtanh.f32 %v1396_v10 }
 0x806   :  { %1807 = vtanh.f32 %v1399_v5 }
 0x80d   :  { %v1802_v31 = vpop.eup %1801 }
 0x80e   :  { %v1403_v32 = vadd.f32 1.0, %v1802_v31  ;;  %v1804_v33 = vpop.eup %1803 }
 0x80f   :  { %v1404_v35 = vadd.f32 1.0, %v1804_v33  ;;  %v1806_v36 = vpop.eup %1805 }
 0x810   :  { %v1406_v34 = vmul.f32 0.5, %v1403_v32  ;;  %v1808_v42 = vpop.eup %1807 }
 0x811   :  { %v1407_v37 = vmul.f32 0.5, %v1404_v35  ;;  %v1405_v18 = vadd.f32 1.0, %v1808_v42 }
 0x812   :  { %v1411_v39 = vmul.f32 %v1806_v36, %v1406_v34 }
 0x813   :  { %v1410_v40 = vmul.f32 %v1407_v37, %v2513_v19  ;;  %v1408_v43 = vmul.f32 0.5, %v1405_v18 }
 0x815   :  { %v1412_v41 = vadd.f32 %v1411_v39, %v1410_v40 }
 0x817   :  { %1809 = vtanh.f32 %v1412_v41 }
 0x821   :  { %v1810_v44 = vpop.eup %1809 }
 0x822   :  { %v1414_v21 = vmul.f32 %v1810_v44, %v1408_v43 }
 0x824   :  { %1638 = vmatmul.mubr.f32.vlgmr.msra.gmra.mrb[48].mxu0 %v1414_v21 }
 0x8f7   :  { %v1509_v13 = vpop.f32.mrb[48].mxu0 }
 0x8f8   :  { %v1510_v22 = vadd.f32 %v1587_v12, %v1509_v13  ;;  %v1639_v23 = vpop.f32.mrb[49].mxu0 }
 0x8fa   :  { %1513 = vst [vmem:[#allocation10] sm:$0xff] %v1510_v22 }
 0x8fb   :  { %1898 = shalt.err (!%p1895_p6)
}
 0x8fc   :  { %s1899_s17 = scalar_lea.hbm %s2549_s6, 128 }
 0x8fd   :  { %p1900_p7 = scmp.ne.s32.totalorder %s2549_s6, %s1899_s17  ;;  %p1903_p8 = scmp.lt.u32.totalorder %s1899_s17, %s2549_s6 }
 0x8ff   :  { %p1905_p9 = pnand %p1903_p8, %p1900_p7 }
 0x901   :  { %1908 = shalt.err (!%p1905_p9)
}
 0x902   :  { %1523 = dma.vmem_to_hbm [thread:$0]  %s1521_s13, 128, %s2549_s6, [#allocation7]  }
 0x903   :  { %1913 = dma.done.wait [#allocation7], 128  }
 0x904   :  { %1914 = vsyncadd [#allocation7], 4294967168 }
 0x905   :  { %1527 = vsyncpa [#allocation6], 1 }
 0x906   :  { %1528 = vsyncpa [#allocation9], 1 }
 0x907   :  { %1529 = vsyncpa [#allocation7], 1 }

</bundles_post_ra>
